<compile_context>
chip_gen: v7x
topology: tpu7x:2x2x1
jax: 0.10.0
libtpu: 0.0.40
codegen_flags: <defaults>
</compile_context>

<pallas_src>
import functools

import jax
import jax.numpy as jnp
from jax import lax
from jax.experimental import pallas as pl
from jax.experimental.pallas import tpu as pltpu

_POS = 1e30   # stand-in for +inf (identity for min-pool padding)
_NEG = -1e30  # stand-in for -inf (identity for max-pool padding)


def _round_up(x, m):
    return (x + m - 1) // m * m


def _min3(x, axis, lo_mask, hi_mask):
    # kernel=3, stride=1, pad=1 min-pool along `axis` (== -maxpool(-x) in torch):
    # out-of-range neighbors act as +inf.
    n = x.shape[axis]
    a = jnp.where(lo_mask, _POS, pltpu.roll(x, 1, axis))       # neighbor i-1
    b = jnp.where(hi_mask, _POS, pltpu.roll(x, n - 1, axis))   # neighbor i+1
    return jnp.minimum(jnp.minimum(a, x), b)


def _max3(x, axis, lo_mask, hi_mask):
    # kernel=3, stride=1, pad=1 max-pool along `axis`: out-of-range acts as -inf.
    n = x.shape[axis]
    a = jnp.where(lo_mask, _NEG, pltpu.roll(x, 1, axis))
    b = jnp.where(hi_mask, _NEG, pltpu.roll(x, n - 1, axis))
    return jnp.maximum(jnp.maximum(a, x), b)


def _cldice_kernel(logits_ref, labels_ref, out_ref, *, n_iter, h_real, w_real):
    logits = logits_ref[...].astype(jnp.float32)     # (C, Hp, Wp)
    labels = labels_ref[...]                         # (Hp, Wp) int32
    c, hp, wp = logits.shape
    cm1 = c - 1
    c2 = 2 * cm1

    # ---- masks, hoisted once per grid step --------------------------------
    hi_ = lax.broadcasted_iota(jnp.int32, (1, hp, wp), 1)
    wi_ = lax.broadcasted_iota(jnp.int32, (1, hp, wp), 2)
    full = (c2, hp, wp)
    h_lo = jnp.broadcast_to(hi_ == 0, full)            # top border (H axis)
    h_hi = jnp.broadcast_to(hi_ >= h_real - 1, full)   # bottom border + H pad
    w_lo = jnp.broadcast_to(wi_ == 0, full)            # left border (W axis)
    w_hi = jnp.broadcast_to(wi_ >= w_real - 1, full)   # right border + W pad
    valid = jnp.broadcast_to(
        ((hi_ < h_real) & (wi_ < w_real)).astype(jnp.float32), (cm1, hp, wp))

    def erode(x):
        # min over (3,1) and (1,3) directional min-pools.
        return jnp.minimum(_min3(x, 1, h_lo, h_hi), _min3(x, 2, w_lo, w_hi))

    def dilate(x):
        # separable 3x3 max-pool.
        return _max3(_max3(x, 1, h_lo, h_hi), 2, w_lo, w_hi)

    def opening(x):
        return dilate(erode(x))

    # ---- softmax over channels (channel axis is the major axis) -----------
    m = jnp.max(logits, axis=0, keepdims=True)
    e = jnp.exp(logits - m)
    probs = e / jnp.sum(e, axis=0, keepdims=True)      # (C, Hp, Wp)
    yp = probs[1:]                                     # (C-1, Hp, Wp)

    # ---- one-hot of labels, foreground channels only ------------------------
    ch = lax.broadcasted_iota(jnp.int32, (cm1, hp, wp), 0) + 1
    yt = (labels[None, :, :] == ch).astype(jnp.float32)   # (C-1, Hp, Wp)

    # ---- fused soft skeletonization of both streams -------------------------
    img = jnp.concatenate([yp, yt], axis=0)            # (2*(C-1), Hp, Wp)
    skel = jnp.maximum(img - opening(img), 0.0)

    def body(_, carry):
        img, skel = carry
        img = erode(img)
        delta = jnp.maximum(img - opening(img), 0.0)
        skel = skel + jnp.maximum(delta - skel * delta, 0.0)
        return img, skel

    _, skel = lax.fori_loop(0, n_iter, body, (img, skel), unroll=True)

    skel_pred = skel[:cm1] * valid
    skel_true = skel[cm1:] * valid

    # per-lane partial sums; final scalar combine happens in the wrapper.
    out_ref[0, :] = jnp.sum(skel_pred * yt, axis=(0, 1))
    out_ref[1, :] = jnp.sum(skel_pred, axis=(0, 1))
    out_ref[2, :] = jnp.sum(skel_true * yp, axis=(0, 1))
    out_ref[3, :] = jnp.sum(skel_true, axis=(0, 1))


def soft_cldice(y_pred, y_true, n_iter=3, smooth=1.0):
    """y_pred: (B, C, H, W) float logits; y_true: (B, H, W) int labels."""
    B, C, H, W = y_pred.shape
    assert C >= 2, "soft_cldice needs a background channel plus >=1 class"
    hp = _round_up(H, 8)
    wp = _round_up(W, 128)
    if (hp, wp) != (H, W):
        y_pred = jnp.pad(y_pred, ((0, 0), (0, 0), (0, hp - H), (0, wp - W)))
        y_true = jnp.pad(y_true, ((0, 0), (0, hp - H), (0, wp - W)))
    y_true = y_true.astype(jnp.int32)  # logits keep their dtype (bf16 ok)

    kernel = functools.partial(
        _cldice_kernel, n_iter=int(n_iter), h_real=H, w_real=W)

    partials = pl.pallas_call(
        kernel,
        out_shape=jax.ShapeDtypeStruct((B, 4, wp), jnp.float32),
        grid=(B,),
        in_specs=[
            pl.BlockSpec((None, C, hp, wp), lambda b: (b, 0, 0, 0)),
            pl.BlockSpec((None, hp, wp), lambda b: (b, 0, 0)),
        ],
        out_specs=pl.BlockSpec((None, 4, wp), lambda b: (b, 0, 0)),
        compiler_params=pltpu.CompilerParams(
            dimension_semantics=("parallel",),
            vmem_limit_bytes=48 * 1024 * 1024,
        ),
    )(y_pred, y_true)

    sums = jnp.sum(partials, axis=(0, 2))              # (4,)
    tprec = (sums[0] + smooth) / (sums[1] + smooth)
    tsens = (sums[2] + smooth) / (sums[3] + smooth)
    return 1.0 - 2.0 * (tprec * tsens) / (tprec + tsens)


if __name__ == "__main__":
    key = jax.random.PRNGKey(0)
    k1, k2 = jax.random.split(key)

    B, C, H, W = 2, 4, 16, 16
    y_pred = jax.random.normal(k1, (B, C, H, W), dtype=jnp.float32)
    y_true = jax.random.randint(k2, (B, H, W), 0, C, dtype=jnp.int32)

    loss = soft_cldice(y_pred, y_true, n_iter=3, smooth=1.0)
    jax.block_until_ready(loss)
    print("KERNEL_OK")
</pallas_src>

<mosaic_0001>
module attributes {stable_mosaic.version = 11 : i64} {
  func.func @_cldice_kernel(%arg0: i32, %arg1: memref<1x4x16x128xf32, #tpu.memory_space<vmem>>, %arg2: memref<1x16x128xi32, #tpu.memory_space<vmem>>, %arg3: memref<1x4x128xf32, #tpu.memory_space<vmem>>) attributes {dimension_semantics = [#tpu.dimension_semantics<parallel>], iteration_bounds = array<i64: 2>, scalar_prefetch = 0 : i64, scratch_operands = 0 : i64, tpu.core_type = #tpu.core_type<tc>, window_params = [{transform_indices = @transform_0, window_bounds = array<i64: 1, 4, 16, 128>}, {transform_indices = @transform_1, window_bounds = array<i64: 1, 16, 128>}, {transform_indices = @transform_2, window_bounds = array<i64: 1, 4, 128>}]} {
    %c0 = arith.constant 0 : index
    %c0_0 = arith.constant 0 : index
    %c0_1 = arith.constant 0 : index
    %c0_2 = arith.constant 0 : index
    %0 = vector.load %arg1[%c0, %c0_0, %c0_1, %c0_2] : memref<1x4x16x128xf32, #tpu.memory_space<vmem>>, vector<1x4x16x128xf32>
    %1 = vector.shape_cast %0 : vector<1x4x16x128xf32> to vector<4x16x128xf32>
    %c0_3 = arith.constant 0 : index
    %c0_4 = arith.constant 0 : index
    %c0_5 = arith.constant 0 : index
    %2 = vector.load %arg2[%c0_3, %c0_4, %c0_5] : memref<1x16x128xi32, #tpu.memory_space<vmem>>, vector<1x16x128xi32>
    %3 = vector.shape_cast %2 : vector<1x16x128xi32> to vector<16x128xi32>
    %4 = tpu.iota {dimensions = array<i32: 1>} : vector<1x16x128xi32>
    %5 = tpu.iota {dimensions = array<i32: 2>} : vector<1x16x128xi32>
    %c0_i32 = arith.constant 0 : i32
    %6 = vector.broadcast %c0_i32 : i32 to vector<1x16x128xi32>
    %7 = arith.cmpi eq, %4, %6 : vector<1x16x128xi32>
    %8 = vector.shape_cast %7 : vector<1x16x128xi1> to vector<1x16x128xi1>
    %9 = vector.broadcast %8 : vector<1x16x128xi1> to vector<6x16x128xi1>
    %c15_i32 = arith.constant 15 : i32
    %10 = vector.broadcast %c15_i32 : i32 to vector<1x16x128xi32>
    %11 = arith.cmpi sge, %4, %10 : vector<1x16x128xi32>
    %12 = vector.shape_cast %11 : vector<1x16x128xi1> to vector<1x16x128xi1>
    %13 = vector.broadcast %12 : vector<1x16x128xi1> to vector<6x16x128xi1>
    %c0_i32_6 = arith.constant 0 : i32
    %14 = vector.broadcast %c0_i32_6 : i32 to vector<1x16x128xi32>
    %15 = arith.cmpi eq, %5, %14 : vector<1x16x128xi32>
    %16 = vector.shape_cast %15 : vector<1x16x128xi1> to vector<1x16x128xi1>
    %17 = vector.broadcast %16 : vector<1x16x128xi1> to vector<6x16x128xi1>
    %c15_i32_7 = arith.constant 15 : i32
    %18 = vector.broadcast %c15_i32_7 : i32 to vector<1x16x128xi32>
    %19 = arith.cmpi sge, %5, %18 : vector<1x16x128xi32>
    %20 = vector.shape_cast %19 : vector<1x16x128xi1> to vector<1x16x128xi1>
    %21 = vector.broadcast %20 : vector<1x16x128xi1> to vector<6x16x128xi1>
    %c16_i32 = arith.constant 16 : i32
    %22 = vector.broadcast %c16_i32 : i32 to vector<1x16x128xi32>
    %23 = arith.cmpi slt, %4, %22 : vector<1x16x128xi32>
    %c16_i32_8 = arith.constant 16 : i32
    %24 = vector.broadcast %c16_i32_8 : i32 to vector<1x16x128xi32>
    %25 = arith.cmpi slt, %5, %24 : vector<1x16x128xi32>
    %26 = arith.andi %23, %25 : vector<1x16x128xi1>
    %27 = arith.extui %26 : vector<1x16x128xi1> to vector<1x16x128xi32>
    %28 = arith.sitofp %27 : vector<1x16x128xi32> to vector<1x16x128xf32>
    %29 = vector.shape_cast %28 : vector<1x16x128xf32> to vector<1x16x128xf32>
    %30 = vector.broadcast %29 : vector<1x16x128xf32> to vector<3x16x128xf32>
    %cst = arith.constant dense<0xFF800000> : vector<16x128xf32>
    %31 = vector.multi_reduction <maximumf>, %1, %cst [0] : vector<4x16x128xf32> to vector<16x128xf32>
    %32 = vector.shape_cast %31 : vector<16x128xf32> to vector<1x16x128xf32>
    %33 = vector.broadcast %32 : vector<1x16x128xf32> to vector<4x16x128xf32>
    %34 = arith.subf %1, %33 : vector<4x16x128xf32>
    %35 = math.exp %34 : vector<4x16x128xf32>
    %cst_9 = arith.constant dense<0.000000e+00> : vector<16x128xf32>
    %36 = vector.multi_reduction <add>, %35, %cst_9 [0] : vector<4x16x128xf32> to vector<16x128xf32>
    %37 = vector.shape_cast %36 : vector<16x128xf32> to vector<1x16x128xf32>
    %38 = vector.broadcast %37 : vector<1x16x128xf32> to vector<4x16x128xf32>
    %39 = arith.divf %35, %38 : vector<4x16x128xf32>
    %40 = vector.extract_strided_slice %39 {offsets = [1, 0, 0], sizes = [3, 16, 128], strides = [1, 1, 1]} : vector<4x16x128xf32> to vector<3x16x128xf32>
    %41 = tpu.iota {dimensions = array<i32: 0>} : vector<3x16x128xi32>
    %c1_i32 = arith.constant 1 : i32
    %42 = vector.broadcast %c1_i32 : i32 to vector<3x16x128xi32>
    %43 = arith.addi %41, %42 : vector<3x16x128xi32>
    %44 = vector.shape_cast %3 : vector<16x128xi32> to vector<1x16x128xi32>
    %45 = vector.broadcast %44 : vector<1x16x128xi32> to vector<3x16x128xi32>
    %46 = arith.cmpi eq, %45, %43 : vector<3x16x128xi32>
    %47 = arith.extui %46 : vector<3x16x128xi1> to vector<3x16x128xi32>
    %48 = arith.sitofp %47 : vector<3x16x128xi32> to vector<3x16x128xf32>
    %49 = tpu.concatenate %40, %48 in 0 : vector<3x16x128xf32>, vector<3x16x128xf32> -> vector<6x16x128xf32>
    %c1_i32_10 = arith.constant 1 : i32
    %50 = tpu.dynamic_rotate %49 by %c1_i32_10 dim 1 : vector<6x16x128xf32>, i32 -> vector<6x16x128xf32>
    %cst_11 = arith.constant 1.000000e+30 : f32
    %51 = vector.broadcast %cst_11 : f32 to vector<6x16x128xf32>
    %52 = arith.select %9, %51, %50 : vector<6x16x128xi1>, vector<6x16x128xf32>
    %c15_i32_12 = arith.constant 15 : i32
    %53 = tpu.dynamic_rotate %49 by %c15_i32_12 dim 1 : vector<6x16x128xf32>, i32 -> vector<6x16x128xf32>
    %cst_13 = arith.constant 1.000000e+30 : f32
    %54 = vector.broadcast %cst_13 : f32 to vector<6x16x128xf32>
    %55 = arith.select %13, %54, %53 : vector<6x16x128xi1>, vector<6x16x128xf32>
    %56 = arith.minimumf %52, %49 : vector<6x16x128xf32>
    %57 = arith.minimumf %56, %55 : vector<6x16x128xf32>
    %c1_i32_14 = arith.constant 1 : i32
    %58 = tpu.dynamic_rotate %49 by %c1_i32_14 dim 2 : vector<6x16x128xf32>, i32 -> vector<6x16x128xf32>
    %cst_15 = arith.constant 1.000000e+30 : f32
    %59 = vector.broadcast %cst_15 : f32 to vector<6x16x128xf32>
    %60 = arith.select %17, %59, %58 : vector<6x16x128xi1>, vector<6x16x128xf32>
    %c127_i32 = arith.constant 127 : i32
    %61 = tpu.dynamic_rotate %49 by %c127_i32 dim 2 : vector<6x16x128xf32>, i32 -> vector<6x16x128xf32>
    %cst_16 = arith.constant 1.000000e+30 : f32
    %62 = vector.broadcast %cst_16 : f32 to vector<6x16x128xf32>
    %63 = arith.select %21, %62, %61 : vector<6x16x128xi1>, vector<6x16x128xf32>
    %64 = arith.minimumf %60, %49 : vector<6x16x128xf32>
    %65 = arith.minimumf %64, %63 : vector<6x16x128xf32>
    %66 = arith.minimumf %57, %65 : vector<6x16x128xf32>
    %c1_i32_17 = arith.constant 1 : i32
    %67 = tpu.dynamic_rotate %66 by %c1_i32_17 dim 1 : vector<6x16x128xf32>, i32 -> vector<6x16x128xf32>
    %cst_18 = arith.constant -1.000000e+30 : f32
    %68 = vector.broadcast %cst_18 : f32 to vector<6x16x128xf32>
    %69 = arith.select %9, %68, %67 : vector<6x16x128xi1>, vector<6x16x128xf32>
    %c15_i32_19 = arith.constant 15 : i32
    %70 = tpu.dynamic_rotate %66 by %c15_i32_19 dim 1 : vector<6x16x128xf32>, i32 -> vector<6x16x128xf32>
    %cst_20 = arith.constant -1.000000e+30 : f32
    %71 = vector.broadcast %cst_20 : f32 to vector<6x16x128xf32>
    %72 = arith.select %13, %71, %70 : vector<6x16x128xi1>, vector<6x16x128xf32>
    %73 = arith.maximumf %69, %66 : vector<6x16x128xf32>
    %74 = arith.maximumf %73, %72 : vector<6x16x128xf32>
    %c1_i32_21 = arith.constant 1 : i32
    %75 = tpu.dynamic_rotate %74 by %c1_i32_21 dim 2 : vector<6x16x128xf32>, i32 -> vector<6x16x128xf32>
    %cst_22 = arith.constant -1.000000e+30 : f32
    %76 = vector.broadcast %cst_22 : f32 to vector<6x16x128xf32>
    %77 = arith.select %17, %76, %75 : vector<6x16x128xi1>, vector<6x16x128xf32>
    %c127_i32_23 = arith.constant 127 : i32
    %78 = tpu.dynamic_rotate %74 by %c127_i32_23 dim 2 : vector<6x16x128xf32>, i32 -> vector<6x16x128xf32>
    %cst_24 = arith.constant -1.000000e+30 : f32
    %79 = vector.broadcast %cst_24 : f32 to vector<6x16x128xf32>
    %80 = arith.select %21, %79, %78 : vector<6x16x128xi1>, vector<6x16x128xf32>
    %81 = arith.maximumf %77, %74 : vector<6x16x128xf32>
    %82 = arith.maximumf %81, %80 : vector<6x16x128xf32>
    %83 = arith.subf %49, %82 : vector<6x16x128xf32>
    %cst_25 = arith.constant 0.000000e+00 : f32
    %84 = vector.broadcast %cst_25 : f32 to vector<6x16x128xf32>
    %85 = arith.maximumf %83, %84 : vector<6x16x128xf32>
    %c0_i32_26 = arith.constant 0 : i32
    %c1_i32_27 = arith.constant 1 : i32
    %86 = tpu.dynamic_rotate %49 by %c1_i32_27 dim 1 : vector<6x16x128xf32>, i32 -> vector<6x16x128xf32>
    %cst_28 = arith.constant 1.000000e+30 : f32
    %87 = vector.broadcast %cst_28 : f32 to vector<6x16x128xf32>
    %88 = arith.select %9, %87, %86 : vector<6x16x128xi1>, vector<6x16x128xf32>
    %c15_i32_29 = arith.constant 15 : i32
    %89 = tpu.dynamic_rotate %49 by %c15_i32_29 dim 1 : vector<6x16x128xf32>, i32 -> vector<6x16x128xf32>
    %cst_30 = arith.constant 1.000000e+30 : f32
    %90 = vector.broadcast %cst_30 : f32 to vector<6x16x128xf32>
    %91 = arith.select %13, %90, %89 : vector<6x16x128xi1>, vector<6x16x128xf32>
    %92 = arith.minimumf %88, %49 : vector<6x16x128xf32>
    %93 = arith.minimumf %92, %91 : vector<6x16x128xf32>
    %c1_i32_31 = arith.constant 1 : i32
    %94 = tpu.dynamic_rotate %49 by %c1_i32_31 dim 2 : vector<6x16x128xf32>, i32 -> vector<6x16x128xf32>
    %cst_32 = arith.constant 1.000000e+30 : f32
    %95 = vector.broadcast %cst_32 : f32 to vector<6x16x128xf32>
    %96 = arith.select %17, %95, %94 : vector<6x16x128xi1>, vector<6x16x128xf32>
    %c127_i32_33 = arith.constant 127 : i32
    %97 = tpu.dynamic_rotate %49 by %c127_i32_33 dim 2 : vector<6x16x128xf32>, i32 -> vector<6x16x128xf32>
    %cst_34 = arith.constant 1.000000e+30 : f32
    %98 = vector.broadcast %cst_34 : f32 to vector<6x16x128xf32>
    %99 = arith.select %21, %98, %97 : vector<6x16x128xi1>, vector<6x16x128xf32>
    %100 = arith.minimumf %96, %49 : vector<6x16x128xf32>
    %101 = arith.minimumf %100, %99 : vector<6x16x128xf32>
    %102 = arith.minimumf %93, %101 : vector<6x16x128xf32>
    %c1_i32_35 = arith.constant 1 : i32
    %103 = tpu.dynamic_rotate %102 by %c1_i32_35 dim 1 : vector<6x16x128xf32>, i32 -> vector<6x16x128xf32>
    %cst_36 = arith.constant 1.000000e+30 : f32
    %104 = vector.broadcast %cst_36 : f32 to vector<6x16x128xf32>
    %105 = arith.select %9, %104, %103 : vector<6x16x128xi1>, vector<6x16x128xf32>
    %c15_i32_37 = arith.constant 15 : i32
    %106 = tpu.dynamic_rotate %102 by %c15_i32_37 dim 1 : vector<6x16x128xf32>, i32 -> vector<6x16x128xf32>
    %cst_38 = arith.constant 1.000000e+30 : f32
    %107 = vector.broadcast %cst_38 : f32 to vector<6x16x128xf32>
    %108 = arith.select %13, %107, %106 : vector<6x16x128xi1>, vector<6x16x128xf32>
    %109 = arith.minimumf %105, %102 : vector<6x16x128xf32>
    %110 = arith.minimumf %109, %108 : vector<6x16x128xf32>
    %c1_i32_39 = arith.constant 1 : i32
    %111 = tpu.dynamic_rotate %102 by %c1_i32_39 dim 2 : vector<6x16x128xf32>, i32 -> vector<6x16x128xf32>
    %cst_40 = arith.constant 1.000000e+30 : f32
    %112 = vector.broadcast %cst_40 : f32 to vector<6x16x128xf32>
    %113 = arith.select %17, %112, %111 : vector<6x16x128xi1>, vector<6x16x128xf32>
    %c127_i32_41 = arith.constant 127 : i32
    %114 = tpu.dynamic_rotate %102 by %c127_i32_41 dim 2 : vector<6x16x128xf32>, i32 -> vector<6x16x128xf32>
    %cst_42 = arith.constant 1.000000e+30 : f32
    %115 = vector.broadcast %cst_42 : f32 to vector<6x16x128xf32>
    %116 = arith.select %21, %115, %114 : vector<6x16x128xi1>, vector<6x16x128xf32>
    %117 = arith.minimumf %113, %102 : vector<6x16x128xf32>
    %118 = arith.minimumf %117, %116 : vector<6x16x128xf32>
    %119 = arith.minimumf %110, %118 : vector<6x16x128xf32>
    %c1_i32_43 = arith.constant 1 : i32
    %120 = tpu.dynamic_rotate %119 by %c1_i32_43 dim 1 : vector<6x16x128xf32>, i32 -> vector<6x16x128xf32>
    %cst_44 = arith.constant -1.000000e+30 : f32
    %121 = vector.broadcast %cst_44 : f32 to vector<6x16x128xf32>
    %122 = arith.select %9, %121, %120 : vector<6x16x128xi1>, vector<6x16x128xf32>
    %c15_i32_45 = arith.constant 15 : i32
    %123 = tpu.dynamic_rotate %119 by %c15_i32_45 dim 1 : vector<6x16x128xf32>, i32 -> vector<6x16x128xf32>
    %cst_46 = arith.constant -1.000000e+30 : f32
    %124 = vector.broadcast %cst_46 : f32 to vector<6x16x128xf32>
    %125 = arith.select %13, %124, %123 : vector<6x16x128xi1>, vector<6x16x128xf32>
    %126 = arith.maximumf %122, %119 : vector<6x16x128xf32>
    %127 = arith.maximumf %126, %125 : vector<6x16x128xf32>
    %c1_i32_47 = arith.constant 1 : i32
    %128 = tpu.dynamic_rotate %127 by %c1_i32_47 dim 2 : vector<6x16x128xf32>, i32 -> vector<6x16x128xf32>
    %cst_48 = arith.constant -1.000000e+30 : f32
    %129 = vector.broadcast %cst_48 : f32 to vector<6x16x128xf32>
    %130 = arith.select %17, %129, %128 : vector<6x16x128xi1>, vector<6x16x128xf32>
    %c127_i32_49 = arith.constant 127 : i32
    %131 = tpu.dynamic_rotate %127 by %c127_i32_49 dim 2 : vector<6x16x128xf32>, i32 -> vector<6x16x128xf32>
    %cst_50 = arith.constant -1.000000e+30 : f32
    %132 = vector.broadcast %cst_50 : f32 to vector<6x16x128xf32>
    %133 = arith.select %21, %132, %131 : vector<6x16x128xi1>, vector<6x16x128xf32>
    %134 = arith.maximumf %130, %127 : vector<6x16x128xf32>
    %135 = arith.maximumf %134, %133 : vector<6x16x128xf32>
    %136 = arith.subf %102, %135 : vector<6x16x128xf32>
    %cst_51 = arith.constant 0.000000e+00 : f32
    %137 = vector.broadcast %cst_51 : f32 to vector<6x16x128xf32>
    %138 = arith.maximumf %136, %137 : vector<6x16x128xf32>
    %139 = arith.mulf %85, %138 : vector<6x16x128xf32>
    %140 = arith.subf %138, %139 : vector<6x16x128xf32>
    %cst_52 = arith.constant 0.000000e+00 : f32
    %141 = vector.broadcast %cst_52 : f32 to vector<6x16x128xf32>
    %142 = arith.maximumf %140, %141 : vector<6x16x128xf32>
    %143 = arith.addf %85, %142 : vector<6x16x128xf32>
    %c1_i32_53 = arith.constant 1 : i32
    %c1_i32_54 = arith.constant 1 : i32
    %144 = tpu.dynamic_rotate %102 by %c1_i32_54 dim 1 : vector<6x16x128xf32>, i32 -> vector<6x16x128xf32>
    %cst_55 = arith.constant 1.000000e+30 : f32
    %145 = vector.broadcast %cst_55 : f32 to vector<6x16x128xf32>
    %146 = arith.select %9, %145, %144 : vector<6x16x128xi1>, vector<6x16x128xf32>
    %c15_i32_56 = arith.constant 15 : i32
    %147 = tpu.dynamic_rotate %102 by %c15_i32_56 dim 1 : vector<6x16x128xf32>, i32 -> vector<6x16x128xf32>
    %cst_57 = arith.constant 1.000000e+30 : f32
    %148 = vector.broadcast %cst_57 : f32 to vector<6x16x128xf32>
    %149 = arith.select %13, %148, %147 : vector<6x16x128xi1>, vector<6x16x128xf32>
    %150 = arith.minimumf %146, %102 : vector<6x16x128xf32>
    %151 = arith.minimumf %150, %149 : vector<6x16x128xf32>
    %c1_i32_58 = arith.constant 1 : i32
    %152 = tpu.dynamic_rotate %102 by %c1_i32_58 dim 2 : vector<6x16x128xf32>, i32 -> vector<6x16x128xf32>
    %cst_59 = arith.constant 1.000000e+30 : f32
    %153 = vector.broadcast %cst_59 : f32 to vector<6x16x128xf32>
    %154 = arith.select %17, %153, %152 : vector<6x16x128xi1>, vector<6x16x128xf32>
    %c127_i32_60 = arith.constant 127 : i32
    %155 = tpu.dynamic_rotate %102 by %c127_i32_60 dim 2 : vector<6x16x128xf32>, i32 -> vector<6x16x128xf32>
    %cst_61 = arith.constant 1.000000e+30 : f32
    %156 = vector.broadcast %cst_61 : f32 to vector<6x16x128xf32>
    %157 = arith.select %21, %156, %155 : vector<6x16x128xi1>, vector<6x16x128xf32>
    %158 = arith.minimumf %154, %102 : vector<6x16x128xf32>
    %159 = arith.minimumf %158, %157 : vector<6x16x128xf32>
    %160 = arith.minimumf %151, %159 : vector<6x16x128xf32>
    %c1_i32_62 = arith.constant 1 : i32
    %161 = tpu.dynamic_rotate %160 by %c1_i32_62 dim 1 : vector<6x16x128xf32>, i32 -> vector<6x16x128xf32>
    %cst_63 = arith.constant 1.000000e+30 : f32
    %162 = vector.broadcast %cst_63 : f32 to vector<6x16x128xf32>
    %163 = arith.select %9, %162, %161 : vector<6x16x128xi1>, vector<6x16x128xf32>
    %c15_i32_64 = arith.constant 15 : i32
    %164 = tpu.dynamic_rotate %160 by %c15_i32_64 dim 1 : vector<6x16x128xf32>, i32 -> vector<6x16x128xf32>
    %cst_65 = arith.constant 1.000000e+30 : f32
    %165 = vector.broadcast %cst_65 : f32 to vector<6x16x128xf32>
    %166 = arith.select %13, %165, %164 : vector<6x16x128xi1>, vector<6x16x128xf32>
    %167 = arith.minimumf %163, %160 : vector<6x16x128xf32>
    %168 = arith.minimumf %167, %166 : vector<6x16x128xf32>
    %c1_i32_66 = arith.constant 1 : i32
    %169 = tpu.dynamic_rotate %160 by %c1_i32_66 dim 2 : vector<6x16x128xf32>, i32 -> vector<6x16x128xf32>
    %cst_67 = arith.constant 1.000000e+30 : f32
    %170 = vector.broadcast %cst_67 : f32 to vector<6x16x128xf32>
    %171 = arith.select %17, %170, %169 : vector<6x16x128xi1>, vector<6x16x128xf32>
    %c127_i32_68 = arith.constant 127 : i32
    %172 = tpu.dynamic_rotate %160 by %c127_i32_68 dim 2 : vector<6x16x128xf32>, i32 -> vector<6x16x128xf32>
    %cst_69 = arith.constant 1.000000e+30 : f32
    %173 = vector.broadcast %cst_69 : f32 to vector<6x16x128xf32>
    %174 = arith.select %21, %173, %172 : vector<6x16x128xi1>, vector<6x16x128xf32>
    %175 = arith.minimumf %171, %160 : vector<6x16x128xf32>
    %176 = arith.minimumf %175, %174 : vector<6x16x128xf32>
    %177 = arith.minimumf %168, %176 : vector<6x16x128xf32>
    %c1_i32_70 = arith.constant 1 : i32
    %178 = tpu.dynamic_rotate %177 by %c1_i32_70 dim 1 : vector<6x16x128xf32>, i32 -> vector<6x16x128xf32>
    %cst_71 = arith.constant -1.000000e+30 : f32
    %179 = vector.broadcast %cst_71 : f32 to vector<6x16x128xf32>
    %180 = arith.select %9, %179, %178 : vector<6x16x128xi1>, vector<6x16x128xf32>
    %c15_i32_72 = arith.constant 15 : i32
    %181 = tpu.dynamic_rotate %177 by %c15_i32_72 dim 1 : vector<6x16x128xf32>, i32 -> vector<6x16x128xf32>
    %cst_73 = arith.constant -1.000000e+30 : f32
    %182 = vector.broadcast %cst_73 : f32 to vector<6x16x128xf32>
    %183 = arith.select %13, %182, %181 : vector<6x16x128xi1>, vector<6x16x128xf32>
    %184 = arith.maximumf %180, %177 : vector<6x16x128xf32>
    %185 = arith.maximumf %184, %183 : vector<6x16x128xf32>
    %c1_i32_74 = arith.constant 1 : i32
    %186 = tpu.dynamic_rotate %185 by %c1_i32_74 dim 2 : vector<6x16x128xf32>, i32 -> vector<6x16x128xf32>
    %cst_75 = arith.constant -1.000000e+30 : f32
    %187 = vector.broadcast %cst_75 : f32 to vector<6x16x128xf32>
    %188 = arith.select %17, %187, %186 : vector<6x16x128xi1>, vector<6x16x128xf32>
    %c127_i32_76 = arith.constant 127 : i32
    %189 = tpu.dynamic_rotate %185 by %c127_i32_76 dim 2 : vector<6x16x128xf32>, i32 -> vector<6x16x128xf32>
    %cst_77 = arith.constant -1.000000e+30 : f32
    %190 = vector.broadcast %cst_77 : f32 to vector<6x16x128xf32>
    %191 = arith.select %21, %190, %189 : vector<6x16x128xi1>, vector<6x16x128xf32>
    %192 = arith.maximumf %188, %185 : vector<6x16x128xf32>
    %193 = arith.maximumf %192, %191 : vector<6x16x128xf32>
    %194 = arith.subf %160, %193 : vector<6x16x128xf32>
    %cst_78 = arith.constant 0.000000e+00 : f32
    %195 = vector.broadcast %cst_78 : f32 to vector<6x16x128xf32>
    %196 = arith.maximumf %194, %195 : vector<6x16x128xf32>
    %197 = arith.mulf %143, %196 : vector<6x16x128xf32>
    %198 = arith.subf %196, %197 : vector<6x16x128xf32>
    %cst_79 = arith.constant 0.000000e+00 : f32
    %199 = vector.broadcast %cst_79 : f32 to vector<6x16x128xf32>
    %200 = arith.maximumf %198, %199 : vector<6x16x128xf32>
    %201 = arith.addf %143, %200 : vector<6x16x128xf32>
    %c2_i32 = arith.constant 2 : i32
    %c1_i32_80 = arith.constant 1 : i32
    %202 = tpu.dynamic_rotate %160 by %c1_i32_80 dim 1 : vector<6x16x128xf32>, i32 -> vector<6x16x128xf32>
    %cst_81 = arith.constant 1.000000e+30 : f32
    %203 = vector.broadcast %cst_81 : f32 to vector<6x16x128xf32>
    %204 = arith.select %9, %203, %202 : vector<6x16x128xi1>, vector<6x16x128xf32>
    %c15_i32_82 = arith.constant 15 : i32
    %205 = tpu.dynamic_rotate %160 by %c15_i32_82 dim 1 : vector<6x16x128xf32>, i32 -> vector<6x16x128xf32>
    %cst_83 = arith.constant 1.000000e+30 : f32
    %206 = vector.broadcast %cst_83 : f32 to vector<6x16x128xf32>
    %207 = arith.select %13, %206, %205 : vector<6x16x128xi1>, vector<6x16x128xf32>
    %208 = arith.minimumf %204, %160 : vector<6x16x128xf32>
    %209 = arith.minimumf %208, %207 : vector<6x16x128xf32>
    %c1_i32_84 = arith.constant 1 : i32
    %210 = tpu.dynamic_rotate %160 by %c1_i32_84 dim 2 : vector<6x16x128xf32>, i32 -> vector<6x16x128xf32>
    %cst_85 = arith.constant 1.000000e+30 : f32
    %211 = vector.broadcast %cst_85 : f32 to vector<6x16x128xf32>
    %212 = arith.select %17, %211, %210 : vector<6x16x128xi1>, vector<6x16x128xf32>
    %c127_i32_86 = arith.constant 127 : i32
    %213 = tpu.dynamic_rotate %160 by %c127_i32_86 dim 2 : vector<6x16x128xf32>, i32 -> vector<6x16x128xf32>
    %cst_87 = arith.constant 1.000000e+30 : f32
    %214 = vector.broadcast %cst_87 : f32 to vector<6x16x128xf32>
    %215 = arith.select %21, %214, %213 : vector<6x16x128xi1>, vector<6x16x128xf32>
    %216 = arith.minimumf %212, %160 : vector<6x16x128xf32>
    %217 = arith.minimumf %216, %215 : vector<6x16x128xf32>
    %218 = arith.minimumf %209, %217 : vector<6x16x128xf32>
    %c1_i32_88 = arith.constant 1 : i32
    %219 = tpu.dynamic_rotate %218 by %c1_i32_88 dim 1 : vector<6x16x128xf32>, i32 -> vector<6x16x128xf32>
    %cst_89 = arith.constant 1.000000e+30 : f32
    %220 = vector.broadcast %cst_89 : f32 to vector<6x16x128xf32>
    %221 = arith.select %9, %220, %219 : vector<6x16x128xi1>, vector<6x16x128xf32>
    %c15_i32_90 = arith.constant 15 : i32
    %222 = tpu.dynamic_rotate %218 by %c15_i32_90 dim 1 : vector<6x16x128xf32>, i32 -> vector<6x16x128xf32>
    %cst_91 = arith.constant 1.000000e+30 : f32
    %223 = vector.broadcast %cst_91 : f32 to vector<6x16x128xf32>
    %224 = arith.select %13, %223, %222 : vector<6x16x128xi1>, vector<6x16x128xf32>
    %225 = arith.minimumf %221, %218 : vector<6x16x128xf32>
    %226 = arith.minimumf %225, %224 : vector<6x16x128xf32>
    %c1_i32_92 = arith.constant 1 : i32
    %227 = tpu.dynamic_rotate %218 by %c1_i32_92 dim 2 : vector<6x16x128xf32>, i32 -> vector<6x16x128xf32>
    %cst_93 = arith.constant 1.000000e+30 : f32
    %228 = vector.broadcast %cst_93 : f32 to vector<6x16x128xf32>
    %229 = arith.select %17, %228, %227 : vector<6x16x128xi1>, vector<6x16x128xf32>
    %c127_i32_94 = arith.constant 127 : i32
    %230 = tpu.dynamic_rotate %218 by %c127_i32_94 dim 2 : vector<6x16x128xf32>, i32 -> vector<6x16x128xf32>
    %cst_95 = arith.constant 1.000000e+30 : f32
    %231 = vector.broadcast %cst_95 : f32 to vector<6x16x128xf32>
    %232 = arith.select %21, %231, %230 : vector<6x16x128xi1>, vector<6x16x128xf32>
    %233 = arith.minimumf %229, %218 : vector<6x16x128xf32>
    %234 = arith.minimumf %233, %232 : vector<6x16x128xf32>
    %235 = arith.minimumf %226, %234 : vector<6x16x128xf32>
    %c1_i32_96 = arith.constant 1 : i32
    %236 = tpu.dynamic_rotate %235 by %c1_i32_96 dim 1 : vector<6x16x128xf32>, i32 -> vector<6x16x128xf32>
    %cst_97 = arith.constant -1.000000e+30 : f32
    %237 = vector.broadcast %cst_97 : f32 to vector<6x16x128xf32>
    %238 = arith.select %9, %237, %236 : vector<6x16x128xi1>, vector<6x16x128xf32>
    %c15_i32_98 = arith.constant 15 : i32
    %239 = tpu.dynamic_rotate %235 by %c15_i32_98 dim 1 : vector<6x16x128xf32>, i32 -> vector<6x16x128xf32>
    %cst_99 = arith.constant -1.000000e+30 : f32
    %240 = vector.broadcast %cst_99 : f32 to vector<6x16x128xf32>
    %241 = arith.select %13, %240, %239 : vector<6x16x128xi1>, vector<6x16x128xf32>
    %242 = arith.maximumf %238, %235 : vector<6x16x128xf32>
    %243 = arith.maximumf %242, %241 : vector<6x16x128xf32>
    %c1_i32_100 = arith.constant 1 : i32
    %244 = tpu.dynamic_rotate %243 by %c1_i32_100 dim 2 : vector<6x16x128xf32>, i32 -> vector<6x16x128xf32>
    %cst_101 = arith.constant -1.000000e+30 : f32
    %245 = vector.broadcast %cst_101 : f32 to vector<6x16x128xf32>
    %246 = arith.select %17, %245, %244 : vector<6x16x128xi1>, vector<6x16x128xf32>
    %c127_i32_102 = arith.constant 127 : i32
    %247 = tpu.dynamic_rotate %243 by %c127_i32_102 dim 2 : vector<6x16x128xf32>, i32 -> vector<6x16x128xf32>
    %cst_103 = arith.constant -1.000000e+30 : f32
    %248 = vector.broadcast %cst_103 : f32 to vector<6x16x128xf32>
    %249 = arith.select %21, %248, %247 : vector<6x16x128xi1>, vector<6x16x128xf32>
    %250 = arith.maximumf %246, %243 : vector<6x16x128xf32>
    %251 = arith.maximumf %250, %249 : vector<6x16x128xf32>
    %252 = arith.subf %218, %251 : vector<6x16x128xf32>
    %cst_104 = arith.constant 0.000000e+00 : f32
    %253 = vector.broadcast %cst_104 : f32 to vector<6x16x128xf32>
    %254 = arith.maximumf %252, %253 : vector<6x16x128xf32>
    %255 = arith.mulf %201, %254 : vector<6x16x128xf32>
    %256 = arith.subf %254, %255 : vector<6x16x128xf32>
    %cst_105 = arith.constant 0.000000e+00 : f32
    %257 = vector.broadcast %cst_105 : f32 to vector<6x16x128xf32>
    %258 = arith.maximumf %256, %257 : vector<6x16x128xf32>
    %259 = arith.addf %201, %258 : vector<6x16x128xf32>
    %260 = vector.extract_strided_slice %259 {offsets = [0, 0, 0], sizes = [3, 16, 128], strides = [1, 1, 1]} : vector<6x16x128xf32> to vector<3x16x128xf32>
    %261 = arith.mulf %260, %30 : vector<3x16x128xf32>
    %262 = vector.extract_strided_slice %259 {offsets = [3, 0, 0], sizes = [3, 16, 128], strides = [1, 1, 1]} : vector<6x16x128xf32> to vector<3x16x128xf32>
    %263 = arith.mulf %262, %30 : vector<3x16x128xf32>
    %264 = arith.mulf %261, %48 : vector<3x16x128xf32>
    %cst_106 = arith.constant dense<0.000000e+00> : vector<128xf32>
    %265 = vector.multi_reduction <add>, %264, %cst_106 [0, 1] : vector<3x16x128xf32> to vector<128xf32>
    %c0_107 = arith.constant 0 : index
    %c0_108 = arith.constant 0 : index
    %c0_109 = arith.constant 0 : index
    %266 = vector.load %arg3[%c0_107, %c0_108, %c0_109] : memref<1x4x128xf32, #tpu.memory_space<vmem>>, vector<1x1x128xf32>
    %267 = vector.shape_cast %266 : vector<1x1x128xf32> to vector<128xf32>
    %268 = vector.shape_cast %265 : vector<128xf32> to vector<1x1x128xf32>
    tpu.vector_store %arg3[%c0_107, %c0_108, %c0_109], %268 {strides = array<i32>} : memref<1x4x128xf32, #tpu.memory_space<vmem>>, vector<1x1x128xf32>,
    %cst_110 = arith.constant dense<0.000000e+00> : vector<128xf32>
    %269 = vector.multi_reduction <add>, %261, %cst_110 [0, 1] : vector<3x16x128xf32> to vector<128xf32>
    %c0_111 = arith.constant 0 : index
    %c1 = arith.constant 1 : index
    %c0_112 = arith.constant 0 : index
    %270 = vector.load %arg3[%c0_111, %c1, %c0_112] : memref<1x4x128xf32, #tpu.memory_space<vmem>>, vector<1x1x128xf32>
    %271 = vector.shape_cast %270 : vector<1x1x128xf32> to vector<128xf32>
    %272 = vector.shape_cast %269 : vector<128xf32> to vector<1x1x128xf32>
    tpu.vector_store %arg3[%c0_111, %c1, %c0_112], %272 {strides = array<i32>} : memref<1x4x128xf32, #tpu.memory_space<vmem>>, vector<1x1x128xf32>,
    %273 = arith.mulf %263, %40 : vector<3x16x128xf32>
    %cst_113 = arith.constant dense<0.000000e+00> : vector<128xf32>
    %274 = vector.multi_reduction <add>, %273, %cst_113 [0, 1] : vector<3x16x128xf32> to vector<128xf32>
    %c0_114 = arith.constant 0 : index
    %c2 = arith.constant 2 : index
    %c0_115 = arith.constant 0 : index
    %275 = vector.load %arg3[%c0_114, %c2, %c0_115] : memref<1x4x128xf32, #tpu.memory_space<vmem>>, vector<1x1x128xf32>
    %276 = vector.shape_cast %275 : vector<1x1x128xf32> to vector<128xf32>
    %277 = vector.shape_cast %274 : vector<128xf32> to vector<1x1x128xf32>
    tpu.vector_store %arg3[%c0_114, %c2, %c0_115], %277 {strides = array<i32>} : memref<1x4x128xf32, #tpu.memory_space<vmem>>, vector<1x1x128xf32>,
    %cst_116 = arith.constant dense<0.000000e+00> : vector<128xf32>
    %278 = vector.multi_reduction <add>, %263, %cst_116 [0, 1] : vector<3x16x128xf32> to vector<128xf32>
    %c0_117 = arith.constant 0 : index
    %c3 = arith.constant 3 : index
    %c0_118 = arith.constant 0 : index
    %279 = vector.load %arg3[%c0_117, %c3, %c0_118] : memref<1x4x128xf32, #tpu.memory_space<vmem>>, vector<1x1x128xf32>
    %280 = vector.shape_cast %279 : vector<1x1x128xf32> to vector<128xf32>
    %281 = vector.shape_cast %278 : vector<128xf32> to vector<1x1x128xf32>
    tpu.vector_store %arg3[%c0_117, %c3, %c0_118], %281 {strides = array<i32>} : memref<1x4x128xf32, #tpu.memory_space<vmem>>, vector<1x1x128xf32>,
    return
  }
  func.func @transform_0(%arg0: i32) -> (i32, i32, i32, i32) {
    %c0_i32 = arith.constant 0 : i32
    %c0_i32_0 = arith.constant 0 : i32
    %c0_i32_1 = arith.constant 0 : i32
    %c0_i32_2 = arith.constant 0 : i32
    return %arg0, %c0_i32, %c0_i32_0, %c0_i32_1 : i32, i32, i32, i32
  }
  func.func @transform_1(%arg0: i32) -> (i32, i32, i32) {
    %c0_i32 = arith.constant 0 : i32
    %c0_i32_0 = arith.constant 0 : i32
    %c0_i32_1 = arith.constant 0 : i32
    return %arg0, %c0_i32, %c0_i32_0 : i32, i32, i32
  }
  func.func @transform_2(%arg0: i32) -> (i32, i32, i32) {
    %c0_i32 = arith.constant 0 : i32
    %c0_i32_0 = arith.constant 0 : i32
    %c0_i32_1 = arith.constant 0 : i32
    return %arg0, %c0_i32, %c0_i32_0 : i32, i32, i32
  }
}

</mosaic_0001>

<bundles_post_ra>
// kernel: tpu_custom_call.1
= control target key start
LH: loop header
LB: loop body
LE: loop exit
PB: predicated region body
PF: predicated region fallthrough
CT: control target
= control target key end

     0   :  { %7 = vsyncpa [#allocation3], 0  ;;  %s4841_s0 = inlined_call_operand.hbm [shape: f32[2,4,16,128], index: 0, kind: input, shape index: {}]   ;;  %s4842_s1 = inlined_call_operand.hbm [shape: s32[2,16,128], index: 1, kind: input, shape index: {}]   ;;  %s4843_s2 = inlined_call_operand.hbm [shape: f32[2,4,128], index: 2, kind: output, shape index: {}]  }
   0x1   :  { %9 = vsyncpa [#allocation3 + $0x1], 0 }
   0x2   :  { %10 = vsyncpa [#allocation6], 0 }
   0x3   :  { %12 = vsyncpa [#allocation6 + $0x1], 0 }
   0x4   :  { %13 = vsyncpa [#allocation4], 0 }
   0x5   :  { %15 = vsyncpa [#allocation4 + $0x1], 0  ;;  %s2455_s9 = smov 0   ;;  %s2457_s10 = smov 0  }
   0x6   :  { %s2459_s11 = smov 0   ;;  %s2461_s12 = smov 0  }
   0x7 LB: > { %s2476_s13 = sadd.s32 4294967295, %s2430_s12   ;;  %s2167_s14 = sadd.s32 4294967294, %s2430_s12   ;;  %s2430_s12 = sphi %s2461_s12, %s5162_s12   ;;  %s2426_s11 = sphi %s2459_s11, %s5161_s11   ;;  %s2422_s10 = sphi %s2457_s10, %s5160_s10   ;;  %s2418_s9 = sphi %s2455_s9, %s5159_s9  }
   0x8   : > { %s2480_s15 = sadd.s32 1, %s2430_s12   ;;  %s28_s16 = sadd.s32 1, %s2426_s11 }
   0x9   : > { %s25_s17 = ssub.s32 %s2430_s12, %s2480_s15  ;;  %p35_p0 = scmp.ne.s32.totalorder %s2426_s11, %s2422_s10 }
   0xa   : > { %p26_p1 = scmp.eq.s32.totalorder %s25_s17, 0  ;;  %p36_p2 = scmp.eq.s32.totalorder %s2430_s12, 0 }
   0xb   : > { %p41_p3 = scmp.ne.s32.totalorder %s2422_s10, %s2418_s9  ;;  %p42_p4 = scmp.eq.s32.totalorder %s2476_s13, 0 }
   0xc   : > { %s2492_s18 = scalar_select %p26_p1, %s2426_s11, %s28_s16  }
   0xd   : > { %p2494_p5 = por %p36_p2, %p35_p0  ;;  %p2498_p6 = por %p42_p4, %p41_p3 }
   0xe   : > { %p91_p7 = scmp.eq.s32.totalorder %s2476_s13, 1  ;;  %p97_p8 = scmp.eq.s32.totalorder %s2167_s14, 1 }
   0xf   : > { %s4930_s20 = scalar_select %p2498_p6, 1, 0 }
  0x10   : > { %p2211_p10 = scmp.lt.s32.totalorder %s2430_s12, 2  ;;  %p2505_p11 = por %p91_p7, %p35_p0 }
  0x11   : > { %p2509_p12 = por %p97_p8, %p41_p3  ;;  %s2514_s23 = sand.u32 1, %s2426_s11  }
  0x12   : > { %s4931_s21 = scalar_select %p2505_p11, 1, 0 }
  0x13   : > { %s4932_s22 = scalar_select %p2509_p12, 1, 0 }
  0x14   : > { %s2192_s24 = sshll.u32 %s2430_s12, 10  ;;  %s2170_s25 = sshll.u32 %s2514_s23, 6 }
  0x15   : > { %s2521_s28 = scalar_lea.hbm %s4841_s0, %s2192_s24  ;;  %s121_s29 = scalar_lea.vmem [#allocation2], %s2170_s25 }
  0x16   : > { %s128_s30 = sshll.u32 %s121_s29, 4  ;;  %p2525_p13 = pnand %p2211_p10, %p2494_p5  ;;  %s2529_s30 = int_to_ptr.vmem [resolvable:$true] %s128_s30 }
  0x17   : > { %s118_s4 = scalar_lea.sflag [#allocation3], %s2514_s23  ;;  %s2300_s5 = scalar_lea.hbm %s2521_s28, 1024 }
  0x18   : > { %p2301_p0 = scmp.ne.s32.totalorder %s2521_s28, %s2300_s5  ;;  %p2302_p1 = pneg %p2525_p13 }
  0x19   : > { %s2305_s8 = scalar_lea.hbm %s4841_s0, 2048  ;;  %p2306_p4 = scmp.lt.u32.totalorder %s2521_s28, %s4841_s0 }
  0x1a   : > { %p2303_p2 = pnand %p2302_p1, %p2301_p0  ;;  %p2307_p5 = scmp.lt.u32.totalorder %s2305_s8, %s2300_s5 }
  0x1b   : > { %p2309_p8 = scmp.lt.u32.totalorder %s2300_s5, %s2521_s28 }
  0x1c   : > { %p2304_p3 = pneg %p2303_p2  ;;  %p2308_p7 = por %p2307_p5, %p2306_p4 }
  0x1e   : > { %p2310_p10 = por %p2309_p8, %p2308_p7 }
  0x20   : > { %p2311_p9 = pnand %p2310_p10, %p2304_p3 }
  0x22   : > { %2314 = shalt.err (!%p2311_p9)
}
  0x23   : > { %s2315_s17 = scalar_lea.vmem %s2529_s30, 1024  ;;  %s2432_s19 = smov [#allocation2]  }
  0x24   : > { %p2316_p0 = scmp.ne.s32.totalorder %s2529_s30, %s2315_s17  ;;  %s2320_s24 = sshll.u32 %s2432_s19, 4  ;;  %s2321_s24 = int_to_ptr.vmem [resolvable:$false] %s2320_s24 }
  0x25   : > { %s2322_s25 = scalar_lea.vmem %s2321_s24, 2048  ;;  %p2323_p11 = scmp.lt.s32.totalorder %s2529_s30, %s2321_s24 }
  0x26   : > { %p2318_p2 = pnand %p2316_p0, %p2302_p1  ;;  %p2324_p4 = scmp.lt.s32.totalorder %s2322_s25, %s2315_s17 }
  0x28   : > { %p2319_p12 = pneg %p2318_p2  ;;  %p2325_p5 = por %p2324_p4, %p2323_p11 }
  0x2a   : > { %p2326_p7 = pnand %p2325_p5, %p2319_p12 }
  0x2c   : > { %2329 = shalt.err (!%p2326_p7)
}
  0x2d   : > { %s2433_s26 = smov 128   ;;  %s2434_s27 = smov 8  }
  0x2e   : > { %2203 = dma.hbm_to_vmem [thread:$0]  (!%p2525_p13), %s2521_s28, 1024, %s2529_s30, %s118_s4, %s2433_s26, %s2433_s26, %s2434_s27  }
  0x2f   : > { %p2176_p9 = scmp.ge.s32.totalorder %s2430_s12, 1  ;;  %p157_p11 = scmp.lt.s32.totalorder %s2430_s12, 3 }
  0x30   : > { %s2173_s29 = sshll.u32 %s2514_s23, 4  ;;  %s2193_s6 = sshll.u32 %s2430_s12, 8 }
  0x31   : > { %p2565_p12 = pnand %p2176_p9, %p157_p11  ;;  %s142_s7 = scalar_lea.vmem [#allocation5], %s2173_s29 }
  0x32   : > { %s149_s8 = sshll.u32 %s142_s7, 4  ;;  %s2573_s17 = scalar_lea.hbm %s4842_s1, %s2193_s6  ;;  %s2575_s8 = int_to_ptr.vmem [resolvable:$true] %s149_s8 }
  0x33   : > { %s139_s28 = scalar_lea.sflag [#allocation6], %s2514_s23  ;;  %s2330_s30 = scalar_lea.hbm %s2573_s17, 256 }
  0x34   : > { %p2331_p3 = scmp.ne.s32.totalorder %s2573_s17, %s2330_s30  ;;  %s2335_s24 = scalar_lea.hbm %s4842_s1, 512 }
  0x35   : > { %p2336_p0 = scmp.lt.u32.totalorder %s2573_s17, %s4842_s1  ;;  %p2337_p2 = scmp.lt.u32.totalorder %s2335_s24, %s2330_s30 }
  0x36   : > { %p2333_p8 = pnand %p2331_p3, %p2302_p1  ;;  %p2339_p5 = scmp.lt.u32.totalorder %s2330_s30, %s2573_s17 }
  0x37   : > { %p2338_p4 = por %p2337_p2, %p2336_p0 }
  0x38   : > { %p2334_p10 = pneg %p2333_p8 }
  0x39   : > { %p2340_p7 = por %p2339_p5, %p2338_p4 }
  0x3b   : > { %p2341_p9 = pnand %p2340_p7, %p2334_p10 }
  0x3d   : > { %2344 = shalt.err (!%p2341_p9)
}
  0x3e   : > { %s2345_s6 = scalar_lea.vmem %s2575_s8, 256  ;;  %s2435_s7 = smov [#allocation5]  }
  0x3f   : > { %p2346_p11 = scmp.ne.s32.totalorder %s2575_s8, %s2345_s6  ;;  %s2350_s14 = sshll.u32 %s2435_s7, 4  ;;  %s2351_s14 = int_to_ptr.vmem [resolvable:$false] %s2350_s14 }
  0x40   : > { %s2352_s16 = scalar_lea.vmem %s2351_s14, 512  ;;  %p2353_p6 = scmp.lt.s32.totalorder %s2575_s8, %s2351_s14 }
  0x41   : > { %p2348_p3 = pnand %p2346_p11, %p2302_p1  ;;  %p2354_p0 = scmp.lt.s32.totalorder %s2352_s16, %s2345_s6 }
  0x43   : > { %p2349_p8 = pneg %p2348_p3  ;;  %p2355_p2 = por %p2354_p0, %p2353_p6 }
  0x45   : > { %p2356_p4 = pnand %p2355_p2, %p2349_p8 }
  0x47   : > { %2359 = shalt.err (!%p2356_p4)
}
  0x48   : > { %2206 = dma.hbm_to_vmem [thread:$0]  (!%p2525_p13), %s2573_s17, 256, %s2575_s8, %s139_s28, %s2433_s26, %s2433_s26, %s2434_s27  }
  0x49   : > { %161 = sbr.rel (%p2565_p12) target bundleno = 869 (0x365), region = 28 }
  0x50   : > { %s2609_s30 = sand.u32 1, %s2422_s10   ;;  %p4935_p6 = scmp.ne.s32.totalorder %s4930_s20, 0 }
  0x51   : > { %s2177_s4 = sshll.u32 %s2609_s30, 6  ;;  %s164_s19 = scalar_lea.sflag [#allocation3], %s2609_s30 }
  0x52   : > { %s2613_s3 = scalar_lea.vmem [#allocation2], %s2177_s4 }
  0x53   : > { %2405 = dma.done.wait (%p4935_p6), %s164_s19, 1024  }
  0x54   : > { %2407 = vsyncadd (%p4935_p6), %s164_s19, 4294966272  ;;  %s2178_s23 = sshll.u32 %s2609_s30, 4  ;;  %s173_s26 = scalar_lea.sflag [#allocation6], %s2609_s30 }
  0x55   : > { %s176_s27 = scalar_lea.vmem [#allocation5], %s2178_s23 }
  0x56   : > { %2409 = dma.done.wait (%p4935_p6), %s173_s26, 256  }
  0x57   : > { %2411 = vsyncadd (%p4935_p6), %s173_s26, 4294967040  ;;  %v212_v0 = vlaneseq  ;;  %v2436_v2 = vmov 0.0   ;;  %v210_v4 = vld [vmem:[%s176_s27] sm:$0xff]  ;;  %v211_v5 = vld [vmem:[%s176_s27 + $0x8] sm:$0xff]  ;;  %s2437_s20 = smov 1   ;;  %s2438_s5 = smov 127  }
  0x58   : > { %v202_v6 = vld [vmem:[%s2613_s3] sm:$0xff]  ;;  %vm290_vm1 = vcmp.eq.s32.totalorder %v210_v4, 2  ;;  %vm291_vm2 = vcmp.eq.s32.totalorder %v211_v5, 2  ;;  %vm288_vm3 = vcmp.eq.s32.totalorder %v210_v4, 1  ;;  %vm289_vm4 = vcmp.eq.s32.totalorder %v211_v5, 1  ;;  %v204_v7 = vld [vmem:[%s2613_s3 + $0x10] sm:$0xff] }
  0x59   : > { %v2626_v1 = vand.u32 127, %v212_v0  ;;  %v206_v8 = vld [vmem:[%s2613_s3 + $0x20] sm:$0xff]  ;;  %v2634_v9 = vsel %vm290_vm1, 1.0, %v2436_v2  ;;  %v2636_v10 = vsel %vm291_vm2, 1.0, %v2436_v2  ;;  %v2638_v11 = vsel %vm288_vm3, 1.0, %v2436_v2  ;;  %v208_v13 = vld [vmem:[%s2613_s3 + $0x30] sm:$0xff] }
  0x5a   : > { %4937 = vst [vmem:[#allocation12_spill] sm:$0xff] %v2634_v9  ;;  %4938 = vst [vmem:[#allocation13_spill] sm:$0xff] %v2636_v10  ;;  %v2640_v12 = vsel %vm289_vm4, 1.0, %v2436_v2  ;;  %v203_v14 = vld [vmem:[%s2613_s3 + $0x8] sm:$0xff]  ;;  %v2255_v15 = vpack.i.bf16 %v2636_v10, %v2634_v9  ;;  %v205_v17 = vld [vmem:[%s2613_s3 + $0x18] sm:$0xff]  ;;  %vm292_vm5 = vcmp.eq.s32.totalorder %v210_v4, 3  ;;  %v244_v20 = vmax.f32 %v202_v6, %v206_v8 }
  0x5b   : > { %vm237_vm0 = vcmp.lt.s32.totalorder %v2626_v1, 16  ;;  %4939 = vst [vmem:[#allocation14_spill] sm:$0xff] %v2638_v11  ;;  %4940 = vst [vmem:[#allocation15_spill] sm:$0xff] %v2640_v12  ;;  %v2250_v16 = vpack.i.bf16 %v2640_v12, %v2638_v11  ;;  %v207_v18 = vld [vmem:[%s2613_s3 + $0x28] sm:$0xff]  ;;  %v209_v19 = vld [vmem:[%s2613_s3 + $0x38] sm:$0xff]  ;;  %vm293_vm6 = vcmp.eq.s32.totalorder %v211_v5, 3  ;;  %v245_v21 = vmax.f32 %v204_v7, %v208_v13 }
  0x5c   : > { %v2629_v3 = vsel %vm237_vm0, 1.0, %v2436_v2  ;;  %2256 = vrot.lane.b32.xlu1 %v2255_v15, %s2437_s20  ;;  %v2653_v22 = vsel %vm292_vm5, 1.0, %v2436_v2  ;;  %v2655_v23 = vsel %vm293_vm6, 1.0, %v2436_v2  ;;  %v247_v24 = vmax.f32 %v203_v14, %v207_v18  ;;  %s2179_s8 = sshll.u32 %s2609_s30, 2  ;;  %s2189_s28 = sshll.u32 %s2476_s13, 6 }
  0x5d   : > { %4936 = vst [vmem:[#allocation11_spill] sm:$0xff] %v2629_v3  ;;  %2251 = vrot.lane.b32.xlu0 %v2250_v16, %s2437_s20  ;;  %4941 = vst [vmem:[#allocation16_spill] sm:$0xff] %v2653_v22  ;;  %v248_v25 = vmax.f32 %v205_v17, %v209_v19  ;;  %v246_v26 = vmax.f32 %v244_v20, %v245_v21  ;;  %v2270_v27 = vpack.i.bf16 %v2655_v23, %v2653_v22  ;;  %s4776_s17 = scalar_lea.vmem [#allocation7], %s2179_s8  ;;  %s4796_s6 = scalar_lea.hbm %s4843_s2, %s2189_s28 }
  0x5e   : > { %4942 = vst [vmem:[#allocation17_spill] sm:$0xff] %v2655_v23  ;;  %v346_v20 = vrot.slane %v2638_v11, 1  ;;  %vm229_vm11 = vcmp.eq.s32.totalorder %v2626_v1, 0  ;;  %vm232_vm12 = vcmp.ge.s32.totalorder %v2626_v1, 15  ;;  %s2074_s24 = sshll.u32 %s4776_s17, 4  ;;  %s2061_s7 = scalar_lea.sflag [#allocation4], %s2609_s30  ;;  %s4798_s24 = int_to_ptr.vmem [resolvable:$true] %s2074_s24 }
  0x5f   : > { %v249_v28 = vmax.f32 %v247_v24, %v248_v25  ;;  %v250_v29 = vsub.f32 %v202_v6, %v246_v26  ;;  %v252_v30 = vsub.f32 %v204_v7, %v246_v26  ;;  %v254_v31 = vsub.f32 %v206_v8, %v246_v26  ;;  %s2360_s14 = scalar_lea.vmem %s4798_s24, 64  ;;  %p5156_p1 = scmp.ne.s32.totalorder %s4931_s21, 0 }
  0x60   : > { %v256_v32 = vsub.f32 %v208_v13, %v246_v26  ;;  %2266 = vrot.lane.b32.xlu1 %v2255_v15, %s2438_s5  ;;  %v2700_v6 = vshrl.u32 %v212_v0, 7  ;;  %v316_v7 = vrot.slane %v2636_v10, 7  ;;  %v310_v8 = vrot.slane %v2634_v9, 7  ;;  %p2361_p13 = scmp.ne.s32.totalorder %s4798_s24, %s2360_s14  ;;  %s2439_s13 = smov [#allocation7]  }
  0x61   : > { %2261 = vrot.lane.b32.xlu0 %v2250_v16, %s2438_s5  ;;  %v251_v33 = vsub.f32 %v203_v14, %v249_v28  ;;  %v253_v34 = vsub.f32 %v205_v17, %v249_v28  ;;  %v258_v35 = vmul.f32 1.442695, %v250_v29  ;;  %v262_v36 = vmul.f32 1.442695, %v252_v30  ;;  %v5153_v1 = vld [vmem:[#allocation12_spill] sm:$0xff]  ;;  %s2364_s16 = sshll.u32 %s2439_s13, 4  ;;  %s2365_s16 = int_to_ptr.vmem [resolvable:$false] %s2364_s16 }
  0x62   : > { %v266_v37 = vmul.f32 1.442695, %v254_v31  ;;  %v255_v38 = vsub.f32 %v207_v18, %v249_v28  ;;  %v270_v39 = vmul.f32 1.442695, %v256_v32  ;;  %v257_v40 = vsub.f32 %v209_v19, %v249_v28  ;;  %p2362_p12 = pnand %p2361_p13, %p5156_p1  ;;  %s2366_s4 = scalar_lea.vmem %s2365_s16, 128 }
  0x63   : > { %2280 = vpow2.f32 %v258_v35  ;;  %v260_v41 = vmul.f32 1.442695, %v251_v33  ;;  %v264_v42 = vmul.f32 1.442695, %v253_v34  ;;  %vm318_vm7 = vcmp.lt.s32.totalorder %v2700_v6, 1  ;;  %p2367_p5 = scmp.lt.s32.totalorder %s4798_s24, %s2365_s16  ;;  %p2368_p7 = scmp.lt.s32.totalorder %s2366_s4, %s2360_s14 }
  0x64   : > { %2276 = vrot.lane.b32.xlu1 %v2270_v27, %s2438_s5  ;;  %2282 = vpow2.f32 %v262_v36  ;;  %v268_v43 = vmul.f32 1.442695, %v255_v38  ;;  %v272_v44 = vmul.f32 1.442695, %v257_v40  ;;  %v315_v13 = vrot.slane %v2640_v12, 7  ;;  %p2363_p10 = pneg %p2362_p12 }
  0x65   : > { %2271 = vrot.lane.b32.xlu0 %v2270_v27, %s2437_s20  ;;  %2284 = vpow2.f32 %v266_v37  ;;  %v309_v14 = vrot.slane %v2638_v11, 7  ;;  %v2708_v15 = vadd.s32 8, %v2700_v6  ;;  %vm217_vm8 = vcmp.eq.s32.totalorder %v2700_v6, 0  ;;  %p2369_p9 = por %p2368_p7, %p2367_p5 }
  0x66   : > { %2286 = vpow2.f32 %v270_v39  ;;  %v353_v16 = vrot.slane %v2636_v10, 1  ;;  %v329_v0 = vsel %vm318_vm7, %v316_v7, %v310_v8  ;;  %v347_v17 = vrot.slane %v2634_v9, 1 }
  0x67   : > { %2288 = vpow2.f32 %v260_v41  ;;  %vm355_vm9 = vcmp.lt.s32.totalorder %v2700_v6, 7  ;;  %v352_v18 = vrot.slane %v2640_v12, 1  ;;  %v328_v19 = vsel %vm318_vm7, %v315_v13, %v309_v14  ;;  %p2370_p11 = pnand %p2369_p9, %p2363_p10 }
  0x68   : > { %2290 = vpow2.f32 %v264_v42  ;;  %v323_v21 = vsel %vm318_vm7, %v310_v8, %v316_v7  ;;  %v339_v24 = vsel %vm217_vm8, 1e+30, %v329_v0  ;;  %vm224_vm10 = vcmp.ge.s32.totalorder %v2708_v15, 15 }
  0x69   : > { %2292 = vpow2.f32 %v268_v43  ;;  %v366_v25 = vsel %vm355_vm9, %v353_v16, %v347_v17  ;;  %v322_v26 = vsel %vm318_vm7, %v309_v14, %v315_v13  ;;  %v337_v27 = vsel %vm217_vm8, 1e+30, %v328_v19 }
  0x6a   : > { %2294 = vpow2.f32 %v272_v44  ;;  %v311_v28 = vrot.slane %v2653_v22, 7  ;;  %v317_v29 = vrot.slane %v2655_v23, 7  ;;  %v388_v30 = vmin.f32 %v339_v24, %v2634_v9 }
  0x6b   : > { %v389_v31 = vmin.f32 %v323_v21, %v2636_v10  ;;  %v365_v32 = vsel %vm355_vm9, %v352_v18, %v346_v20  ;;  %v360_v33 = vsel %vm355_vm9, %v347_v17, %v353_v16  ;;  %v377_v34 = vsel %vm224_vm10, 1e+30, %v366_v25 }
  0x6c   : > { %v359_v35 = vsel %vm355_vm9, %v346_v20, %v352_v18  ;;  %v386_v36 = vmin.f32 %v337_v27, %v2638_v11  ;;  %v387_v37 = vmin.f32 %v322_v26, %v2640_v12  ;;  %v375_v38 = vsel %vm224_vm10, 1e+30, %v365_v32 }
  0x6d   : > { %v2281_v45 = vpop.eup %2280  ;;  %v330_v39 = vsel %vm318_vm7, %v317_v29, %v311_v28  ;;  %v348_v40 = vrot.slane %v2653_v22, 1  ;;  %v354_v41 = vrot.slane %v2655_v23, 1  ;;  %v400_v44 = vmin.f32 %v388_v30, %v360_v33 }
  0x6e   : > { %v2283_v46 = vpop.eup %2282 }
  0x6f   : > { %v2285_v47 = vpop.eup %2284  ;;  %v274_v48 = vadd.f32 %v2283_v46, %v2281_v45  ;;  %v401_v45 = vmin.f32 %v389_v31, %v377_v34  ;;  %v361_v13 = vsel %vm355_vm9, %v348_v40, %v354_v41 }
  0x70   : > { %v2287_v49 = vpop.eup %2286 }
  0x71   : > { %v2289_v50 = vpop.eup %2288  ;;  %v275_v51 = vadd.f32 %v2285_v47, %v274_v48 }
  0x72   : > { %v2291_v52 = vpop.eup %2290 }
  0x73   : > { %v2293_v53 = vpop.eup %2292  ;;  %v276_v54 = vadd.f32 %v2287_v49, %v275_v51  ;;  %v277_v55 = vadd.f32 %v2291_v52, %v2289_v50  ;;  %v398_v50 = vmin.f32 %v386_v36, %v359_v35  ;;  %v399_v51 = vmin.f32 %v387_v37, %v375_v38 }
  0x74   : > { %v2295_v56 = vpop.eup %2294 }
  0x75   : > { %2296 = vrcp.f32 %v276_v54  ;;  %v278_v57 = vadd.f32 %v2293_v53, %v277_v55 }
  0x77   : > { %v279_v58 = vadd.f32 %v2295_v56, %v278_v57  ;;  %v367_v57 = vsel %vm355_vm9, %v354_v41, %v348_v40 }
  0x78   : > { %v379_v20 = vsel %vm224_vm10, 1e+30, %v367_v57 }
  0x79   : > { %2298 = vrcp.f32 %v279_v58 }
  0x7f   : > { %v2297_v59 = vpop.eup %2296 }
  0x80   : > { %v2663_v60 = vmul.f32 %v2297_v59, %v2285_v47  ;;  %v2665_v61 = vmul.f32 %v2297_v59, %v2283_v46  ;;  %v2681_v5 = vmul.f32 %v2297_v59, %v2287_v49 }
  0x82   : > { %4943 = vst [vmem:[#allocation18_spill] sm:$0xff] %v2663_v60  ;;  %4944 = vst [vmem:[#allocation19_spill] sm:$0xff] %v2665_v61  ;;  %408 = vrot.lane.b32.xlu1 %v2663_v60, %s2437_s20  ;;  %404 = vrot.lane.b32.xlu0 %v2665_v61, %s2437_s20 }
  0x83   : > { %v2299_v62 = vpop.eup %2298  ;;  %4948 = vst [vmem:[#allocation23_spill] sm:$0xff] %v2681_v5 }
  0x84   : > { %v2671_v63 = vmul.f32 %v2299_v62, %v2293_v53  ;;  %v2673_v2 = vmul.f32 %v2299_v62, %v2291_v52  ;;  %v2679_v4 = vmul.f32 %v2299_v62, %v2295_v56  ;;  %v324_v52 = vsel %vm318_vm7, %v311_v28, %v317_v29 }
  0x85   : > { %v341_v53 = vsel %vm217_vm8, 1e+30, %v330_v39  ;;  %v391_v17 = vmin.f32 %v324_v52, %v2655_v23 }
  0x86   : > { %4945 = vst [vmem:[#allocation20_spill] sm:$0xff] %v2671_v63  ;;  %4946 = vst [vmem:[#allocation21_spill] sm:$0xff] %v2673_v2  ;;  %410 = vrot.lane.b32.xlu1 %v2671_v63, %s2437_s20  ;;  %406 = vrot.lane.b32.xlu0 %v2673_v2, %s2437_s20  ;;  %v390_v21 = vmin.f32 %v341_v53, %v2653_v22 }
  0x87   : > { %4947 = vst [vmem:[#allocation22_spill] sm:$0xff] %v2679_v4 }
  0x8a   : > { %414 = vrot.lane.b32.xlu1 %v2679_v4, %s2437_s20  ;;  %412 = vrot.lane.b32.xlu0 %v2681_v5, %s2437_s20 }
  0x8e   : > { %442 = vrot.lane.b32.xlu1 %v2673_v2, %s2438_s5  ;;  %440 = vrot.lane.b32.xlu0 %v2665_v61, %s2438_s5 }
  0x92   : > { %444 = vrot.lane.b32.xlu1 %v2663_v60, %s2438_s5  ;;  %446 = vrot.lane.b32.xlu0 %v2671_v63, %s2438_s5 }
  0x96   : > { %448 = vrot.lane.b32.xlu1 %v2681_v5, %s2438_s5  ;;  %450 = vrot.lane.b32.xlu0 %v2679_v4, %s2438_s5 }
  0xce   : > { %v2257_v42 = vpop.permute.xlu1 %2256 }
  0xcf   : > { %v2252_v43 = vpop.permute.xlu0 %2251  ;;  %v2259_v46 = vunpack.i.h.bf16 %v2257_v42  ;;  %v2258_v47 = vunpack.i.l.bf16 %v2257_v42 }
  0xd0   : > { %v2254_v48 = vunpack.i.h.bf16 %v2252_v43  ;;  %v2253_v49 = vunpack.i.l.bf16 %v2252_v43 }
  0xd1   : > { %v437_v54 = vsel %vm229_vm11, 1e+30, %v2259_v46  ;;  %v436_v55 = vsel %vm229_vm11, 1e+30, %v2258_v47 }
  0xd2   : > { %v435_v56 = vsel %vm229_vm11, 1e+30, %v2254_v48  ;;  %v485_v58 = vmin.f32 %v437_v54, %v2636_v10  ;;  %v484_v59 = vmin.f32 %v436_v55, %v2634_v9  ;;  %v434_v62 = vsel %vm229_vm11, 1e+30, %v2253_v49  ;;  %v2267_v7 = vpop.permute.xlu1 %2266 }
  0xd3   : > { %v2262_v8 = vpop.permute.xlu0 %2261  ;;  %v2269_v14 = vunpack.i.h.bf16 %v2267_v7  ;;  %v2268_v16 = vunpack.i.l.bf16 %v2267_v7  ;;  %v483_v18 = vmin.f32 %v435_v56, %v2640_v12  ;;  %v482_v24 = vmin.f32 %v434_v62, %v2638_v11 }
  0xd4   : > { %v2264_v0 = vunpack.i.h.bf16 %v2262_v8  ;;  %v2263_v19 = vunpack.i.l.bf16 %v2262_v8 }
  0xd5   : > { %v473_v25 = vsel %vm232_vm12, 1e+30, %v2269_v14  ;;  %v472_v26 = vsel %vm232_vm12, 1e+30, %v2268_v16 }
  0xd6   : > { %v471_v27 = vsel %vm232_vm12, 1e+30, %v2264_v0  ;;  %v496_v28 = vmin.f32 %v484_v59, %v472_v26  ;;  %v497_v29 = vmin.f32 %v485_v58, %v473_v25  ;;  %v470_v30 = vsel %vm232_vm12, 1e+30, %v2263_v19  ;;  %v2277_v33 = vpop.permute.xlu1 %2276 }
  0xd7   : > { %v495_v31 = vmin.f32 %v483_v18, %v471_v27  ;;  %v2272_v32 = vpop.permute.xlu0 %2271  ;;  %v494_v34 = vmin.f32 %v482_v24, %v470_v30  ;;  %v2279_v37 = vunpack.i.h.bf16 %v2277_v33  ;;  %v2278_v41 = vunpack.i.l.bf16 %v2277_v33 }
  0xd8   : > { %v2274_v35 = vunpack.i.h.bf16 %v2272_v32  ;;  %v2273_v36 = vunpack.i.l.bf16 %v2272_v32  ;;  %v2785_v38 = vmin.f32 %v400_v44, %v496_v28  ;;  %v2787_v39 = vmin.f32 %v401_v45, %v497_v29 }
  0xd9   : > { %v2789_v40 = vmin.f32 %v399_v51, %v495_v31  ;;  %v2791_v42 = vmin.f32 %v398_v50, %v494_v34  ;;  %v475_v47 = vsel %vm232_vm12, 1e+30, %v2279_v37  ;;  %v474_v48 = vsel %vm232_vm12, 1e+30, %v2278_v41 }
  0xda   : > { %4949 = vst [vmem:[#allocation24_spill] sm:$0xff] %v2787_v39  ;;  %v439_v43 = vsel %vm229_vm11, 1e+30, %v2274_v35  ;;  %v438_v46 = vsel %vm229_vm11, 1e+30, %v2273_v36  ;;  %v402_v50 = vmin.f32 %v390_v21, %v361_v13  ;;  %v403_v51 = vmin.f32 %v391_v17, %v379_v20 }
  0xdb   : > { %4950 = vst [vmem:[#allocation25_spill] sm:$0xff] %v2789_v40  ;;  %4951 = vst [vmem:[#allocation26_spill] sm:$0xff] %v2791_v42  ;;  %790 = vrot.lane.b32.xlu1 %v2789_v40, %s2437_s20  ;;  %v487_v44 = vmin.f32 %v439_v43, %v2655_v23  ;;  %v486_v45 = vmin.f32 %v438_v46, %v2653_v22  ;;  %v521_v49 = vrot.slane %v2789_v40, 7  ;;  %788 = vrot.lane.b32.xlu0 %v2791_v42, %s2437_s20 }
  0xdc   : > { %v515_v52 = vrot.slane %v2791_v42, 7  ;;  %v551_v55 = vrot.slane %v2791_v42, 1  ;;  %v557_v56 = vrot.slane %v2789_v40, 1  ;;  %v516_v58 = vrot.slane %v2785_v38, 7 }
  0xdd   : > { %v498_v53 = vmin.f32 %v486_v45, %v474_v48  ;;  %v499_v54 = vmin.f32 %v487_v44, %v475_v47  ;;  %v522_v59 = vrot.slane %v2787_v39, 7  ;;  %v552_v8 = vrot.slane %v2785_v38, 1 }
  0xde   : > { %v533_v57 = vsel %vm318_vm7, %v521_v49, %v515_v52  ;;  %v527_v62 = vsel %vm318_vm7, %v515_v52, %v521_v49  ;;  %v569_v16 = vsel %vm355_vm9, %v557_v56, %v551_v55  ;;  %v563_v17 = vsel %vm355_vm9, %v551_v55, %v557_v56 }
  0xdf   : > { %794 = vrot.lane.b32.xlu1 %v2787_v39, %s2437_s20  ;;  %792 = vrot.lane.b32.xlu0 %v2785_v38, %s2437_s20  ;;  %v734_v7 = vsel %vm217_vm8, 1e+30, %v533_v57  ;;  %v2824_v13 = vmin.f32 %v402_v50, %v498_v53  ;;  %v2826_v14 = vmin.f32 %v403_v51, %v499_v54  ;;  %v558_v18 = vrot.slane %v2787_v39, 1 }
  0xe0   : > { %v758_v0 = vmin.f32 %v734_v7, %v2791_v42  ;;  %v534_v19 = vsel %vm318_vm7, %v522_v59, %v516_v58  ;;  %v759_v20 = vmin.f32 %v527_v62, %v2789_v40  ;;  %v528_v24 = vsel %vm318_vm7, %v516_v58, %v522_v59 }
  0xe1   : > { %4952 = vst [vmem:[#allocation27_spill] sm:$0xff] %v2824_v13  ;;  %4953 = vst [vmem:[#allocation28_spill] sm:$0xff] %v2826_v14  ;;  %v736_v25 = vsel %vm217_vm8, 1e+30, %v534_v19  ;;  %v747_v26 = vsel %vm224_vm10, 1e+30, %v569_v16  ;;  %v570_v27 = vsel %vm355_vm9, %v558_v18, %v552_v8  ;;  %v564_v28 = vsel %vm355_vm9, %v552_v8, %v558_v18 }
  0xe2   : > { %v2839_v21 = vmin.f32 %v758_v0, %v563_v17  ;;  %v760_v29 = vmin.f32 %v736_v25, %v2785_v38  ;;  %v517_v30 = vrot.slane %v2824_v13, 7  ;;  %v523_v31 = vrot.slane %v2826_v14, 7 }
  0xe3   : > { %826 = vrot.lane.b32.xlu1 %v2789_v40, %s2438_s5  ;;  %824 = vrot.lane.b32.xlu0 %v2791_v42, %s2438_s5  ;;  %v749_v32 = vsel %vm224_vm10, 1e+30, %v570_v27  ;;  %v761_v33 = vmin.f32 %v528_v24, %v2787_v39  ;;  %v553_v35 = vrot.slane %v2824_v13, 1  ;;  %v559_v37 = vrot.slane %v2826_v14, 1 }
  0xe4   : > { %v2859_v34 = vmin.f32 %v760_v29, %v564_v28  ;;  %v529_v36 = vsel %vm318_vm7, %v517_v30, %v523_v31  ;;  %v535_v41 = vsel %vm318_vm7, %v523_v31, %v517_v30  ;;  %v2869_v43 = vmin.f32 %v759_v20, %v747_v26 }
  0xe5   : > { %v763_v46 = vmin.f32 %v529_v36, %v2826_v14  ;;  %v738_v47 = vsel %vm217_vm8, 1e+30, %v535_v41  ;;  %v571_v44 = vsel %vm355_vm9, %v559_v37, %v553_v35  ;;  %v565_v45 = vsel %vm355_vm9, %v553_v35, %v559_v37 }
  0xe6   : > { %v762_v48 = vmin.f32 %v738_v47, %v2824_v13  ;;  %v751_v49 = vsel %vm224_vm10, 1e+30, %v571_v44  ;;  %v2883_v50 = vmin.f32 %v761_v33, %v749_v32  ;;  %v542_v51 = vsel %vm217_vm8, -1e+30, %v533_v57 }
  0xe7   : > { %830 = vrot.lane.b32.xlu1 %v2787_v39, %s2438_s5  ;;  %828 = vrot.lane.b32.xlu0 %v2785_v38, %s2438_s5  ;;  %v2891_v53 = vmin.f32 %v763_v46, %v751_v49  ;;  %v591_v54 = vmax.f32 %v527_v62, %v2789_v40  ;;  %v579_v55 = vsel %vm224_vm10, -1e+30, %v569_v16  ;;  %v590_v56 = vmax.f32 %v542_v51, %v2791_v42 }
  0xe8   : > { %v2889_v52 = vmin.f32 %v762_v48, %v565_v45  ;;  %v544_v57 = vsel %vm217_vm8, -1e+30, %v534_v19  ;;  %v593_v59 = vmax.f32 %v528_v24, %v2787_v39  ;;  %v306_v62 = vrot.slane %v2665_v61, 7 }
  0xe9   : > { %v2905_v58 = vmax.f32 %v591_v54, %v579_v55  ;;  %v2909_v7 = vmax.f32 %v590_v56, %v563_v17  ;;  %v581_v8 = vsel %vm224_vm10, -1e+30, %v570_v27  ;;  %v592_v16 = vmax.f32 %v544_v57, %v2785_v38 }
  0xea   : > { %v312_v0 = vrot.slane %v2673_v2, 7  ;;  %v546_v18 = vsel %vm217_vm8, -1e+30, %v535_v41  ;;  %v349_v19 = vrot.slane %v2673_v2, 1  ;;  %v343_v17 = vrot.slane %v2665_v61, 1 }
  0xeb   : > { %798 = vrot.lane.b32.xlu1 %v2826_v14, %s2437_s20  ;;  %796 = vrot.lane.b32.xlu0 %v2824_v13, %s2437_s20  ;;  %4954 = vst [vmem:[#allocation29_spill] sm:$0xff] %v2905_v58  ;;  %4955 = vst [vmem:[#allocation30_spill] sm:$0xff] %v2909_v7  ;;  %v2923_v25 = vmax.f32 %v593_v59, %v581_v8  ;;  %v595_v26 = vmax.f32 %v529_v36, %v2826_v14  ;;  %v313_v27 = vrot.slane %v2671_v63, 7 }
  0xec   : > { %v307_v29 = vrot.slane %v2663_v60, 7  ;;  %v2928_v30 = vmax.f32 %v592_v16, %v564_v28  ;;  %v583_v31 = vsel %vm224_vm10, -1e+30, %v571_v44  ;;  %v594_v32 = vmax.f32 %v546_v18, %v2824_v13 }
  0xed   : > { %4956 = vst [vmem:[#allocation31_spill] sm:$0xff] %v2923_v25  ;;  %v325_v33 = vsel %vm318_vm7, %v312_v0, %v306_v62  ;;  %v362_v35 = vsel %vm355_vm9, %v349_v19, %v343_v17  ;;  %v344_v28 = vrot.slane %v2663_v60, 1  ;;  %v2942_v41 = vmax.f32 %v595_v26, %v583_v31 }
  0xee   : > { %v319_v46 = vsel %vm318_vm7, %v306_v62, %v312_v0  ;;  %v331_v47 = vsel %vm217_vm8, 1e+30, %v325_v33  ;;  %v350_v44 = vrot.slane %v2671_v63, 1  ;;  %v2949_v48 = vmax.f32 %v594_v32, %v565_v45 }
  0xef   : > { %834 = vrot.lane.b32.xlu1 %v2826_v14, %s2438_s5  ;;  %832 = vrot.lane.b32.xlu0 %v2824_v13, %s2438_s5  ;;  %4957 = vst [vmem:[#allocation32_spill] sm:$0xff] %v2942_v41  ;;  %v326_v49 = vsel %vm318_vm7, %v313_v27, %v307_v29  ;;  %v308_v51 = vrot.slane %v2681_v5, 7  ;;  %v314_v54 = vrot.slane %v2679_v4, 7  ;;  %v369_v55 = vsel %vm224_vm10, 1e+30, %v362_v35 }
  0xf0   : > { %4958 = vst [vmem:[#allocation33_spill] sm:$0xff] %v2949_v48  ;;  %v356_v56 = vsel %vm355_vm9, %v343_v17, %v349_v19  ;;  %v381_v59 = vmin.f32 %v319_v46, %v2673_v2  ;;  %v380_v62 = vmin.f32 %v331_v47, %v2665_v61  ;;  %v333_v0 = vsel %vm217_vm8, 1e+30, %v326_v49 }
  0xf1   : > { %v320_v18 = vsel %vm318_vm7, %v307_v29, %v313_v27  ;;  %v345_v19 = vrot.slane %v2681_v5, 1  ;;  %v351_v17 = vrot.slane %v2679_v4, 1  ;;  %v363_v26 = vsel %vm355_vm9, %v350_v44, %v344_v28 }
  0xf2   : > { %v327_v31 = vsel %vm318_vm7, %v314_v54, %v308_v51  ;;  %v393_v35 = vmin.f32 %v381_v59, %v369_v55  ;;  %v383_v46 = vmin.f32 %v320_v18, %v2671_v63  ;;  %v321_v49 = vsel %vm318_vm7, %v308_v51, %v314_v54 }
  0xf3   : > { %622 = vrot.lane.b32.xlu1 %v2905_v58, %s2437_s20  ;;  %620 = vrot.lane.b32.xlu0 %v2909_v7, %s2437_s20  ;;  %v364_v55 = vsel %vm355_vm9, %v351_v17, %v345_v19 }
  0xf4   : > { %v409_v20 = vpop.permute.xlu1 %408  ;;  %v405_v24 = vpop.permute.xlu0 %404 }
  0xf5   : > { %v428_v45 = vsel %vm229_vm11, 1e+30, %v405_v24  ;;  %v357_v24 = vsel %vm355_vm9, %v344_v28, %v350_v44  ;;  %v430_v32 = vsel %vm229_vm11, 1e+30, %v409_v20  ;;  %v382_v28 = vmin.f32 %v333_v0, %v2663_v60 }
  0xf6   : > { %v476_v33 = vmin.f32 %v428_v45, %v2665_v61  ;;  %v371_v44 = vsel %vm224_vm10, 1e+30, %v363_v26 }
  0xf7   : > { %626 = vrot.lane.b32.xlu1 %v2923_v25, %s2437_s20  ;;  %624 = vrot.lane.b32.xlu0 %v2928_v30, %s2437_s20  ;;  %v394_v18 = vmin.f32 %v382_v28, %v357_v24  ;;  %v395_v26 = vmin.f32 %v383_v46, %v371_v44  ;;  %v373_v24 = vsel %vm224_vm10, 1e+30, %v364_v55 }
  0xf8   : > { %v411_v36 = vpop.permute.xlu1 %410  ;;  %v407_v37 = vpop.permute.xlu0 %406 }
  0xf9   : > { %v429_v57 = vsel %vm229_vm11, 1e+30, %v407_v37  ;;  %v431_v27 = vsel %vm229_vm11, 1e+30, %v411_v36  ;;  %v392_v37 = vmin.f32 %v380_v62, %v356_v56  ;;  %v335_v36 = vsel %vm217_vm8, 1e+30, %v327_v31 }
  0xfa   : > { %v477_v29 = vmin.f32 %v429_v57, %v2673_v2  ;;  %v478_v56 = vmin.f32 %v430_v32, %v2663_v60  ;;  %v479_v45 = vmin.f32 %v431_v27, %v2671_v63  ;;  %v358_v31 = vsel %vm355_vm9, %v345_v19, %v351_v17 }
  0xfb   : > { %630 = vrot.lane.b32.xlu1 %v2942_v41, %s2437_s20  ;;  %628 = vrot.lane.b32.xlu0 %v2949_v48, %s2437_s20  ;;  %v385_v32 = vmin.f32 %v321_v49, %v2679_v4 }
  0xfc   : > { %v415_v8 = vpop.permute.xlu1 %414  ;;  %v413_v16 = vpop.permute.xlu0 %412 }
  0xfd   : > { %v433_v62 = vsel %vm229_vm11, 1e+30, %v415_v8  ;;  %v432_v0 = vsel %vm229_vm11, 1e+30, %v413_v16 }
  0xfe   : > { %v481_v28 = vmin.f32 %v433_v62, %v2679_v4  ;;  %v480_v46 = vmin.f32 %v432_v0, %v2681_v5 }
  0xff   : > { %658 = vrot.lane.b32.xlu1 %v2905_v58, %s2438_s5  ;;  %656 = vrot.lane.b32.xlu0 %v2909_v7, %s2438_s5 }
 0x100   : > { %v443_v20 = vpop.permute.xlu1 %442  ;;  %v441_v47 = vpop.permute.xlu0 %440 }
 0x101   : > { %v465_v57 = vsel %vm232_vm12, 1e+30, %v443_v20  ;;  %v464_v59 = vsel %vm232_vm12, 1e+30, %v441_v47 }
 0x102   : > { %v489_v51 = vmin.f32 %v477_v29, %v465_v57  ;;  %v488_v54 = vmin.f32 %v476_v33, %v464_v59  ;;  %v384_v33 = vmin.f32 %v335_v36, %v2681_v5  ;;  %v397_v57 = vmin.f32 %v385_v32, %v373_v24 }
 0x103   : > { %662 = vrot.lane.b32.xlu1 %v2923_v25, %s2438_s5  ;;  %660 = vrot.lane.b32.xlu0 %v2928_v30, %s2438_s5 }
 0x104   : > { %v3018_v27 = vmin.f32 %v393_v35, %v489_v51  ;;  %v3020_v8 = vmin.f32 %v392_v37, %v488_v54  ;;  %v445_v16 = vpop.permute.xlu1 %444  ;;  %v447_v29 = vpop.permute.xlu0 %446  ;;  %v396_v49 = vmin.f32 %v384_v33, %v358_v31 }
 0x105   : > { %v466_v19 = vsel %vm232_vm12, 1e+30, %v445_v16  ;;  %v467_v17 = vsel %vm232_vm12, 1e+30, %v447_v29 }
 0x106   : > { %4959 = vst [vmem:[#allocation34_spill] sm:$0xff] %v3018_v27  ;;  %4960 = vst [vmem:[#allocation35_spill] sm:$0xff] %v3020_v8  ;;  %v490_v35 = vmin.f32 %v478_v56, %v466_v19  ;;  %v491_v37 = vmin.f32 %v479_v45, %v467_v17  ;;  %v512_v20 = vrot.slane %v3020_v8, 7  ;;  %v518_v47 = vrot.slane %v3018_v27, 7 }
 0x107   : > { %666 = vrot.lane.b32.xlu1 %v2942_v41, %s2438_s5  ;;  %664 = vrot.lane.b32.xlu0 %v2949_v48, %s2438_s5  ;;  %v548_v44 = vrot.slane %v3020_v8, 1  ;;  %v554_v36 = vrot.slane %v3018_v27, 1 }
 0x108   : > { %v449_v55 = vpop.permute.xlu1 %448  ;;  %v451_v59 = vpop.permute.xlu0 %450  ;;  %v530_v56 = vsel %vm318_vm7, %v518_v47, %v512_v20  ;;  %v3043_v45 = vsel %vm318_vm7, %v512_v20, %v518_v47  ;;  %v3045_v62 = vmin.f32 %v394_v18, %v490_v35  ;;  %v3047_v0 = vmin.f32 %v395_v26, %v491_v37 }
 0x109   : > { %v468_v51 = vsel %vm232_vm12, 1e+30, %v449_v55  ;;  %v469_v54 = vsel %vm232_vm12, 1e+30, %v451_v59  ;;  %v560_v16 = vsel %vm355_vm9, %v548_v44, %v554_v36  ;;  %v728_v18 = vsel %vm217_vm8, 1e+30, %v530_v56 }
 0x10a   : > { %4961 = vst [vmem:[#allocation36_spill] sm:$0xff] %v3045_v62  ;;  %4962 = vst [vmem:[#allocation37_spill] sm:$0xff] %v3047_v0  ;;  %v492_v31 = vmin.f32 %v480_v46, %v468_v51  ;;  %v493_v32 = vmin.f32 %v481_v28, %v469_v54  ;;  %v752_v26 = vmin.f32 %v728_v18, %v3020_v8  ;;  %v513_v17 = vrot.slane %v3045_v62, 7 }
 0x10b   : > { %778 = vrot.lane.b32.xlu1 %v3018_v27, %s2437_s20  ;;  %776 = vrot.lane.b32.xlu0 %v3020_v8, %s2437_s20  ;;  %v566_v29 = vsel %vm355_vm9, %v554_v36, %v548_v44  ;;  %v753_v33 = vmin.f32 %v3043_v45, %v3018_v27  ;;  %v519_v35 = vrot.slane %v3047_v0, 7  ;;  %v549_v37 = vrot.slane %v3045_v62, 1 }
 0x10c   : > { %v3066_v24 = vmin.f32 %v396_v49, %v492_v31  ;;  %v3068_v28 = vmin.f32 %v397_v57, %v493_v32  ;;  %v3070_v46 = vmin.f32 %v752_v26, %v560_v16  ;;  %v741_v19 = vsel %vm224_vm10, 1e+30, %v566_v29 }
 0x10d   : > { %v555_v20 = vrot.slane %v3047_v0, 1  ;;  %v3085_v49 = vmin.f32 %v753_v33, %v741_v19  ;;  %v531_v55 = vsel %vm318_vm7, %v519_v35, %v513_v17  ;;  %v525_v57 = vsel %vm318_vm7, %v513_v17, %v519_v35 }
 0x10e   : > { %4963 = vst [vmem:[#allocation38_spill] sm:$0xff] %v3066_v24  ;;  %4964 = vst [vmem:[#allocation39_spill] sm:$0xff] %v3068_v28  ;;  %v514_v47 = vrot.slane %v3066_v24, 7  ;;  %v520_v44 = vrot.slane %v3068_v28, 7  ;;  %v550_v36 = vrot.slane %v3066_v24, 1  ;;  %v556_v51 = vrot.slane %v3068_v28, 1 }
 0x10f   : > { %782 = vrot.lane.b32.xlu1 %v3047_v0, %s2437_s20  ;;  %780 = vrot.lane.b32.xlu0 %v3045_v62, %s2437_s20  ;;  %v567_v59 = vsel %vm355_vm9, %v555_v20, %v549_v37  ;;  %v561_v54 = vsel %vm355_vm9, %v549_v37, %v555_v20  ;;  %v730_v31 = vsel %vm217_vm8, 1e+30, %v531_v55  ;;  %v755_v18 = vmin.f32 %v525_v57, %v3047_v0 }
 0x110   : > { %v754_v32 = vmin.f32 %v730_v31, %v3045_v62  ;;  %v743_v26 = vsel %vm224_vm10, 1e+30, %v567_v59  ;;  %v532_v33 = vsel %vm318_vm7, %v520_v44, %v514_v47  ;;  %v526_v19 = vsel %vm318_vm7, %v514_v47, %v520_v44 }
 0x111   : > { %v562_v35 = vsel %vm355_vm9, %v550_v36, %v556_v51  ;;  %v732_v37 = vsel %vm217_vm8, 1e+30, %v532_v33  ;;  %v568_v31 = vsel %vm355_vm9, %v556_v51, %v550_v36  ;;  %v757_v47 = vmin.f32 %v526_v19, %v3068_v28 }
 0x112   : > { %v3110_v17 = vmin.f32 %v754_v32, %v561_v54  ;;  %v756_v20 = vmin.f32 %v732_v37, %v3066_v24  ;;  %v745_v5 = vsel %vm224_vm10, 1e+30, %v568_v31  ;;  %v3124_v44 = vmin.f32 %v755_v18, %v743_v26 }
 0x113   : > { %814 = vrot.lane.b32.xlu1 %v3018_v27, %s2438_s5  ;;  %812 = vrot.lane.b32.xlu0 %v3020_v8, %s2438_s5  ;;  %v3130_v60 = vmin.f32 %v757_v47, %v745_v5  ;;  %v536_v36 = vsel %vm217_vm8, -1e+30, %v530_v56  ;;  %v585_v51 = vmax.f32 %v3043_v45, %v3018_v27  ;;  %v573_v26 = vsel %vm224_vm10, -1e+30, %v566_v29 }
 0x114   : > { %v3128_v32 = vmin.f32 %v756_v20, %v562_v35  ;;  %v584_v18 = vmax.f32 %v536_v36, %v3020_v8  ;;  %v538_v5 = vsel %vm217_vm8, -1e+30, %v531_v55  ;;  %v587_v37 = vmax.f32 %v525_v57, %v3047_v0 }
 0x115   : > { %v3149_v56 = vmax.f32 %v585_v51, %v573_v26  ;;  %v586_v45 = vmax.f32 %v538_v5, %v3045_v62  ;;  %v575_v29 = vsel %vm224_vm10, -1e+30, %v567_v59  ;;  %v540_v55 = vsel %vm217_vm8, -1e+30, %v532_v33 }
 0x116   : > { %v3152_v20 = vmax.f32 %v584_v18, %v560_v16  ;;  %v3163_v47 = vmax.f32 %v587_v37, %v575_v29  ;;  %v589_v57 = vmax.f32 %v526_v19, %v3068_v28  ;;  %v588_v36 = vmax.f32 %v540_v55, %v3066_v24 }
 0x117   : > { %818 = vrot.lane.b32.xlu1 %v3047_v0, %s2438_s5  ;;  %816 = vrot.lane.b32.xlu0 %v3045_v62, %s2438_s5  ;;  %4965 = vst [vmem:[#allocation40_spill] sm:$0xff] %v3149_v56  ;;  %v3166_v16 = vmax.f32 %v586_v45, %v561_v54  ;;  %v577_v59 = vsel %vm224_vm10, -1e+30, %v568_v31 }
 0x118   : > { %4966 = vst [vmem:[#allocation41_spill] sm:$0xff] %v3152_v20  ;;  %4967 = vst [vmem:[#allocation42_spill] sm:$0xff] %v3163_v47  ;;  %v3175_v33 = vmax.f32 %v589_v57, %v577_v59  ;;  %v3177_v51 = vmax.f32 %v588_v36, %v562_v35 }
 0x119   : > { %4968 = vst [vmem:[#allocation43_spill] sm:$0xff] %v3166_v16 }
 0x11a   : > { %4969 = vst [vmem:[#allocation44_spill] sm:$0xff] %v3175_v33  ;;  %4970 = vst [vmem:[#allocation45_spill] sm:$0xff] %v3177_v51 }
 0x11b   : > { %786 = vrot.lane.b32.xlu1 %v3068_v28, %s2437_s20  ;;  %784 = vrot.lane.b32.xlu0 %v3066_v24, %s2437_s20 }
 0x11f   : > { %822 = vrot.lane.b32.xlu1 %v3068_v28, %s2438_s5  ;;  %820 = vrot.lane.b32.xlu0 %v3066_v24, %s2438_s5 }
 0x123   : > { %610 = vrot.lane.b32.xlu1 %v3149_v56, %s2437_s20  ;;  %608 = vrot.lane.b32.xlu0 %v3152_v20, %s2437_s20 }
 0x127   : > { %614 = vrot.lane.b32.xlu1 %v3163_v47, %s2437_s20  ;;  %612 = vrot.lane.b32.xlu0 %v3166_v16, %s2437_s20 }
 0x12b   : > { %618 = vrot.lane.b32.xlu1 %v3175_v33, %s2437_s20  ;;  %616 = vrot.lane.b32.xlu0 %v3177_v51, %s2437_s20 }
 0x12f   : > { %646 = vrot.lane.b32.xlu1 %v3149_v56, %s2438_s5  ;;  %644 = vrot.lane.b32.xlu0 %v3152_v20, %s2438_s5 }
 0x133   : > { %650 = vrot.lane.b32.xlu1 %v3163_v47, %s2438_s5  ;;  %648 = vrot.lane.b32.xlu0 %v3166_v16, %s2438_s5 }
 0x137   : > { %654 = vrot.lane.b32.xlu1 %v3175_v33, %s2438_s5  ;;  %652 = vrot.lane.b32.xlu0 %v3177_v51, %s2438_s5 }
 0x14d   : > { %v791_v54 = vpop.permute.xlu1 %790  ;;  %v789_v19 = vpop.permute.xlu0 %788 }
 0x14e   : > { %v807_v31 = vsel %vm229_vm11, 1e+30, %v791_v54  ;;  %v806_v26 = vsel %vm229_vm11, 1e+30, %v789_v19 }
 0x14f   : > { %v855_v5 = vmin.f32 %v807_v31, %v2789_v40  ;;  %v854_v45 = vmin.f32 %v806_v26, %v2791_v42 }
 0x151   : > { %v795_v35 = vpop.permute.xlu1 %794  ;;  %v793_v18 = vpop.permute.xlu0 %792 }
 0x152   : > { %v809_v29 = vsel %vm229_vm11, 1e+30, %v795_v35  ;;  %v808_v36 = vsel %vm229_vm11, 1e+30, %v793_v18 }
 0x153   : > { %v857_v31 = vmin.f32 %v809_v29, %v2787_v39  ;;  %v856_v35 = vmin.f32 %v808_v36, %v2785_v38 }
 0x155   : > { %v827_v37 = vpop.permute.xlu1 %826  ;;  %v825_v57 = vpop.permute.xlu0 %824 }
 0x156   : > { %v843_v55 = vsel %vm232_vm12, 1e+30, %v827_v37  ;;  %v842_v54 = vsel %vm232_vm12, 1e+30, %v825_v57 }
 0x157   : > { %v867_v59 = vmin.f32 %v855_v5, %v843_v55  ;;  %v866_v19 = vmin.f32 %v854_v45, %v842_v54 }
 0x159   : > { %v3211_v51 = vmin.f32 %v2869_v43, %v867_v59  ;;  %v831_v26 = vpop.permute.xlu1 %830  ;;  %v3215_v16 = vmin.f32 %v2839_v21, %v866_v19  ;;  %v829_v18 = vpop.permute.xlu0 %828 }
 0x15a   : > { %v845_v37 = vsel %vm232_vm12, 1e+30, %v831_v26  ;;  %v844_v55 = vsel %vm232_vm12, 1e+30, %v829_v18 }
 0x15b   : > { %4971 = vst [vmem:[#allocation46_spill] sm:$0xff] %v3211_v51  ;;  %4972 = vst [vmem:[#allocation47_spill] sm:$0xff] %v3215_v16  ;;  %v869_v5 = vmin.f32 %v857_v31, %v845_v37  ;;  %1210 = vrot.lane.b32.xlu1 %v3211_v51, %s2437_s20  ;;  %v893_v43 = vrot.slane %v3211_v51, 7  ;;  %v868_v45 = vmin.f32 %v856_v35, %v844_v55  ;;  %1208 = vrot.lane.b32.xlu0 %v3215_v16, %s2437_s20 }
 0x15c   : > { %v887_v21 = vrot.slane %v3215_v16, 7  ;;  %v923_v36 = vrot.slane %v3215_v16, 1  ;;  %v929_v59 = vrot.slane %v3211_v51, 1 }
 0x15d   : > { %v3228_v29 = vmin.f32 %v2883_v50, %v869_v5  ;;  %v799_v57 = vpop.permute.xlu1 %798  ;;  %v3233_v54 = vmin.f32 %v2859_v34, %v868_v45  ;;  %v797_v31 = vpop.permute.xlu0 %796 }
 0x15e   : > { %v811_v19 = vsel %vm229_vm11, 1e+30, %v799_v57  ;;  %v905_v26 = vsel %vm318_vm7, %v893_v43, %v887_v21  ;;  %v810_v35 = vsel %vm229_vm11, 1e+30, %v797_v31  ;;  %v899_v37 = vsel %vm318_vm7, %v887_v21, %v893_v43 }
 0x15f   : > { %4973 = vst [vmem:[#allocation48_spill] sm:$0xff] %v3228_v29  ;;  %4974 = vst [vmem:[#allocation49_spill] sm:$0xff] %v3233_v54  ;;  %1214 = vrot.lane.b32.xlu1 %v3228_v29, %s2437_s20  ;;  %v1154_v50 = vsel %vm217_vm8, 1e+30, %v905_v26  ;;  %1212 = vrot.lane.b32.xlu0 %v3233_v54, %s2437_s20  ;;  %v859_v18 = vmin.f32 %v811_v19, %v2826_v14  ;;  %v3253_v55 = vsel %vm355_vm9, %v923_v36, %v929_v59 }
 0x160   : > { %v1178_v34 = vmin.f32 %v1154_v50, %v3215_v16  ;;  %v941_v45 = vsel %vm355_vm9, %v929_v59, %v923_v36  ;;  %v1179_v57 = vmin.f32 %v899_v37, %v3211_v51  ;;  %v858_v31 = vmin.f32 %v810_v35, %v2824_v13 }
 0x161   : > { %v835_v5 = vpop.permute.xlu1 %834  ;;  %v833_v20 = vpop.permute.xlu0 %832  ;;  %v888_v21 = vrot.slane %v3233_v54, 7  ;;  %v1167_v36 = vsel %vm224_vm10, 1e+30, %v941_v45  ;;  %v924_v14 = vrot.slane %v3233_v54, 1  ;;  %v930_v23 = vrot.slane %v3228_v29, 1 }
 0x162   : > { %v847_v50 = vsel %vm232_vm12, 1e+30, %v835_v5  ;;  %v3262_v43 = vmin.f32 %v1178_v34, %v3253_v55  ;;  %v846_v19 = vsel %vm232_vm12, 1e+30, %v833_v20  ;;  %v894_v5 = vrot.slane %v3228_v29, 7 }
 0x163   : > { %1246 = vrot.lane.b32.xlu1 %v3211_v51, %s2438_s5  ;;  %v871_v59 = vmin.f32 %v859_v18, %v847_v50  ;;  %v870_v35 = vmin.f32 %v858_v31, %v846_v19  ;;  %1244 = vrot.lane.b32.xlu0 %v3215_v16, %s2438_s5  ;;  %v3278_v20 = vmin.f32 %v1179_v57, %v1167_v36  ;;  %v951_v2 = vsel %vm224_vm10, -1e+30, %v941_v45 }
 0x164   : > { %v906_v18 = vsel %vm318_vm7, %v894_v5, %v888_v21  ;;  %v900_v57 = vsel %vm318_vm7, %v888_v21, %v894_v5  ;;  %v936_v36 = vsel %vm355_vm9, %v924_v14, %v930_v23  ;;  %v914_v21 = vsel %vm217_vm8, -1e+30, %v905_v26 }
 0x165   : > { %v3274_v34 = vpop.permute.xlu1 %622  ;;  %v3281_v22 = vmin.f32 %v2889_v52, %v870_v35  ;;  %v3283_v13 = vpop.permute.xlu0 %620  ;;  %v1156_v31 = vsel %vm217_vm8, 1e+30, %v906_v18  ;;  %v3292_v50 = vmin.f32 %v2891_v53, %v871_v59  ;;  %v942_v35 = vsel %vm355_vm9, %v930_v23, %v924_v14 }
 0x166   : > { %4975 = vst [vmem:[#allocation50_spill] sm:$0xff] %v3274_v34  ;;  %4977 = vst [vmem:[#allocation52_spill] sm:$0xff] %v3283_v13  ;;  %v1180_v52 = vmin.f32 %v1156_v31, %v3233_v54  ;;  %v1181_v41 = vmin.f32 %v900_v57, %v3228_v29  ;;  %v1169_v5 = vsel %vm224_vm10, 1e+30, %v942_v35  ;;  %v963_v23 = vmax.f32 %v899_v37, %v3211_v51 }
 0x167   : > { %4976 = vst [vmem:[#allocation51_spill] sm:$0xff] %v3281_v22  ;;  %1250 = vrot.lane.b32.xlu1 %v3228_v29, %s2438_s5  ;;  %4978 = vst [vmem:[#allocation53_spill] sm:$0xff] %v3292_v50  ;;  %1248 = vrot.lane.b32.xlu0 %v3233_v54, %s2438_s5  ;;  %v889_v48 = vrot.slane %v3281_v22, 7  ;;  %v895_v14 = vrot.slane %v3292_v50, 7  ;;  %v925_v31 = vrot.slane %v3281_v22, 1  ;;  %v962_v3 = vmax.f32 %v914_v21, %v3215_v16 }
 0x168   : > { %v3308_v59 = vmin.f32 %v1180_v52, %v936_v36  ;;  %v931_v52 = vrot.slane %v3292_v50, 1  ;;  %v3327_v26 = vmin.f32 %v1181_v41, %v1169_v5  ;;  %v3344_v45 = vmax.f32 %v963_v23, %v951_v2 }
 0x169   : > { %v3299_v19 = vpop.permute.xlu1 %626  ;;  %v3306_v53 = vpop.permute.xlu0 %624  ;;  %v907_v37 = vsel %vm318_vm7, %v895_v14, %v889_v48  ;;  %v901_v10 = vsel %vm318_vm7, %v889_v48, %v895_v14  ;;  %v965_v14 = vmax.f32 %v900_v57, %v3228_v29  ;;  %v3360_v2 = vmax.f32 %v962_v3, %v3253_v55 }
 0x16a   : > { %4979 = vst [vmem:[#allocation54_spill] sm:$0xff] %v3299_v19  ;;  %v1158_v41 = vsel %vm217_vm8, 1e+30, %v907_v37  ;;  %4982 = vst [vmem:[#allocation57_spill] sm:$0xff] %v3344_v45  ;;  %v943_v5 = vsel %vm355_vm9, %v931_v52, %v925_v31  ;;  %v1183_v39 = vmin.f32 %v901_v10, %v3292_v50  ;;  %v918_v57 = vsel %vm217_vm8, -1e+30, %v907_v37 }
 0x16b   : > { %1218 = vrot.lane.b32.xlu1 %v3292_v50, %s2437_s20  ;;  %1216 = vrot.lane.b32.xlu0 %v3281_v22, %s2437_s20  ;;  %v1182_v21 = vmin.f32 %v1158_v41, %v3281_v22  ;;  %4985 = vst [vmem:[#allocation60_spill] sm:$0xff] %v3360_v2  ;;  %v953_v41 = vsel %vm224_vm10, -1e+30, %v942_v35  ;;  %v955_v37 = vsel %vm224_vm10, -1e+30, %v943_v5 }
 0x16c   : > { %v3377_v55 = vmax.f32 %v965_v14, %v953_v41 }
 0x16d   : > { %v3323_v56 = vpop.permute.xlu1 %630  ;;  %v3329_v61 = vpop.permute.xlu0 %628 }
 0x16e   : > { %4980 = vst [vmem:[#allocation55_spill] sm:$0xff] %v3323_v56  ;;  %4981 = vst [vmem:[#allocation56_spill] sm:$0xff] %v3329_v61  ;;  %v916_v56 = vsel %vm217_vm8, -1e+30, %v906_v18  ;;  %v937_v18 = vsel %vm355_vm9, %v925_v31, %v931_v52  ;;  %v1171_v61 = vsel %vm224_vm10, 1e+30, %v943_v5 }
 0x16f   : > { %1254 = vrot.lane.b32.xlu1 %v3292_v50, %s2438_s5  ;;  %1252 = vrot.lane.b32.xlu0 %v3281_v22, %s2438_s5  ;;  %v964_v23 = vmax.f32 %v916_v56, %v3233_v54  ;;  %v3365_v12 = vmin.f32 %v1182_v21, %v937_v18  ;;  %v3371_v31 = vmin.f32 %v1183_v39, %v1171_v61 }
 0x170   : > { %4987 = vst [vmem:[#allocation62_spill] sm:$0xff] %v3377_v55  ;;  %v967_v56 = vmax.f32 %v901_v10, %v3292_v50  ;;  %v966_v21 = vmax.f32 %v918_v57, %v3281_v22 }
 0x171   : > { %v3349_v48 = vpop.permute.xlu1 %658  ;;  %v3357_v25 = vpop.permute.xlu0 %656  ;;  %v3382_v52 = vmax.f32 %v964_v23, %v936_v36 }
 0x172   : > { %4983 = vst [vmem:[#allocation58_spill] sm:$0xff] %v3349_v48  ;;  %4984 = vst [vmem:[#allocation59_spill] sm:$0xff] %v3357_v25  ;;  %v3393_v39 = vmax.f32 %v967_v56, %v955_v37  ;;  %v3397_v14 = vmax.f32 %v966_v21, %v937_v18 }
 0x173   : > { %994 = vrot.lane.b32.xlu1 %v3344_v45, %s2437_s20  ;;  %992 = vrot.lane.b32.xlu0 %v3360_v2, %s2437_s20 }
 0x174   : > { %4989 = vst [vmem:[#allocation64_spill] sm:$0xff] %v3393_v39  ;;  %4991 = vst [vmem:[#allocation66_spill] sm:$0xff] %v3397_v14 }
 0x175   : > { %v3375_v3 = vpop.permute.xlu1 %662  ;;  %v3380_v35 = vpop.permute.xlu0 %660 }
 0x176   : > { %4986 = vst [vmem:[#allocation61_spill] sm:$0xff] %v3375_v3 }
 0x177   : > { %998 = vrot.lane.b32.xlu1 %v3377_v55, %s2437_s20  ;;  %996 = vrot.lane.b32.xlu0 %v3382_v52, %s2437_s20 }
 0x179   : > { %v3391_v61 = vpop.permute.xlu1 %666  ;;  %v3395_v10 = vpop.permute.xlu0 %664 }
 0x17a   : > { %4988 = vst [vmem:[#allocation63_spill] sm:$0xff] %v3391_v61  ;;  %4990 = vst [vmem:[#allocation65_spill] sm:$0xff] %v3395_v10 }
 0x17b   : > { %1002 = vrot.lane.b32.xlu1 %v3393_v39, %s2437_s20  ;;  %1000 = vrot.lane.b32.xlu0 %v3397_v14, %s2437_s20 }
 0x17d   : > { %v779_v36 = vpop.permute.xlu1 %778  ;;  %v777_v5 = vpop.permute.xlu0 %776 }
 0x17e   : > { %v801_v41 = vsel %vm229_vm11, 1e+30, %v779_v36  ;;  %v800_v57 = vsel %vm229_vm11, 1e+30, %v777_v5 }
 0x17f   : > { %1030 = vrot.lane.b32.xlu1 %v3344_v45, %s2438_s5  ;;  %1028 = vrot.lane.b32.xlu0 %v3360_v2, %s2438_s5  ;;  %v849_v56 = vmin.f32 %v801_v41, %v3018_v27  ;;  %v848_v37 = vmin.f32 %v800_v57, %v3020_v8 }
 0x181   : > { %v783_v23 = vpop.permute.xlu1 %782  ;;  %v781_v18 = vpop.permute.xlu0 %780 }
 0x182   : > { %v803_v61 = vsel %vm229_vm11, 1e+30, %v783_v23  ;;  %v802_v36 = vsel %vm229_vm11, 1e+30, %v781_v18 }
 0x183   : > { %1034 = vrot.lane.b32.xlu1 %v3377_v55, %s2438_s5  ;;  %v851_v57 = vmin.f32 %v803_v61, %v3047_v0  ;;  %v850_v23 = vmin.f32 %v802_v36, %v3045_v62 }
 0x185   : > { %v815_v21 = vpop.permute.xlu1 %814  ;;  %v813_v10 = vpop.permute.xlu0 %812 }
 0x186   : > { %v837_v3 = vsel %vm232_vm12, 1e+30, %v815_v21  ;;  %v836_v5 = vsel %vm232_vm12, 1e+30, %v813_v10 }
 0x187   : > { %v861_v11 = vmin.f32 %v849_v56, %v837_v3  ;;  %1038 = vrot.lane.b32.xlu1 %v3393_v39, %s2438_s5  ;;  %v860_v41 = vmin.f32 %v848_v37, %v836_v5 }
 0x189   : > { %v819_v8 = vpop.permute.xlu1 %818  ;;  %v3428_v27 = vmin.f32 %v3070_v46, %v860_v41  ;;  %v3431_v21 = vmin.f32 %v3085_v49, %v861_v11  ;;  %v817_v18 = vpop.permute.xlu0 %816 }
 0x18a   : > { %v839_v10 = vsel %vm232_vm12, 1e+30, %v819_v8  ;;  %v838_v3 = vsel %vm232_vm12, 1e+30, %v817_v18 }
 0x18b   : > { %4992 = vst [vmem:[#allocation67_spill] sm:$0xff] %v3428_v27  ;;  %4993 = vst [vmem:[#allocation68_spill] sm:$0xff] %v3431_v21  ;;  %v863_v56 = vmin.f32 %v851_v57, %v839_v10  ;;  %1032 = vrot.lane.b32.xlu1 %v3382_v52, %s2438_s5  ;;  %v862_v61 = vmin.f32 %v850_v23, %v838_v3  ;;  %1196 = vrot.lane.b32.xlu0 %v3428_v27, %s2437_s20  ;;  %v884_v8 = vrot.slane %v3428_v27, 7 }
 0x18c   : > { %v890_v36 = vrot.slane %v3431_v21, 7  ;;  %v926_v23 = vrot.slane %v3431_v21, 1 }
 0x18d   : > { %v787_v46 = vpop.permute.xlu1 %786  ;;  %v3442_v37 = vmin.f32 %v3110_v17, %v862_v61  ;;  %v785_v11 = vpop.permute.xlu0 %784  ;;  %v3449_v5 = vmin.f32 %v3124_v44, %v863_v56  ;;  %v920_v56 = vrot.slane %v3428_v27, 1 }
 0x18e   : > { %v805_v49 = vsel %vm229_vm11, 1e+30, %v787_v46  ;;  %v804_v41 = vsel %vm229_vm11, 1e+30, %v785_v11  ;;  %v902_v3 = vsel %vm318_vm7, %v890_v36, %v884_v8 }
 0x18f   : > { %4994 = vst [vmem:[#allocation69_spill] sm:$0xff] %v3442_v37  ;;  %4995 = vst [vmem:[#allocation70_spill] sm:$0xff] %v3449_v5  ;;  %1036 = vrot.lane.b32.xlu1 %v3397_v14, %s2438_s5  ;;  %1200 = vrot.lane.b32.xlu0 %v3442_v37, %s2437_s20  ;;  %v853_v17 = vmin.f32 %v805_v49, %v3068_v28  ;;  %v852_v18 = vmin.f32 %v804_v41, %v3066_v24  ;;  %v885_v11 = vrot.slane %v3442_v37, 7 }
 0x190   : > { %v891_v49 = vrot.slane %v3449_v5, 7 }
 0x191   : > { %v823_v57 = vpop.permute.xlu1 %822  ;;  %v821_v10 = vpop.permute.xlu0 %820 }
 0x192   : > { %v841_v44 = vsel %vm232_vm12, 1e+30, %v823_v57  ;;  %v840_v61 = vsel %vm232_vm12, 1e+30, %v821_v10  ;;  %v927_v10 = vrot.slane %v3449_v5, 1 }
 0x193   : > { %v865_v46 = vmin.f32 %v853_v17, %v841_v44  ;;  %1198 = vrot.lane.b32.xlu1 %v3431_v21, %s2437_s20  ;;  %v864_v41 = vmin.f32 %v852_v18, %v840_v61  ;;  %1232 = vrot.lane.b32.xlu0 %v3428_v27, %s2438_s5  ;;  %v896_v17 = vsel %vm318_vm7, %v884_v8, %v890_v36  ;;  %v1148_v44 = vsel %vm217_vm8, 1e+30, %v902_v3 }
 0x194   : > { %v921_v18 = vrot.slane %v3442_v37, 1  ;;  %v897_v8 = vsel %vm318_vm7, %v885_v11, %v891_v49  ;;  %v1172_v62 = vmin.f32 %v1148_v44, %v3428_v27  ;;  %v1173_v39 = vmin.f32 %v896_v17, %v3431_v21 }
 0x195   : > { %v3474_v57 = vmin.f32 %v3130_v60, %v865_v46  ;;  %v3477_v24 = vmin.f32 %v3128_v32, %v864_v41  ;;  %v938_v60 = vsel %vm355_vm9, %v926_v23, %v920_v56  ;;  %v903_v32 = vsel %vm318_vm7, %v891_v49, %v885_v11 }
 0x196   : > { %v1150_v14 = vsel %vm217_vm8, 1e+30, %v903_v32  ;;  %v1161_v55 = vsel %vm224_vm10, 1e+30, %v938_v60  ;;  %v939_v11 = vsel %vm355_vm9, %v927_v10, %v921_v18  ;;  %v932_v49 = vsel %vm355_vm9, %v920_v56, %v926_v23 }
 0x197   : > { %4996 = vst [vmem:[#allocation71_spill] sm:$0xff] %v3474_v57  ;;  %4997 = vst [vmem:[#allocation72_spill] sm:$0xff] %v3477_v24  ;;  %1202 = vrot.lane.b32.xlu1 %v3449_v5, %s2437_s20  ;;  %v892_v61 = vrot.slane %v3474_v57, 7  ;;  %1236 = vrot.lane.b32.xlu0 %v3442_v37, %s2438_s5  ;;  %v886_v36 = vrot.slane %v3477_v24, 7  ;;  %v922_v46 = vrot.slane %v3477_v24, 1  ;;  %v928_v41 = vrot.slane %v3474_v57, 1 }
 0x198   : > { %v959_v19 = vmax.f32 %v897_v8, %v3449_v5  ;;  %v3516_v40 = vmin.f32 %v1172_v62, %v932_v49  ;;  %v933_v58 = vsel %vm355_vm9, %v921_v18, %v927_v10  ;;  %v1174_v48 = vmin.f32 %v1150_v14, %v3442_v37 }
 0x199   : > { %v904_v44 = vsel %vm318_vm7, %v892_v61, %v886_v36  ;;  %v940_v42 = vsel %vm355_vm9, %v928_v41, %v922_v46  ;;  %v3523_v7 = vmin.f32 %v1173_v39, %v1161_v55  ;;  %v898_v23 = vsel %vm318_vm7, %v886_v36, %v892_v61 }
 0x19a   : > { %v1152_v56 = vsel %vm217_vm8, 1e+30, %v904_v44  ;;  %v1163_v62 = vsel %vm224_vm10, 1e+30, %v939_v11  ;;  %v1175_v45 = vmin.f32 %v897_v8, %v3449_v5  ;;  %v947_v10 = vsel %vm224_vm10, -1e+30, %v939_v11 }
 0x19b   : > { %1234 = vrot.lane.b32.xlu1 %v3431_v21, %s2438_s5  ;;  %1204 = vrot.lane.b32.xlu0 %v3477_v24, %s2437_s20  ;;  %v3536_v14 = vmin.f32 %v1174_v48, %v933_v58  ;;  %v1176_v55 = vmin.f32 %v1152_v56, %v3477_v24  ;;  %v1165_v18 = vsel %vm224_vm10, 1e+30, %v940_v42  ;;  %v934_v61 = vsel %vm355_vm9, %v922_v46, %v928_v41 }
 0x19c   : > { %v3541_v39 = vmin.f32 %v1175_v45, %v1163_v62  ;;  %v1177_v8 = vmin.f32 %v898_v23, %v3474_v57  ;;  %v3548_v36 = vmax.f32 %v959_v19, %v947_v10  ;;  %v961_v48 = vmax.f32 %v898_v23, %v3474_v57 }
 0x19d   : > { %v3551_v11 = vmin.f32 %v1176_v55, %v934_v61  ;;  %v949_v45 = vsel %vm224_vm10, -1e+30, %v940_v42  ;;  %v908_v56 = vsel %vm217_vm8, -1e+30, %v902_v3  ;;  %v957_v19 = vmax.f32 %v896_v17, %v3431_v21  ;;  %v3580_v55 = vpop.permute.xlu1 %610 }
 0x19e   : > { %v3559_v62 = vmin.f32 %v1177_v8, %v1165_v18  ;;  %v3564_v46 = vmax.f32 %v961_v48, %v949_v45  ;;  %v956_v41 = vmax.f32 %v908_v56, %v3428_v27  ;;  %v945_v23 = vsel %vm224_vm10, -1e+30, %v938_v60  ;;  %4998 = vst [vmem:[#allocation73_spill] sm:$0xff] %v3580_v55  ;;  %v3586_v18 = vpop.permute.xlu0 %608 }
 0x19f   : > { %1238 = vrot.lane.b32.xlu1 %v3449_v5, %s2438_s5  ;;  %1240 = vrot.lane.b32.xlu0 %v3477_v24, %s2438_s5  ;;  %v910_v42 = vsel %vm217_vm8, -1e+30, %v903_v32  ;;  %v3575_v3 = vmax.f32 %v957_v19, %v945_v23  ;;  %v912_v60 = vsel %vm217_vm8, -1e+30, %v904_v44  ;;  %4999 = vst [vmem:[#allocation74_spill] sm:$0xff] %v3586_v18 }
 0x1a0   : > { %v3577_v10 = vmax.f32 %v956_v41, %v932_v49  ;;  %v958_v17 = vmax.f32 %v910_v42, %v3442_v37  ;;  %v960_v49 = vmax.f32 %v912_v60, %v3477_v24 }
 0x1a1   : > { %v3597_v8 = vpop.permute.xlu1 %614 }
 0x1a2   : > { %v3590_v32 = vmax.f32 %v958_v17, %v933_v58  ;;  %5000 = vst [vmem:[#allocation75_spill] sm:$0xff] %v3597_v8  ;;  %v3599_v48 = vpop.permute.xlu0 %612  ;;  %v3601_v44 = vmax.f32 %v960_v49, %v934_v61 }
 0x1a3   : > { %1206 = vrot.lane.b32.xlu1 %v3474_v57, %s2437_s20  ;;  %1022 = vrot.lane.b32.xlu0 %v3548_v36, %s2438_s5  ;;  %5001 = vst [vmem:[#allocation76_spill] sm:$0xff] %v3599_v48 }
 0x1a5   : > { %v3607_v58 = vpop.permute.xlu1 %618 }
 0x1a6   : > { %5002 = vst [vmem:[#allocation77_spill] sm:$0xff] %v3607_v58  ;;  %v3611_v45 = vpop.permute.xlu0 %616 }
 0x1a7   : > { %1242 = vrot.lane.b32.xlu1 %v3474_v57, %s2438_s5  ;;  %1026 = vrot.lane.b32.xlu0 %v3564_v46, %s2438_s5  ;;  %5003 = vst [vmem:[#allocation78_spill] sm:$0xff] %v3611_v45 }
 0x1a9   : > { %v3617_v61 = vpop.permute.xlu1 %646 }
 0x1aa   : > { %5004 = vst [vmem:[#allocation79_spill] sm:$0xff] %v3617_v61  ;;  %v3619_v56 = vpop.permute.xlu0 %644 }
 0x1ab   : > { %982 = vrot.lane.b32.xlu1 %v3575_v3, %s2437_s20  ;;  %980 = vrot.lane.b32.xlu0 %v3577_v10, %s2437_s20  ;;  %5005 = vst [vmem:[#allocation80_spill] sm:$0xff] %v3619_v56 }
 0x1ad   : > { %v3623_v19 = vpop.permute.xlu1 %650 }
 0x1ae   : > { %5006 = vst [vmem:[#allocation81_spill] sm:$0xff] %v3623_v19  ;;  %v3625_v41 = vpop.permute.xlu0 %648 }
 0x1af   : > { %986 = vrot.lane.b32.xlu1 %v3548_v36, %s2437_s20  ;;  %984 = vrot.lane.b32.xlu0 %v3590_v32, %s2437_s20  ;;  %5007 = vst [vmem:[#allocation82_spill] sm:$0xff] %v3625_v41 }
 0x1b1   : > { %v3627_v23 = vpop.permute.xlu1 %654 }
 0x1b2   : > { %5008 = vst [vmem:[#allocation83_spill] sm:$0xff] %v3627_v23  ;;  %v3629_v42 = vpop.permute.xlu0 %652 }
 0x1b3   : > { %990 = vrot.lane.b32.xlu1 %v3564_v46, %s2437_s20  ;;  %988 = vrot.lane.b32.xlu0 %v3601_v44, %s2437_s20  ;;  %5009 = vst [vmem:[#allocation84_spill] sm:$0xff] %v3629_v42 }
 0x1b7   : > { %1018 = vrot.lane.b32.xlu1 %v3575_v3, %s2438_s5  ;;  %1016 = vrot.lane.b32.xlu0 %v3577_v10, %s2438_s5 }
 0x1bb   : > { %1020 = vrot.lane.b32.xlu0 %v3590_v32, %s2438_s5 }
 0x1bf   : > { %1024 = vrot.lane.b32.xlu0 %v3601_v44, %s2438_s5 }
 0x1cd   : > { %v1211_v17 = vpop.permute.xlu1 %1210  ;;  %v1209_v60 = vpop.permute.xlu0 %1208 }
 0x1ce   : > { %v1227_v45 = vsel %vm229_vm11, 1e+30, %v1211_v17  ;;  %v1226_v56 = vsel %vm229_vm11, 1e+30, %v1209_v60 }
 0x1cf   : > { %v1275_v18 = vmin.f32 %v1227_v45, %v3211_v51  ;;  %v1274_v55 = vmin.f32 %v1226_v56, %v3215_v16 }
 0x1d1   : > { %v1215_v49 = vpop.permute.xlu1 %1214  ;;  %v1213_v48 = vpop.permute.xlu0 %1212 }
 0x1d2   : > { %v1229_v41 = vsel %vm229_vm11, 1e+30, %v1215_v49  ;;  %v1228_v2 = vsel %vm229_vm11, 1e+30, %v1213_v48 }
 0x1d3   : > { %v1277_v45 = vmin.f32 %v1229_v41, %v3228_v29  ;;  %v1276_v49 = vmin.f32 %v1228_v2, %v3233_v54 }
 0x1d5   : > { %v1247_v61 = vpop.permute.xlu1 %1246  ;;  %v1245_v25 = vpop.permute.xlu0 %1244 }
 0x1d6   : > { %v1263_v42 = vsel %vm232_vm12, 1e+30, %v1247_v61  ;;  %v1262_v17 = vsel %vm232_vm12, 1e+30, %v1245_v25 }
 0x1d7   : > { %v1287_v34 = vmin.f32 %v1275_v18, %v1263_v42  ;;  %v1286_v60 = vmin.f32 %v1274_v55, %v1262_v17 }
 0x1d9   : > { %v3647_v51 = vmin.f32 %v3278_v20, %v1287_v34  ;;  %v1251_v56 = vpop.permute.xlu1 %1250  ;;  %v3651_v16 = vmin.f32 %v3262_v43, %v1286_v60  ;;  %v1249_v61 = vpop.permute.xlu0 %1248 }
 0x1da   : > { %v1265_v48 = vsel %vm232_vm12, 1e+30, %v1251_v56  ;;  %v1264_v25 = vsel %vm232_vm12, 1e+30, %v1249_v61 }
 0x1db   : > { %v1289_v18 = vmin.f32 %v1277_v45, %v1265_v48  ;;  %1630 = vrot.lane.b32.xlu0 %v3647_v51, %s2437_s20  ;;  %v1288_v55 = vmin.f32 %v1276_v49, %v1264_v25  ;;  %1628 = vrot.lane.b32.xlu1 %v3651_v16, %s2437_s20  ;;  %v1343_v45 = vrot.slane %v3651_v16, 1  ;;  %v1349_v56 = vrot.slane %v3647_v51, 1 }
 0x1dd   : > { %v3662_v34 = vmin.f32 %v3327_v26, %v1289_v18  ;;  %v1219_v43 = vpop.permute.xlu1 %1218  ;;  %v3665_v20 = vmin.f32 %v3308_v59, %v1288_v55  ;;  %v1217_v2 = vpop.permute.xlu0 %1216  ;;  %v1313_v26 = vrot.slane %v3647_v51, 7  ;;  %v1307_v59 = vrot.slane %v3651_v16, 7 }
 0x1de   : > { %v1231_v41 = vsel %vm229_vm11, 1e+30, %v1219_v43  ;;  %v1230_v42 = vsel %vm229_vm11, 1e+30, %v1217_v2 }
 0x1df   : > { %1634 = vrot.lane.b32.xlu0 %v3662_v34, %s2437_s20  ;;  %1632 = vrot.lane.b32.xlu1 %v3665_v20, %s2437_s20  ;;  %v1279_v17 = vmin.f32 %v1231_v41, %v3292_v50  ;;  %v1278_v49 = vmin.f32 %v1230_v42, %v3281_v22  ;;  %v1308_v25 = vrot.slane %v3665_v20, 7  ;;  %v1314_v18 = vrot.slane %v3662_v34, 7 }
 0x1e0   : > { %v1344_v2 = vrot.slane %v3665_v20, 1  ;;  %v1350_v41 = vrot.slane %v3662_v34, 1 }
 0x1e1   : > { %v1255_v60 = vpop.permute.xlu1 %1254  ;;  %v1253_v61 = vpop.permute.xlu0 %1252 }
 0x1e2   : > { %v1267_v48 = vsel %vm232_vm12, 1e+30, %v1255_v60  ;;  %v1266_v55 = vsel %vm232_vm12, 1e+30, %v1253_v61  ;;  %v1325_v61 = vsel %vm318_vm7, %v1313_v26, %v1307_v59 }
 0x1e3   : > { %v1291_v43 = vmin.f32 %v1279_v17, %v1267_v48  ;;  %1666 = vrot.lane.b32.xlu0 %v3647_v51, %s2438_s5  ;;  %v1290_v42 = vmin.f32 %v1278_v49, %v1266_v55  ;;  %1664 = vrot.lane.b32.xlu1 %v3651_v16, %s2438_s5  ;;  %v1319_v17 = vsel %vm318_vm7, %v1307_v59, %v1313_v26  ;;  %v1334_v29 = vsel %vm217_vm8, -1e+30, %v1325_v61 }
 0x1e4   : > { %v1320_v49 = vsel %vm318_vm7, %v1308_v25, %v1314_v18  ;;  %v1362_v48 = vsel %vm355_vm9, %v1350_v41, %v1344_v2  ;;  %v1599_v13 = vmin.f32 %v1319_v17, %v3647_v51  ;;  %v1574_v28 = vsel %vm217_vm8, 1e+30, %v1325_v61 }
 0x1e5   : > { %v3694_v60 = vmin.f32 %v3371_v31, %v1291_v43  ;;  %v3696_v50 = vpop.permute.xlu1 %994  ;;  %v3699_v22 = vmin.f32 %v3365_v12, %v1290_v42  ;;  %v1361_v31 = vsel %vm355_vm9, %v1349_v56, %v1343_v45  ;;  %v3713_v12 = vpop.permute.xlu0 %992  ;;  %v1589_v23 = vsel %vm224_vm10, 1e+30, %v1362_v48 }
 0x1e6   : > { %5011 = vst [vmem:[#allocation86_spill] sm:$0xff] %v3696_v50  ;;  %5013 = vst [vmem:[#allocation88_spill] sm:$0xff] %v3713_v12  ;;  %v1601_v50 = vmin.f32 %v1320_v49, %v3662_v34  ;;  %v1326_v12 = vsel %vm318_vm7, %v1314_v18, %v1308_v25  ;;  %v1587_v4 = vsel %vm224_vm10, 1e+30, %v1361_v31  ;;  %v1598_v63 = vmin.f32 %v1574_v28, %v3651_v16 }
 0x1e7   : > { %5010 = vst [vmem:[#allocation85_spill] sm:$0xff] %v3694_v60  ;;  %5012 = vst [vmem:[#allocation87_spill] sm:$0xff] %v3699_v22  ;;  %1670 = vrot.lane.b32.xlu0 %v3662_v34, %s2438_s5  ;;  %1668 = vrot.lane.b32.xlu1 %v3665_v20, %s2438_s5  ;;  %v1309_v55 = vrot.slane %v3699_v22, 7  ;;  %v1315_v26 = vrot.slane %v3694_v60, 7  ;;  %v1345_v59 = vrot.slane %v3699_v22, 1  ;;  %v1351_v43 = vrot.slane %v3694_v60, 1 }
 0x1e8   : > { %v3754_v33 = vmin.f32 %v1599_v13, %v1587_v4  ;;  %v3757_v58 = vmin.f32 %v1601_v50, %v1589_v23  ;;  %v1371_v4 = vsel %vm224_vm10, -1e+30, %v1361_v31  ;;  %v1356_v13 = vsel %vm355_vm9, %v1344_v2, %v1350_v41 }
 0x1e9   : > { %v3721_v42 = vpop.permute.xlu1 %998  ;;  %v3742_v25 = vsel %vm318_vm7, %v1315_v26, %v1309_v55  ;;  %v3746_v18 = vsel %vm318_vm7, %v1309_v55, %v1315_v26  ;;  %v3750_v61 = vsel %vm355_vm9, %v1351_v43, %v1345_v59  ;;  %v3761_v47 = vpop.permute.xlu0 %996  ;;  %v1383_v55 = vmax.f32 %v1319_v17, %v3647_v51 }
 0x1ea   : > { %5014 = vst [vmem:[#allocation89_spill] sm:$0xff] %v3721_v42  ;;  %v1382_v42 = vmax.f32 %v1334_v29, %v3651_v16  ;;  %5016 = vst [vmem:[#allocation91_spill] sm:$0xff] %v3757_v58  ;;  %v1576_v29 = vsel %vm217_vm8, 1e+30, %v1326_v12  ;;  %v1355_v26 = vsel %vm355_vm9, %v1343_v45, %v1349_v56  ;;  %v1591_v50 = vsel %vm224_vm10, 1e+30, %v3750_v61 }
 0x1eb   : > { %1638 = vrot.lane.b32.xlu0 %v3694_v60, %s2437_s20  ;;  %1636 = vrot.lane.b32.xlu1 %v3699_v22, %s2437_s20  ;;  %v1600_v19 = vmin.f32 %v1576_v29, %v3665_v20  ;;  %v3773_v28 = vmin.f32 %v1598_v63, %v1355_v26  ;;  %v1603_v45 = vmin.f32 %v3746_v18, %v3694_v60  ;;  %v1578_v56 = vsel %vm217_vm8, 1e+30, %v3742_v25 }
 0x1ec   : > { %v3789_v63 = vmax.f32 %v1382_v42, %v1355_v26  ;;  %v1602_v2 = vmin.f32 %v1578_v56, %v3699_v22  ;;  %v3792_v41 = vmax.f32 %v1383_v55, %v1371_v4  ;;  %v3796_v31 = vsel %vm355_vm9, %v1345_v59, %v1351_v43 }
 0x1ed   : > { %v3752_v0 = vpop.permute.xlu1 %1002  ;;  %v3780_v23 = vmin.f32 %v1600_v19, %v1356_v13  ;;  %v3798_v19 = vmin.f32 %v1603_v45, %v1591_v50  ;;  %v1385_v55 = vmax.f32 %v1320_v49, %v3662_v34  ;;  %v1373_v59 = vsel %vm224_vm10, -1e+30, %v1362_v48 }
 0x1ee   : > { %5015 = vst [vmem:[#allocation90_spill] sm:$0xff] %v3752_v0  ;;  %5019 = vst [vmem:[#allocation94_spill] sm:$0xff] %v3789_v63  ;;  %v3803_v29 = vmin.f32 %v1602_v2, %v3796_v31  ;;  %v3805_v0 = vpop.permute.xlu0 %1000  ;;  %v1336_v43 = vsel %vm217_vm8, -1e+30, %v1326_v12 }
 0x1ef   : > { %1674 = vrot.lane.b32.xlu0 %v3694_v60, %s2438_s5  ;;  %1672 = vrot.lane.b32.xlu1 %v3699_v22, %s2438_s5  ;;  %5017 = vst [vmem:[#allocation92_spill] sm:$0xff] %v3780_v23  ;;  %5020 = vst [vmem:[#allocation95_spill] sm:$0xff] %v3792_v41  ;;  %v3824_v50 = vmax.f32 %v1385_v55, %v1373_v59  ;;  %v1384_v49 = vmax.f32 %v1336_v43, %v3665_v20 }
 0x1f0   : > { %5021 = vst [vmem:[#allocation96_spill] sm:$0xff] %v3798_v19  ;;  %5022 = vst [vmem:[#allocation97_spill] sm:$0xff] %v3803_v29 }
 0x1f1   : > { %v3787_v17 = vpop.permute.xlu1 %1030  ;;  %5023 = vst [vmem:[#allocation98_spill] sm:$0xff] %v3805_v0  ;;  %v3831_v56 = vmax.f32 %v1384_v49, %v1356_v13 }
 0x1f2   : > { %5018 = vst [vmem:[#allocation93_spill] sm:$0xff] %v3787_v17  ;;  %v3822_v4 = vpop.permute.xlu0 %1028 }
 0x1f3   : > { %1412 = vrot.lane.b32.xlu0 %v3789_v63, %s2437_s20  ;;  %1414 = vrot.lane.b32.xlu1 %v3792_v41, %s2437_s20  ;;  %5026 = vst [vmem:[#allocation101_spill] sm:$0xff] %v3822_v4  ;;  %5027 = vst [vmem:[#allocation102_spill] sm:$0xff] %v3831_v56 }
 0x1f5   : > { %v3809_v42 = vpop.permute.xlu1 %1034 }
 0x1f6   : > { %5024 = vst [vmem:[#allocation99_spill] sm:$0xff] %v3809_v42 }
 0x1f7   : > { %1448 = vrot.lane.b32.xlu0 %v3789_v63, %s2438_s5  ;;  %1450 = vrot.lane.b32.xlu1 %v3792_v41, %s2438_s5 }
 0x1f9   : > { %v3820_v26 = vpop.permute.xlu1 %1038 }
 0x1fa   : > { %5025 = vst [vmem:[#allocation100_spill] sm:$0xff] %v3820_v26 }
 0x1fb   : > { %1418 = vrot.lane.b32.xlu1 %v3824_v50, %s2437_s20 }
 0x1fd   : > { %v3829_v45 = vpop.permute.xlu1 %1032  ;;  %v1197_v48 = vpop.permute.xlu0 %1196 }
 0x1fe   : > { %v1220_v55 = vsel %vm229_vm11, 1e+30, %v1197_v48 }
 0x1ff   : > { %1416 = vrot.lane.b32.xlu1 %v3831_v56, %s2437_s20  ;;  %v1268_v43 = vmin.f32 %v1220_v55, %v3428_v27 }
 0x201   : > { %v3835_v12 = vpop.permute.xlu1 %1036  ;;  %v1201_v2 = vpop.permute.xlu0 %1200 }
 0x202   : > { %5028 = vst [vmem:[#allocation103_spill] sm:$0xff] %v3835_v12  ;;  %v1222_v13 = vsel %vm229_vm11, 1e+30, %v1201_v2 }
 0x203   : > { %1452 = vrot.lane.b32.xlu1 %v3831_v56, %s2438_s5  ;;  %v1270_v12 = vmin.f32 %v1222_v13, %v3442_v37 }
 0x205   : > { %v1199_v59 = vpop.permute.xlu1 %1198  ;;  %v1233_v26 = vpop.permute.xlu0 %1232 }
 0x206   : > { %v1256_v49 = vsel %vm232_vm12, 1e+30, %v1233_v26  ;;  %v1221_v48 = vsel %vm229_vm11, 1e+30, %v1199_v59 }
 0x207   : > { %v1280_v0 = vmin.f32 %v1268_v43, %v1256_v49  ;;  %v1269_v26 = vmin.f32 %v1221_v48, %v3431_v21 }
 0x209   : > { %v1203_v42 = vpop.permute.xlu1 %1202  ;;  %v3848_v17 = vmin.f32 %v3516_v40, %v1280_v0  ;;  %v1237_v4 = vpop.permute.xlu0 %1236 }
 0x20a   : > { %v1258_v55 = vsel %vm232_vm12, 1e+30, %v1237_v4  ;;  %v1223_v40 = vsel %vm229_vm11, 1e+30, %v1203_v42 }
 0x20b   : > { %5029 = vst [vmem:[#allocation104_spill] sm:$0xff] %v3848_v17  ;;  %v1282_v27 = vmin.f32 %v1270_v12, %v1258_v55  ;;  %1616 = vrot.lane.b32.xlu1 %v3848_v17, %s2437_s20  ;;  %v1271_v4 = vmin.f32 %v1223_v40, %v3449_v5 }
 0x20d   : > { %v1235_v2 = vpop.permute.xlu1 %1234  ;;  %v3858_v43 = vmin.f32 %v3536_v14, %v1282_v27  ;;  %v1205_v0 = vpop.permute.xlu0 %1204 }
 0x20e   : > { %v1257_v59 = vsel %vm232_vm12, 1e+30, %v1235_v2  ;;  %v1224_v12 = vsel %vm229_vm11, 1e+30, %v1205_v0 }
 0x20f   : > { %5030 = vst [vmem:[#allocation105_spill] sm:$0xff] %v3858_v43  ;;  %v1281_v13 = vmin.f32 %v1269_v26, %v1257_v59  ;;  %1620 = vrot.lane.b32.xlu1 %v3858_v43, %s2437_s20  ;;  %v1272_v26 = vmin.f32 %v1224_v12, %v3477_v24 }
 0x211   : > { %v3870_v49 = vmin.f32 %v3523_v7, %v1281_v13  ;;  %v1239_v27 = vpop.permute.xlu1 %1238  ;;  %v1241_v14 = vpop.permute.xlu0 %1240 }
 0x212   : > { %v1259_v42 = vsel %vm232_vm12, 1e+30, %v1239_v27  ;;  %v1260_v48 = vsel %vm232_vm12, 1e+30, %v1241_v14  ;;  %v1304_v27 = vrot.slane %v3848_v17, 7  ;;  %v1340_v14 = vrot.slane %v3848_v17, 1 }
 0x213   : > { %v1283_v55 = vmin.f32 %v1271_v4, %v1259_v42  ;;  %1618 = vrot.lane.b32.xlu0 %v3870_v49, %s2437_s20  ;;  %1652 = vrot.lane.b32.xlu1 %v3848_v17, %s2438_s5  ;;  %v1310_v40 = vrot.slane %v3870_v49, 7  ;;  %v1284_v0 = vmin.f32 %v1272_v26, %v1260_v48  ;;  %v1346_v4 = vrot.slane %v3870_v49, 1 }
 0x215   : > { %v3882_v7 = vmin.f32 %v3541_v39, %v1283_v55  ;;  %v1207_v2 = vpop.permute.xlu1 %1206  ;;  %v1023_v59 = vpop.permute.xlu0 %1022  ;;  %v1305_v39 = vrot.slane %v3858_v43, 7  ;;  %v1338_v55 = vsel %vm217_vm8, -1e+30, %v3742_v25  ;;  %v3902_v26 = vsel %vm318_vm7, %v1310_v40, %v1304_v27 }
 0x216   : > { %v1225_v13 = vsel %vm229_vm11, 1e+30, %v1207_v2  ;;  %v3905_v2 = vmin.f32 %v3551_v11, %v1284_v0  ;;  %v3924_v0 = vsel %vm318_vm7, %v1304_v27, %v1310_v40  ;;  %v3954_v63 = vsel %vm355_vm9, %v1340_v14, %v1346_v4 }
 0x217   : > { %5031 = vst [vmem:[#allocation106_spill] sm:$0xff] %v3882_v7  ;;  %1622 = vrot.lane.b32.xlu0 %v3882_v7, %s2437_s20  ;;  %v1311_v12 = vrot.slane %v3882_v7, 7  ;;  %1656 = vrot.lane.b32.xlu1 %v3858_v43, %s2438_s5  ;;  %v1273_v42 = vmin.f32 %v1225_v13, %v3474_v57  ;;  %v3913_v13 = vsel %vm355_vm9, %v1346_v4, %v1340_v14  ;;  %v1347_v11 = vrot.slane %v3882_v7, 1 }
 0x218   : > { %5032 = vst [vmem:[#allocation107_spill] sm:$0xff] %v3905_v2  ;;  %v1341_v57 = vrot.slane %v3858_v43, 1  ;;  %v1581_v27 = vsel %vm224_vm10, 1e+30, %v3913_v13  ;;  %v1306_v54 = vrot.slane %v3905_v2, 7  ;;  %v1342_v56 = vrot.slane %v3905_v2, 1 }
 0x219   : > { %v1243_v48 = vpop.permute.xlu1 %1242  ;;  %v3907_v24 = vpop.permute.xlu0 %1026  ;;  %v3917_v21 = vsel %vm318_vm7, %v1311_v12, %v1305_v39  ;;  %v1317_v14 = vsel %vm318_vm7, %v1305_v39, %v1311_v12  ;;  %v1043_v12 = vsel %vm232_vm12, -1e+30, %v1023_v59 }
 0x21a   : > { %v1261_v37 = vsel %vm232_vm12, 1e+30, %v1243_v48  ;;  %v1386_v48 = vmax.f32 %v1338_v55, %v3699_v22  ;;  %v1570_v40 = vsel %vm217_vm8, 1e+30, %v3917_v21  ;;  %v3958_v9 = vsel %vm355_vm9, %v1341_v57, %v1347_v11 }
 0x21b   : > { %v1285_v25 = vmin.f32 %v1273_v42, %v1261_v37  ;;  %1654 = vrot.lane.b32.xlu0 %v3870_v49, %s2438_s5  ;;  %1624 = vrot.lane.b32.xlu1 %v3905_v2, %s2437_s20  ;;  %v1568_v37 = vsel %vm217_vm8, 1e+30, %v3902_v26  ;;  %v1594_v41 = vmin.f32 %v1570_v40, %v3858_v43  ;;  %v1359_v40 = vsel %vm355_vm9, %v1347_v11, %v1341_v57 }
 0x21c   : > { %v1592_v8 = vmin.f32 %v1568_v37, %v3848_v17  ;;  %v1595_v59 = vmin.f32 %v1317_v14, %v3882_v7 }
 0x21d   : > { %v3934_v42 = vmin.f32 %v3559_v62, %v1285_v25  ;;  %v983_v5 = vpop.permute.xlu1 %982  ;;  %v981_v55 = vpop.permute.xlu0 %980  ;;  %v1593_v62 = vmin.f32 %v3924_v0, %v3870_v49  ;;  %v3968_v19 = vmin.f32 %v1594_v41, %v3958_v9  ;;  %v1387_v41 = vmax.f32 %v3746_v18, %v3694_v60 }
 0x21e   : > { %v3965_v29 = vmin.f32 %v1592_v8, %v3954_v63  ;;  %v3981_v8 = vmax.f32 %v1386_v48, %v3796_v31  ;;  %v1583_v31 = vsel %vm224_vm10, 1e+30, %v1359_v40  ;;  %v1367_v18 = vsel %vm224_vm10, -1e+30, %v1359_v40 }
 0x21f   : > { %5033 = vst [vmem:[#allocation108_spill] sm:$0xff] %v3934_v42  ;;  %1658 = vrot.lane.b32.xlu0 %v3882_v7, %s2438_s5  ;;  %v1312_v25 = vrot.slane %v3934_v42, 7  ;;  %v1348_v37 = vrot.slane %v3934_v42, 1  ;;  %1660 = vrot.lane.b32.xlu1 %v3905_v2, %s2438_s5  ;;  %5034 = vst [vmem:[#allocation109_spill] sm:$0xff] %v3968_v19  ;;  %v3970_v22 = vmin.f32 %v1593_v62, %v1581_v27 }
 0x220   : > { %v1379_v48 = vmax.f32 %v1317_v14, %v3882_v7 }
 0x221   : > { %5035 = vst [vmem:[#allocation110_spill] sm:$0xff] %v3970_v22  ;;  %v987_v4 = vpop.permute.xlu1 %986  ;;  %v3976_v23 = vsel %vm318_vm7, %v1312_v25, %v1306_v54  ;;  %v985_v58 = vpop.permute.xlu0 %984  ;;  %v1360_v11 = vsel %vm355_vm9, %v1348_v37, %v1342_v56  ;;  %v1318_v27 = vsel %vm318_vm7, %v1306_v54, %v1312_v25  ;;  %v1005_v54 = vsel %vm229_vm11, -1e+30, %v983_v5 }
 0x222   : > { %v1007_v57 = vsel %vm229_vm11, -1e+30, %v987_v4  ;;  %v1354_v14 = vsel %vm355_vm9, %v1342_v56, %v1348_v37  ;;  %v4016_v22 = vmin.f32 %v1595_v59, %v1583_v31  ;;  %v1597_v7 = vmin.f32 %v1318_v27, %v3934_v42 }
 0x223   : > { %v1055_v39 = vmax.f32 %v1007_v57, %v3548_v36  ;;  %1626 = vrot.lane.b32.xlu0 %v3934_v42, %s2437_s20  ;;  %1420 = vrot.lane.b32.xlu1 %v3981_v8, %s2437_s20  ;;  %v1572_v36 = vsel %vm217_vm8, 1e+30, %v3976_v23  ;;  %v1585_v57 = vsel %vm224_vm10, 1e+30, %v1360_v11  ;;  %v1004_v5 = vsel %vm229_vm11, -1e+30, %v981_v55 }
 0x224   : > { %v1596_v4 = vmin.f32 %v1572_v36, %v3905_v2  ;;  %v1045_v56 = vsel %vm232_vm12, -1e+30, %v3907_v24  ;;  %v4034_v37 = vmin.f32 %v1597_v7, %v1585_v57  ;;  %v4039_v31 = vmax.f32 %v1379_v48, %v1367_v18 }
 0x225   : > { %v4007_v62 = vmax.f32 %v1055_v39, %v1043_v12  ;;  %v991_v25 = vpop.permute.xlu1 %990  ;;  %v989_v40 = vpop.permute.xlu0 %988  ;;  %v1375_v39 = vsel %vm224_vm10, -1e+30, %v3750_v61  ;;  %v1052_v61 = vmax.f32 %v1004_v5, %v3577_v10  ;;  %v1006_v24 = vsel %vm229_vm11, -1e+30, %v985_v58 }
 0x226   : > { %v1009_v19 = vsel %vm229_vm11, -1e+30, %v991_v25  ;;  %v4027_v36 = vmin.f32 %v1596_v4, %v1354_v14  ;;  %v4044_v4 = vmax.f32 %v1387_v41, %v1375_v39  ;;  %v1381_v10 = vmax.f32 %v1318_v27, %v3934_v42 }
 0x227   : > { %v1057_v12 = vmax.f32 %v1009_v19, %v3564_v46  ;;  %1662 = vrot.lane.b32.xlu0 %v3934_v42, %s2438_s5  ;;  %1454 = vrot.lane.b32.xlu1 %v3824_v50, %s2438_s5  ;;  %v1053_v46 = vmax.f32 %v1005_v54, %v3575_v3  ;;  %v1054_v41 = vmax.f32 %v1006_v24, %v3590_v32  ;;  %v1369_v58 = vsel %vm224_vm10, -1e+30, %v1360_v11 }
 0x228   : > { %v1008_v54 = vsel %vm229_vm11, -1e+30, %v989_v40  ;;  %v4072_v27 = vmax.f32 %v1381_v10, %v1369_v58  ;;  %v1377_v11 = vmax.f32 %v3924_v0, %v3870_v49  ;;  %v1328_v40 = vsel %vm217_vm8, -1e+30, %v3902_v26 }
 0x229   : > { %v4037_v19 = vmax.f32 %v1057_v12, %v1045_v56  ;;  %v1019_v55 = vpop.permute.xlu1 %1018  ;;  %v1017_v59 = vpop.permute.xlu0 %1016  ;;  %v1056_v32 = vmax.f32 %v1008_v54, %v3601_v44  ;;  %v1365_v56 = vsel %vm224_vm10, -1e+30, %v3913_v13  ;;  %v1376_v44 = vmax.f32 %v1328_v40, %v3848_v17 }
 0x22a   : > { %v1041_v25 = vsel %vm232_vm12, -1e+30, %v1019_v55  ;;  %v1040_v7 = vsel %vm232_vm12, -1e+30, %v1017_v59  ;;  %v4092_v0 = vmax.f32 %v1377_v11, %v1365_v56  ;;  %v1330_v26 = vsel %vm217_vm8, -1e+30, %v3917_v21 }
 0x22b   : > { %v4050_v3 = vmax.f32 %v1053_v46, %v1041_v25  ;;  %1406 = vrot.lane.b32.xlu0 %v4039_v31, %s2437_s20  ;;  %v4054_v18 = vmax.f32 %v1052_v61, %v1040_v7  ;;  %1422 = vrot.lane.b32.xlu1 %v4044_v4, %s2437_s20  ;;  %v4102_v13 = vmax.f32 %v1376_v44, %v3954_v63  ;;  %v1332_v21 = vsel %vm217_vm8, -1e+30, %v3976_v23 }
 0x22c   : > { %v1378_v55 = vmax.f32 %v1330_v26, %v3858_v43  ;;  %v1380_v63 = vmax.f32 %v1332_v21, %v3905_v2  ;;  %v1048_v54 = vsel %vm232_vm12, -1e+30, %v3829_v45  ;;  %v676_v45 = vsel %vm232_vm12, -1e+30, %v3380_v35 }
 0x22d   : > { %v1021_v48 = vpop.permute.xlu0 %1020 }
 0x22e   : > { %v1042_v57 = vsel %vm232_vm12, -1e+30, %v1021_v48  ;;  %v4110_v61 = vmax.f32 %v1378_v55, %v3958_v9  ;;  %v4122_v59 = vmax.f32 %v1380_v63, %v1354_v14  ;;  %v1012_v14 = vsel %vm229_vm11, -1e+30, %v3761_v47 }
 0x22f   : > { %1442 = vrot.lane.b32.xlu0 %v4039_v31, %s2438_s5  ;;  %v4068_v5 = vmax.f32 %v1054_v41, %v1042_v57  ;;  %1456 = vrot.lane.b32.xlu1 %v3981_v8, %s2438_s5  ;;  %v640_v41 = vsel %vm229_vm11, -1e+30, %v3306_v53  ;;  %v1060_v11 = vmax.f32 %v1012_v14, %v3382_v52 }
 0x230   : > { %5036 = vst [vmem:[#allocation111_spill] sm:$0xff] %v4122_v59  ;;  %v688_v52 = vmax.f32 %v640_v41, %v2928_v30 }
 0x231   : > { %v1025_v12 = vpop.permute.xlu0 %1024  ;;  %v4155_v44 = vmax.f32 %v1060_v11, %v1048_v54 }
 0x232   : > { %v1044_v39 = vsel %vm232_vm12, -1e+30, %v1025_v12 }
 0x233   : > { %1410 = vrot.lane.b32.xlu0 %v4072_v27, %s2437_s20  ;;  %v4087_v46 = vmax.f32 %v1056_v32, %v1044_v39  ;;  %1458 = vrot.lane.b32.xlu1 %v4044_v4, %s2438_s5  ;;  %v1084_v30 = vsub.f32 %v2785_v38, %v4155_v44 }
 0x237   : > { %1446 = vrot.lane.b32.xlu0 %v4072_v27, %s2438_s5  ;;  %1402 = vrot.lane.b32.xlu1 %v4092_v0, %s2437_s20 }
 0x23b   : > { %1400 = vrot.lane.b32.xlu0 %v4102_v13, %s2437_s20  ;;  %1438 = vrot.lane.b32.xlu1 %v4092_v0, %s2438_s5 }
 0x23f   : > { %1404 = vrot.lane.b32.xlu0 %v4110_v61, %s2437_s20 }
 0x243   : > { %1436 = vrot.lane.b32.xlu0 %v4102_v13, %s2438_s5 }
 0x247   : > { %1440 = vrot.lane.b32.xlu0 %v4110_v61, %s2438_s5 }
 0x24b   : > { %1408 = vrot.lane.b32.xlu0 %v4122_v59, %s2437_s20 }
 0x24d   : > { %v1631_v9 = vpop.permute.xlu0 %1630  ;;  %v1629_v25 = vpop.permute.xlu1 %1628 }
 0x24e   : > { %v1647_v23 = vsel %vm229_vm11, 1e+30, %v1631_v9  ;;  %v1646_v10 = vsel %vm229_vm11, 1e+30, %v1629_v25 }
 0x24f   : > { %1444 = vrot.lane.b32.xlu0 %v4122_v59, %s2438_s5  ;;  %v1695_v48 = vmin.f32 %v1647_v23, %v3647_v51  ;;  %v1694_v57 = vmin.f32 %v1646_v10, %v3651_v16  ;;  %v4166_v10 = vmax.f32 %v688_v52, %v676_v45  ;;  %v5039_v52 = vld [vmem:[#allocation87_spill] sm:$0xff] }
 0x251   : > { %v1635_v24 = vpop.permute.xlu0 %1634  ;;  %v1633_v7 = vpop.permute.xlu1 %1632 }
 0x252   : > { %v1649_v32 = vsel %vm229_vm11, 1e+30, %v1635_v24  ;;  %v1648_v53 = vsel %vm229_vm11, 1e+30, %v1633_v7 }
 0x253   : > { %v1697_v26 = vmin.f32 %v1649_v32, %v3662_v34  ;;  %v1696_v63 = vmin.f32 %v1648_v53, %v3665_v20  ;;  %v5038_v32 = vld [vmem:[#allocation92_spill] sm:$0xff] }
 0x255   : > { %v1667_v58 = vpop.permute.xlu0 %1666  ;;  %v1665_v47 = vpop.permute.xlu1 %1664 }
 0x256   : > { %v1683_v12 = vsel %vm232_vm12, 1e+30, %v1667_v58  ;;  %v1682_v39 = vsel %vm232_vm12, 1e+30, %v1665_v47  ;;  %v5037_v58 = vld [vmem:[#allocation91_spill] sm:$0xff] }
 0x257   : > { %v1707_v40 = vmin.f32 %v1695_v48, %v1683_v12  ;;  %v1706_v56 = vmin.f32 %v1694_v57, %v1682_v39 }
 0x259   : > { %v1719_v55 = vmin.f32 %v3754_v33, %v1707_v40  ;;  %v1671_v21 = vpop.permute.xlu0 %1670  ;;  %v1718_v9 = vmin.f32 %v3773_v28, %v1706_v56  ;;  %v1669_v24 = vpop.permute.xlu1 %1668 }
 0x25a   : > { %v1685_v25 = vsel %vm232_vm12, 1e+30, %v1671_v21  ;;  %v1684_v35 = vsel %vm232_vm12, 1e+30, %v1669_v24 }
 0x25b   : > { %v1733_v23 = vrot.slane %v1719_v55, 7  ;;  %v1709_v7 = vmin.f32 %v1697_v26, %v1685_v25  ;;  %v1727_v14 = vrot.slane %v1718_v9, 7  ;;  %v1708_v33 = vmin.f32 %v1696_v63, %v1684_v35 }
 0x25c   : > { %v1769_v41 = vrot.slane %v1719_v55, 1  ;;  %v1763_v48 = vrot.slane %v1718_v9, 1 }
 0x25d   : > { %v1721_v28 = vmin.f32 %v5037_v58, %v1709_v7  ;;  %v1639_v54 = vpop.permute.xlu0 %1638  ;;  %v1745_v57 = vsel %vm318_vm7, %v1733_v23, %v1727_v14  ;;  %v1720_v12 = vmin.f32 %v5038_v32, %v1708_v33  ;;  %v1637_v11 = vpop.permute.xlu1 %1636  ;;  %v1739_v53 = vsel %vm318_vm7, %v1727_v14, %v1733_v23 }
 0x25e   : > { %v1651_v47 = vsel %vm229_vm11, 1e+30, %v1639_v54  ;;  %v1754_v38 = vsel %vm217_vm8, -1e+30, %v1745_v57  ;;  %v1650_v21 = vsel %vm229_vm11, 1e+30, %v1637_v11  ;;  %v1781_v24 = vsel %vm355_vm9, %v1769_v41, %v1763_v48 }
 0x25f   : > { %v1734_v40 = vrot.slane %v1721_v28, 7  ;;  %v1770_v39 = vrot.slane %v1721_v28, 1  ;;  %v1699_v56 = vmin.f32 %v1651_v47, %v3694_v60  ;;  %v1802_v45 = vmax.f32 %v1754_v38, %v1718_v9 }
 0x260   : > { %v1728_v44 = vrot.slane %v1720_v12, 7  ;;  %v1764_v26 = vrot.slane %v1720_v12, 1  ;;  %v1698_v63 = vmin.f32 %v1650_v21, %v5039_v52  ;;  %v1803_v23 = vmax.f32 %v1739_v53, %v1719_v55  ;;  %v5040_v53 = vld [vmem:[#allocation96_spill] sm:$0xff] }
 0x261   : > { %v1675_v25 = vpop.permute.xlu0 %1674  ;;  %v1775_v7 = vsel %vm355_vm9, %v1763_v48, %v1769_v41  ;;  %v1673_v14 = vpop.permute.xlu1 %1672  ;;  %v1791_v33 = vsel %vm224_vm10, -1e+30, %v1781_v24 }
 0x262   : > { %v1746_v35 = vsel %vm318_vm7, %v1734_v40, %v1728_v44  ;;  %v1687_v9 = vsel %vm232_vm12, 1e+30, %v1675_v25  ;;  %v4194_v58 = vmax.f32 %v1802_v45, %v1775_v7  ;;  %v1686_v55 = vsel %vm232_vm12, 1e+30, %v1673_v14 }
 0x263   : > { %v1756_v54 = vsel %vm217_vm8, -1e+30, %v1746_v35  ;;  %v1711_v57 = vmin.f32 %v1699_v56, %v1687_v9  ;;  %v4200_v41 = vmax.f32 %v1803_v23, %v1791_v33  ;;  %v1710_v32 = vmin.f32 %v1698_v63, %v1686_v55  ;;  %v5041_v63 = vld [vmem:[#allocation97_spill] sm:$0xff]  ;;  %v5044_v55 = vld [vmem:[#allocation95_spill] sm:$0xff] }
 0x264   : > { %v1804_v48 = vmax.f32 %v1756_v54, %v1720_v12  ;;  %1832 = vrot.lane.b32.xlu0 %v4194_v58, %s2437_s20  ;;  %v1740_v47 = vsel %vm318_vm7, %v1728_v44, %v1734_v40  ;;  %v1782_v11 = vsel %vm355_vm9, %v1770_v39, %v1764_v26  ;;  %v1776_v21 = vsel %vm355_vm9, %v1764_v26, %v1770_v39  ;;  %v5042_v39 = vld [vmem:[#allocation12_spill] sm:$0xff]  ;;  %v5043_v54 = vld [vmem:[#allocation94_spill] sm:$0xff] }
 0x265   : > { %v1723_v38 = vmin.f32 %v5040_v53, %v1711_v57  ;;  %1834 = vrot.lane.b32.xlu1 %v4200_v41, %s2437_s20  ;;  %v1413_v56 = vpop.permute.xlu0 %1412  ;;  %v1793_v45 = vsel %vm224_vm10, -1e+30, %v1782_v11  ;;  %v1805_v12 = vmax.f32 %v1740_v47, %v1721_v28  ;;  %v1722_v25 = vmin.f32 %v5041_v63, %v1710_v32  ;;  %v1415_v44 = vpop.permute.xlu1 %1414 }
 0x266   : > { %v1430_v40 = vsel %vm229_vm11, -1e+30, %v1413_v56  ;;  %v4218_v24 = vmax.f32 %v1804_v48, %v1776_v21  ;;  %v1431_v35 = vsel %vm229_vm11, -1e+30, %v1415_v44  ;;  %v712_v26 = vsub.f32 %v5042_v39, %v4166_v10 }
 0x267   : > { %v1735_v23 = vrot.slane %v1723_v38, 7  ;;  %v1771_v7 = vrot.slane %v1723_v38, 1  ;;  %v1729_v9 = vrot.slane %v1722_v25, 7  ;;  %v1765_v14 = vrot.slane %v1722_v25, 1 }
 0x268   : > { %1868 = vrot.lane.b32.xlu0 %v4194_v58, %s2438_s5  ;;  %v4224_v28 = vmax.f32 %v1805_v12, %v1793_v45  ;;  %v1096_v33 = vmax.f32 %v1084_v30, 0.0  ;;  %v1478_v57 = vmax.f32 %v1430_v40, %v5043_v54  ;;  %v1479_v48 = vmax.f32 %v1431_v35, %v5044_v55 }
 0x269   : > { %1870 = vrot.lane.b32.xlu1 %v4200_v41, %s2438_s5  ;;  %v1449_v32 = vpop.permute.xlu0 %1448  ;;  %v1747_v47 = vsel %vm318_vm7, %v1735_v23, %v1729_v9  ;;  %v1451_v53 = vpop.permute.xlu1 %1450  ;;  %v1741_v56 = vsel %vm318_vm7, %v1729_v9, %v1735_v23  ;;  %v1783_v10 = vsel %vm355_vm9, %v1771_v7, %v1765_v14  ;;  %v1777_v23 = vsel %vm355_vm9, %v1765_v14, %v1771_v7  ;;  %v5045_v7 = vld [vmem:[#allocation102_spill] sm:$0xff] }
 0x26a   : > { %v1466_v11 = vsel %vm232_vm12, -1e+30, %v1449_v32  ;;  %v1758_v30 = vsel %vm217_vm8, -1e+30, %v1747_v47  ;;  %v1467_v12 = vsel %vm232_vm12, -1e+30, %v1451_v53  ;;  %v1807_v44 = vmax.f32 %v1741_v56, %v1723_v38 }
 0x26b   : > { %v4242_v45 = vmax.f32 %v1478_v57, %v1466_v11  ;;  %v1795_v21 = vsel %vm224_vm10, -1e+30, %v1783_v10  ;;  %v1806_v63 = vmax.f32 %v1758_v30, %v1722_v25  ;;  %v4248_v40 = vmax.f32 %v1479_v48, %v1467_v12  ;;  %v5046_v53 = vld [vmem:[#allocation49_spill] sm:$0xff] }
 0x26c   : > { %v724_v35 = vmax.f32 %v712_v26, 0.0  ;;  %v4256_v54 = vmax.f32 %v1807_v44, %v1795_v21 }
 0x26d   : > { %1838 = vrot.lane.b32.xlu1 %v4224_v28, %s2437_s20  ;;  %v4254_v9 = vpop.permute.xlu1 %1418  ;;  %v4258_v57 = vmax.f32 %v1806_v63, %v1777_v23  ;;  %v5047_v23 = vld [vmem:[#allocation75_spill] sm:$0xff] }
 0x26e   : > { %v1108_v55 = vmul.f32 %v1096_v33, %v724_v35 }
 0x270   : > { %v1120_v48 = vsub.f32 %v1096_v33, %v1108_v55  ;;  %v635_v55 = vsel %vm229_vm11, -1e+30, %v5047_v23  ;;  %v5050_v23 = vld [vmem:[#allocation77_spill] sm:$0xff] }
 0x271   : > { %1874 = vrot.lane.b32.xlu1 %v4224_v28, %s2438_s5  ;;  %v1417_v25 = vpop.permute.xlu1 %1416 }
 0x272   : > { %v1432_v38 = vsel %vm229_vm11, -1e+30, %v1417_v25  ;;  %v1132_v47 = vmax.f32 %v1120_v48, 0.0  ;;  %v5048_v48 = vld [vmem:[#allocation81_spill] sm:$0xff] }
 0x273   : > { %v1480_v14 = vmax.f32 %v1432_v38, %v5045_v7  ;;  %v671_v7 = vsel %vm232_vm12, -1e+30, %v5048_v48 }
 0x274   : > { %v1144_v10 = vadd.f32 %v1132_v47, %v724_v35 }
 0x275   : > { %1842 = vrot.lane.b32.xlu1 %v4256_v54, %s2437_s20  ;;  %v1453_v26 = vpop.permute.xlu1 %1452 }
 0x276   : > { %v1468_v32 = vsel %vm232_vm12, -1e+30, %v1453_v26  ;;  %v5049_v26 = vld [vmem:[#allocation42_spill] sm:$0xff] }
 0x277   : > { %v1492_v11 = vmax.f32 %v1480_v14, %v1468_v32  ;;  %v683_v32 = vmax.f32 %v635_v55, %v5049_v26  ;;  %v637_v55 = vsel %vm229_vm11, -1e+30, %v5050_v23  ;;  %v5053_v23 = vld [vmem:[#allocation37_spill] sm:$0xff] }
 0x278   : > { %v1079_v39 = vsub.f32 %v5053_v23, %v4007_v62 }
 0x279   : > { %1836 = vrot.lane.b32.xlu1 %v4218_v24, %s2437_s20  ;;  %v1504_v56 = vsub.f32 %v5046_v53, %v1492_v11  ;;  %v695_v53 = vmax.f32 %v683_v32, %v671_v7 }
 0x27a   : > { %v4322_v59 = vmax.f32 %v1079_v39, 0.0 }
 0x27b   : > { %v1516_v30 = vmax.f32 %v1504_v56, 0.0 }
 0x27d   : > { %1872 = vrot.lane.b32.xlu1 %v4218_v24, %s2438_s5  ;;  %v1528_v33 = vmul.f32 %v1516_v30, %v1144_v10  ;;  %v1617_v12 = vpop.permute.xlu1 %1616 }
 0x27e   : > { %v1640_v35 = vsel %vm229_vm11, 1e+30, %v1617_v12 }
 0x27f   : > { %v1540_v21 = vsub.f32 %v1516_v30, %v1528_v33  ;;  %v1688_v11 = vmin.f32 %v1640_v35, %v3848_v17  ;;  %v5051_v35 = vld [vmem:[#allocation20_spill] sm:$0xff] }
 0x280   : > { %v707_v48 = vsub.f32 %v5051_v35, %v695_v53  ;;  %v5054_v53 = vld [vmem:[#allocation83_spill] sm:$0xff] }
 0x281   : > { %1840 = vrot.lane.b32.xlu1 %v4258_v57, %s2437_s20  ;;  %v1552_v63 = vmax.f32 %v1540_v21, 0.0  ;;  %v1621_v44 = vpop.permute.xlu1 %1620 }
 0x282   : > { %v1642_v56 = vsel %vm229_vm11, 1e+30, %v1621_v44 }
 0x283   : > { %v4279_v25 = vadd.f32 %v1552_v63, %v1144_v10  ;;  %v1690_v63 = vmin.f32 %v1642_v56, %v3858_v43  ;;  %v5052_v56 = vld [vmem:[#allocation44_spill] sm:$0xff]  ;;  %v5055_v43 = vld [vmem:[#allocation106_spill] sm:$0xff] }
 0x285   : > { %v1619_v38 = vpop.permute.xlu0 %1618  ;;  %v1653_v14 = vpop.permute.xlu1 %1652 }
 0x286   : > { %v1676_v47 = vsel %vm232_vm12, 1e+30, %v1653_v14  ;;  %v1641_v30 = vsel %vm229_vm11, 1e+30, %v1619_v38 }
 0x287   : > { %v1700_v33 = vmin.f32 %v1688_v11, %v1676_v47  ;;  %v1689_v7 = vmin.f32 %v1641_v30, %v3870_v49  ;;  %v673_v30 = vsel %vm232_vm12, -1e+30, %v5054_v53 }
 0x289   : > { %v1623_v10 = vpop.permute.xlu0 %1622  ;;  %v1657_v12 = vpop.permute.xlu1 %1656  ;;  %v1712_v14 = vmin.f32 %v3965_v29, %v1700_v33  ;;  %v5056_v33 = vld [vmem:[#allocation110_spill] sm:$0xff] }
 0x28a   : > { %v1678_v21 = vsel %vm232_vm12, 1e+30, %v1657_v12  ;;  %v1643_v38 = vsel %vm229_vm11, 1e+30, %v1623_v10  ;;  %v685_v12 = vmax.f32 %v637_v55, %v5052_v56 }
 0x28b   : > { %v1702_v26 = vmin.f32 %v1690_v63, %v1678_v21  ;;  %v1691_v29 = vmin.f32 %v1643_v38, %v5055_v43  ;;  %v4317_v63 = vmax.f32 %v707_v48, 0.0  ;;  %v1760_v56 = vrot.slane %v1712_v14, 1 }
 0x28c   : > { %v697_v38 = vmax.f32 %v685_v12, %v673_v30 }
 0x28d   : > { %v1655_v44 = vpop.permute.xlu0 %1654  ;;  %v1625_v47 = vpop.permute.xlu1 %1624 }
 0x28e   : > { %v1677_v32 = vsel %vm232_vm12, 1e+30, %v1655_v44  ;;  %v1644_v10 = vsel %vm229_vm11, 1e+30, %v1625_v47  ;;  %v5057_v44 = vld [vmem:[#allocation109_spill] sm:$0xff] }
 0x28f   : > { %v1701_v11 = vmin.f32 %v1689_v7, %v1677_v32  ;;  %v1724_v7 = vrot.slane %v1712_v14, 7  ;;  %v1714_v55 = vmin.f32 %v5057_v44, %v1702_v26 }
 0x291   : > { %v1713_v17 = vmin.f32 %v5056_v33, %v1701_v11  ;;  %v1659_v21 = vpop.permute.xlu0 %1658  ;;  %v1661_v32 = vpop.permute.xlu1 %1660  ;;  %v1692_v11 = vmin.f32 %v1644_v10, %v3905_v2  ;;  %v1725_v12 = vrot.slane %v1714_v55, 7  ;;  %v1761_v44 = vrot.slane %v1714_v55, 1 }
 0x292   : > { %v1679_v62 = vsel %vm232_vm12, 1e+30, %v1659_v21  ;;  %v1680_v48 = vsel %vm232_vm12, 1e+30, %v1661_v32 }
 0x293   : > { %v1730_v23 = vrot.slane %v1713_v17, 7  ;;  %v1766_v53 = vrot.slane %v1713_v17, 1  ;;  %v1703_v60 = vmin.f32 %v1691_v29, %v1679_v62  ;;  %v1704_v2 = vmin.f32 %v1692_v11, %v1680_v48 }
 0x295   : > { %v1736_v47 = vsel %vm318_vm7, %v1724_v7, %v1730_v23  ;;  %v1715_v26 = vmin.f32 %v4016_v22, %v1703_v60  ;;  %v1627_v33 = vpop.permute.xlu0 %1626  ;;  %v1778_v21 = vsel %vm355_vm9, %v1766_v53, %v1760_v56  ;;  %v1742_v29 = vsel %vm318_vm7, %v1730_v23, %v1724_v7  ;;  %v5058_v60 = vld [vmem:[#allocation39_spill] sm:$0xff] }
 0x296   : > { %v1797_v39 = vmax.f32 %v1736_v47, %v1713_v17  ;;  %v1645_v30 = vsel %vm229_vm11, 1e+30, %v1627_v33  ;;  %v1785_v10 = vsel %vm224_vm10, -1e+30, %v1778_v21  ;;  %v1103_v22 = vmul.f32 %v4322_v59, %v4317_v63 }
 0x297   : > { %v1731_v62 = vrot.slane %v1715_v26, 7  ;;  %v1767_v32 = vrot.slane %v1715_v26, 1  ;;  %v1081_v52 = vsub.f32 %v5058_v60, %v4037_v19  ;;  %v1693_v7 = vmin.f32 %v1645_v30, %v3934_v42 }
 0x298   : > { %v4343_v23 = vmax.f32 %v1797_v39, %v1785_v10  ;;  %v1748_v11 = vsel %vm217_vm8, -1e+30, %v1742_v29  ;;  %v1772_v48 = vsel %vm355_vm9, %v1760_v56, %v1766_v53  ;;  %v1716_v10 = vmin.f32 %v4027_v36, %v1704_v2  ;;  %v5059_v53 = vld [vmem:[#allocation22_spill] sm:$0xff] }
 0x299   : > { %v1737_v17 = vsel %vm318_vm7, %v1725_v12, %v1731_v62  ;;  %v1663_v47 = vpop.permute.xlu0 %1662  ;;  %v1779_v33 = vsel %vm355_vm9, %v1767_v32, %v1761_v44  ;;  %v1796_v30 = vmax.f32 %v1748_v11, %v1712_v14  ;;  %v1743_v29 = vsel %vm318_vm7, %v1731_v62, %v1725_v12 }
 0x29a   : > { %v1799_v21 = vmax.f32 %v1737_v17, %v1715_v26  ;;  %v1681_v19 = vsel %vm232_vm12, 1e+30, %v1663_v47  ;;  %1822 = vrot.lane.b32.xlu1 %v4343_v23, %s2437_s20  ;;  %v1787_v39 = vsel %vm224_vm10, -1e+30, %v1779_v33  ;;  %v1773_v56 = vsel %vm355_vm9, %v1761_v44, %v1767_v32 }
 0x29b   : > { %v1705_v60 = vmin.f32 %v1693_v7, %v1681_v19  ;;  %v709_v26 = vsub.f32 %v5059_v53, %v697_v38  ;;  %v4367_v47 = vmax.f32 %v1796_v30, %v1772_v48  ;;  %v1750_v42 = vsel %vm217_vm8, -1e+30, %v1743_v29 }
 0x29c   : > { %v4365_v17 = vmax.f32 %v1799_v21, %v1787_v39  ;;  %v1798_v2 = vmax.f32 %v1750_v42, %v1714_v55  ;;  %v1115_v36 = vsub.f32 %v4322_v59, %v1103_v22  ;;  %v1093_v7 = vmax.f32 %v1081_v52, 0.0 }
 0x29d   : > { %5060 = vst [vmem:[#allocation91_spill] sm:$0xff] %v4367_v47  ;;  %v1717_v14 = vmin.f32 %v4034_v37, %v1705_v60  ;;  %v1407_v33 = vpop.permute.xlu0 %1406  ;;  %v1726_v38 = vrot.slane %v1716_v10, 7  ;;  %v1762_v44 = vrot.slane %v1716_v10, 1  ;;  %v721_v11 = vmax.f32 %v709_v26, 0.0 }
 0x29e   : > { %v1427_v12 = vsel %vm229_vm11, -1e+30, %v1407_v33  ;;  %1858 = vrot.lane.b32.xlu1 %v4343_v23, %s2438_s5  ;;  %1826 = vrot.lane.b32.xlu0 %v4365_v17, %s2437_s20  ;;  %v4380_v42 = vmax.f32 %v1798_v2, %v1773_v56  ;;  %v1127_v39 = vmax.f32 %v1115_v36, 0.0 }
 0x29f   : > { %v1732_v62 = vrot.slane %v1717_v14, 7  ;;  %v1768_v32 = vrot.slane %v1717_v14, 1  ;;  %v1475_v37 = vmax.f32 %v1427_v12, %v4039_v31  ;;  %v1105_v30 = vmul.f32 %v1093_v7, %v721_v11 }
 0x2a0   : > { %5061 = vst [vmem:[#allocation92_spill] sm:$0xff] %v4380_v42  ;;  %v1139_v6 = vadd.f32 %v1127_v39, %v4317_v63  ;;  %v4420_v63 = vpop.permute.xlu1 %1420 }
 0x2a1   : > { %v1738_v59 = vsel %vm318_vm7, %v1726_v38, %v1732_v62  ;;  %v1443_v52 = vpop.permute.xlu0 %1442  ;;  %v1780_v55 = vsel %vm355_vm9, %v1768_v32, %v1762_v44  ;;  %v1744_v22 = vsel %vm318_vm7, %v1732_v62, %v1726_v38  ;;  %v1774_v48 = vsel %vm355_vm9, %v1762_v44, %v1768_v32 }
 0x2a2   : > { %v1801_v21 = vmax.f32 %v1738_v59, %v1717_v14  ;;  %v1463_v19 = vsel %vm232_vm12, -1e+30, %v1443_v52  ;;  %1876 = vrot.lane.b32.xlu1 %v4258_v57, %s2438_s5  ;;  %1862 = vrot.lane.b32.xlu0 %v4365_v17, %s2438_s5  ;;  %v1789_v31 = vsel %vm224_vm10, -1e+30, %v1780_v55  ;;  %v1752_v29 = vsel %vm217_vm8, -1e+30, %v1744_v22 }
 0x2a3   : > { %v1487_v60 = vmax.f32 %v1475_v37, %v1463_v19  ;;  %v1800_v26 = vmax.f32 %v1752_v29, %v1716_v10  ;;  %v5063_v14 = vld [vmem:[#allocation70_spill] sm:$0xff]  ;;  %v1117_v36 = vsub.f32 %v1093_v7, %v1105_v30  ;;  %v5065_v22 = vld [vmem:[#allocation71_spill] sm:$0xff]  ;;  %v5067_v30 = vld [vmem:[#allocation88_spill] sm:$0xff] }
 0x2a4   : > { %v4400_v56 = vmax.f32 %v1801_v21, %v1789_v31  ;;  %v1455_v29 = vpop.permute.xlu1 %1454 }
 0x2a5   : > { %v1499_v33 = vsub.f32 %v5063_v14, %v1487_v60  ;;  %v1411_v2 = vpop.permute.xlu0 %1410  ;;  %v4409_v15 = vmax.f32 %v1800_v26, %v1774_v48  ;;  %v1129_v37 = vmax.f32 %v1117_v36, 0.0  ;;  %v1010_v60 = vsel %vm229_vm11, -1e+30, %v5067_v30  ;;  %v5068_v14 = vld [vmem:[#allocation86_spill] sm:$0xff] }
 0x2a6   : > { %5062 = vst [vmem:[#allocation96_spill] sm:$0xff] %v4400_v56  ;;  %v1429_v12 = vsel %vm229_vm11, -1e+30, %v1411_v2  ;;  %1878 = vrot.lane.b32.xlu1 %v4256_v54, %s2438_s5  ;;  %1830 = vrot.lane.b32.xlu0 %v4400_v56, %s2437_s20 }
 0x2a7   : > { %5064 = vst [vmem:[#allocation97_spill] sm:$0xff] %v4409_v15  ;;  %v1511_v38 = vmax.f32 %v1499_v33, 0.0  ;;  %v1477_v10 = vmax.f32 %v1429_v12, %v4072_v27  ;;  %v1141_v7 = vadd.f32 %v1129_v37, %v721_v11  ;;  %v1011_v11 = vsel %vm229_vm11, -1e+30, %v5068_v14  ;;  %v5069_v33 = vld [vmem:[#allocation52_spill] sm:$0xff]  ;;  %v5070_v12 = vld [vmem:[#allocation101_spill] sm:$0xff] }
 0x2a8   : > { %v638_v2 = vsel %vm229_vm11, -1e+30, %v5069_v33  ;;  %v1046_v36 = vsel %vm232_vm12, -1e+30, %v5070_v12  ;;  %v4464_v33 = vpop.permute.xlu1 %1422 }
 0x2a9   : > { %v1523_v44 = vmul.f32 %v1511_v38, %v1139_v6  ;;  %v1447_v62 = vpop.permute.xlu0 %1446 }
 0x2aa   : > { %v1465_v32 = vsel %vm232_vm12, -1e+30, %v1447_v62  ;;  %1820 = vrot.lane.b32.xlu0 %v4367_v47, %s2437_s20 }
 0x2ab   : > { %v1535_v59 = vsub.f32 %v1511_v38, %v1523_v44  ;;  %v1489_v52 = vmax.f32 %v1477_v10, %v1465_v32  ;;  %v5072_v38 = vld [vmem:[#allocation50_spill] sm:$0xff]  ;;  %v5073_v10 = vld [vmem:[#allocation60_spill] sm:$0xff]  ;;  %v5074_v32 = vld [vmem:[#allocation93_spill] sm:$0xff] }
 0x2ac   : > { %v639_v44 = vsel %vm229_vm11, -1e+30, %v5072_v38  ;;  %v1058_v62 = vmax.f32 %v1010_v60, %v5073_v10  ;;  %v1047_v37 = vsel %vm232_vm12, -1e+30, %v5074_v32  ;;  %v5079_v60 = vld [vmem:[#allocation29_spill] sm:$0xff]  ;;  %v5081_v10 = vld [vmem:[#allocation26_spill] sm:$0xff] }
 0x2ad   : > { %v1547_v55 = vmax.f32 %v1535_v59, 0.0  ;;  %v1501_v48 = vsub.f32 %v5065_v22, %v1489_v52  ;;  %v4426_v39 = vpop.permute.xlu0 %1400  ;;  %v5075_v59 = vld [vmem:[#allocation59_spill] sm:$0xff] }
 0x2ae   : > { %1824 = vrot.lane.b32.xlu0 %v4380_v42, %s2437_s20  ;;  %v674_v52 = vsel %vm232_vm12, -1e+30, %v5075_v59  ;;  %v5083_v59 = vld [vmem:[#allocation54_spill] sm:$0xff] }
 0x2af   : > { %v1513_v27 = vmax.f32 %v1501_v48, 0.0  ;;  %v4422_v21 = vadd.f32 %v1547_v55, %v1139_v6  ;;  %v5076_v55 = vld [vmem:[#allocation57_spill] sm:$0xff]  ;;  %v5077_v48 = vld [vmem:[#allocation30_spill] sm:$0xff] }
 0x2b0   : > { %v1059_v22 = vmax.f32 %v1011_v11, %v5076_v55  ;;  %v5080_v11 = vld [vmem:[#allocation89_spill] sm:$0xff] }
 0x2b1   : > { %5066 = vst [vmem:[#allocation94_spill] sm:$0xff] %v4422_v21  ;;  %v1525_v19 = vmul.f32 %v1513_v27, %v1141_v7  ;;  %v4459_v30 = vpop.permute.xlu0 %1404 }
 0x2b2   : > { %1856 = vrot.lane.b32.xlu0 %v4367_v47, %s2438_s5  ;;  %v1071_v14 = vmax.f32 %v1059_v22, %v1047_v37  ;;  %v5084_v37 = vld [vmem:[#allocation14_spill] sm:$0xff]  ;;  %v5085_v22 = vld [vmem:[#allocation99_spill] sm:$0xff] }
 0x2b3   : > { %v1537_v31 = vsub.f32 %v1513_v27, %v1525_v19  ;;  %v686_v27 = vmax.f32 %v638_v2, %v5077_v48  ;;  %v1013_v2 = vsel %vm229_vm11, -1e+30, %v5080_v11 }
 0x2b5   : > { %v1549_v26 = vmax.f32 %v1537_v31, 0.0  ;;  %v1070_v31 = vmax.f32 %v1058_v62, %v1046_v36  ;;  %v698_v12 = vmax.f32 %v686_v27, %v674_v52  ;;  %v5082_v36 = vld [vmem:[#allocation25_spill] sm:$0xff]  ;;  %v1049_v52 = vsel %vm232_vm12, -1e+30, %v5085_v22  ;;  %v4480_v48 = vpop.permute.xlu0 %1436  ;;  %v5086_v27 = vld [vmem:[#allocation15_spill] sm:$0xff] }
 0x2b6   : > { %1860 = vrot.lane.b32.xlu0 %v4380_v42, %s2438_s5  ;;  %v1083_v62 = vsub.f32 %v5082_v36, %v1071_v14 }
 0x2b7   : > { %v4442_v6 = vadd.f32 %v1549_v26, %v1141_v7  ;;  %v5078_v7 = vld [vmem:[#allocation58_spill] sm:$0xff]  ;;  %v687_v26 = vmax.f32 %v639_v44, %v5079_v60  ;;  %v1082_v32 = vsub.f32 %v5081_v10, %v1070_v31  ;;  %v641_v44 = vsel %vm229_vm11, -1e+30, %v5083_v59  ;;  %v4484_v60 = vpop.permute.xlu1 %1456 }
 0x2b8   : > { %v675_v19 = vsel %vm232_vm12, -1e+30, %v5078_v7  ;;  %v710_v55 = vsub.f32 %v5084_v37, %v698_v12  ;;  %v5089_v12 = vld [vmem:[#allocation31_spill] sm:$0xff]  ;;  %v1095_v36 = vmax.f32 %v1083_v62, 0.0 }
 0x2b9   : > { %5071 = vst [vmem:[#allocation95_spill] sm:$0xff] %v4442_v6  ;;  %v699_v38 = vmax.f32 %v687_v26, %v675_v19  ;;  %v5087_v19 = vld [vmem:[#allocation62_spill] sm:$0xff]  ;;  %v5088_v26 = vld [vmem:[#allocation61_spill] sm:$0xff]  ;;  %v1094_v11 = vmax.f32 %v1082_v32, 0.0  ;;  %v689_v10 = vmax.f32 %v641_v44, %v5089_v12  ;;  %v5092_v44 = vld [vmem:[#allocation47_spill] sm:$0xff] }
 0x2ba   : > { %1828 = vrot.lane.b32.xlu0 %v4409_v15, %s2437_s20  ;;  %v1061_v31 = vmax.f32 %v1013_v2, %v5087_v19  ;;  %v677_v14 = vsel %vm232_vm12, -1e+30, %v5088_v26  ;;  %v722_v22 = vmax.f32 %v710_v55, 0.0  ;;  %v5090_v19 = vld [vmem:[#allocation24_spill] sm:$0xff]  ;;  %v5091_v26 = vld [vmem:[#allocation13_spill] sm:$0xff]  ;;  %v1502_v62 = vsub.f32 %v5092_v44, %v4242_v45 }
 0x2bb   : > { %v711_v7 = vsub.f32 %v5086_v27, %v699_v38  ;;  %v701_v37 = vmax.f32 %v689_v10, %v677_v14  ;;  %v4492_v27 = vpop.permute.xlu0 %1440  ;;  %v4495_v53 = vpop.permute.xlu1 %1458  ;;  %v1433_v55 = vsel %vm229_vm11, -1e+30, %v4254_v9 }
 0x2bc   : > { %v1073_v59 = vmax.f32 %v1061_v31, %v1049_v52  ;;  %v1106_v38 = vmul.f32 %v1094_v11, %v722_v22  ;;  %v5093_v31 = vld [vmem:[#allocation46_spill] sm:$0xff]  ;;  %v1481_v45 = vmax.f32 %v1433_v55, %v3824_v50 }
 0x2bd   : > { %v723_v6 = vmax.f32 %v711_v7, 0.0  ;;  %v713_v32 = vsub.f32 %v5091_v26, %v701_v37  ;;  %v1503_v14 = vsub.f32 %v5093_v31, %v4248_v40  ;;  %v1469_v37 = vsel %vm232_vm12, -1e+30, %v1455_v29 }
 0x2be   : > { %1864 = vrot.lane.b32.xlu0 %v4409_v15, %s2438_s5  ;;  %v1085_v15 = vsub.f32 %v5090_v19, %v1073_v59  ;;  %v1118_v42 = vsub.f32 %v1094_v11, %v1106_v38  ;;  %v1493_v38 = vmax.f32 %v1481_v45, %v1469_v37 }
 0x2bf   : > { %v1107_v2 = vmul.f32 %v1095_v36, %v723_v6  ;;  %v4503_v52 = vpop.permute.xlu0 %1408  ;;  %v725_v7 = vmax.f32 %v713_v32, 0.0  ;;  %v4507_v12 = vpop.permute.xlu1 %1402  ;;  %v1515_v59 = vmax.f32 %v1503_v14, 0.0 }
 0x2c0   : > { %v1130_v10 = vmax.f32 %v1118_v42, 0.0  ;;  %v5094_v42 = vld [vmem:[#allocation48_spill] sm:$0xff] }
 0x2c1   : > { %v1119_v47 = vsub.f32 %v1095_v36, %v1107_v2  ;;  %v1514_v36 = vmax.f32 %v1502_v62, 0.0  ;;  %v1505_v26 = vsub.f32 %v5094_v42, %v1493_v38 }
 0x2c2   : > { %1866 = vrot.lane.b32.xlu0 %v4400_v56, %s2438_s5  ;;  %v1097_v56 = vmax.f32 %v1085_v15, 0.0  ;;  %v1142_v9 = vadd.f32 %v1130_v10, %v722_v22 }
 0x2c3   : > { %v1131_v15 = vmax.f32 %v1119_v47, 0.0  ;;  %v4512_v2 = vpop.permute.xlu0 %1444  ;;  %v4514_v44 = vpop.permute.xlu1 %1438  ;;  %v1517_v14 = vmax.f32 %v1505_v26, 0.0 }
 0x2c4   : > { %v1109_v11 = vmul.f32 %v1097_v56, %v725_v7  ;;  %v1526_v40 = vmul.f32 %v1514_v36, %v1142_v9 }
 0x2c5   : > { %v1143_v32 = vadd.f32 %v1131_v15, %v723_v6 }
 0x2c6   : > { %v1121_v19 = vsub.f32 %v1097_v56, %v1109_v11  ;;  %v1538_v62 = vsub.f32 %v1514_v36, %v1526_v40 }
 0x2c7   : > { %v1527_v31 = vmul.f32 %v1515_v59, %v1143_v32 }
 0x2c8   : > { %v1133_v29 = vmax.f32 %v1121_v19, 0.0  ;;  %v1550_v45 = vmax.f32 %v1538_v62, 0.0 }
 0x2c9   : > { %v1539_v55 = vsub.f32 %v1515_v59, %v1527_v31 }
 0x2ca   : > { %v1145_v10 = vadd.f32 %v1133_v29, %v725_v7  ;;  %v1562_v7 = vadd.f32 %v1550_v45, %v1142_v9 }
 0x2cb   : > { %v1551_v38 = vmax.f32 %v1539_v55, 0.0 }
 0x2cc   : > { %v1529_v19 = vmul.f32 %v1517_v14, %v1145_v10 }
 0x2cd   : > { %v1563_v29 = vadd.f32 %v1551_v38, %v1143_v32  ;;  %v5095_v38 = vld [vmem:[#allocation11_spill] sm:$0xff] }
 0x2ce   : > { %v1541_v42 = vsub.f32 %v1517_v14, %v1529_v19  ;;  %v5096_v19 = vld [vmem:[#allocation73_spill] sm:$0xff] }
 0x2d6   : > { %v1833_v21 = vpop.permute.xlu0 %1832 }
 0x2d7   : > { %v1835_v47 = vpop.permute.xlu1 %1834  ;;  %v1850_v50 = vsel %vm229_vm11, -1e+30, %v1833_v21 }
 0x2d8   : > { %v1851_v22 = vsel %vm229_vm11, -1e+30, %v1835_v47  ;;  %v1898_v56 = vmax.f32 %v1850_v50, %v4194_v58 }
 0x2d9   : > { %v1899_v37 = vmax.f32 %v1851_v22, %v4200_v41 }
 0x2da   : > { %v1869_v6 = vpop.permute.xlu0 %1868 }
 0x2db   : > { %v1871_v15 = vpop.permute.xlu1 %1870  ;;  %v1886_v11 = vsel %vm232_vm12, -1e+30, %v1869_v6  ;;  %v1553_v6 = vmax.f32 %v1541_v42, 0.0 }
 0x2dc   : > { %v1887_v21 = vsel %vm232_vm12, -1e+30, %v1871_v15  ;;  %v1910_v36 = vmax.f32 %v1898_v56, %v1886_v11 }
 0x2dd   : > { %v1911_v40 = vmax.f32 %v1899_v37, %v1887_v21  ;;  %v1565_v21 = vadd.f32 %v1553_v6, %v1145_v10 }
 0x2de   : > { %v1922_v26 = vsub.f32 %v3651_v16, %v1910_v36 }
 0x2df   : > { %v1923_v58 = vsub.f32 %v3647_v51, %v1911_v40  ;;  %v1839_v59 = vpop.permute.xlu1 %1838  ;;  %v633_v40 = vsel %vm229_vm11, -1e+30, %v5096_v19  ;;  %v5105_v19 = vld [vmem:[#allocation55_spill] sm:$0xff] }
 0x2e0   : > { %v1934_v31 = vmax.f32 %v1922_v26, 0.0  ;;  %v1853_v41 = vsel %vm229_vm11, -1e+30, %v1839_v59 }
 0x2e1   : > { %v1935_v47 = vmax.f32 %v1923_v58, 0.0  ;;  %v1901_v22 = vmax.f32 %v1853_v41, %v4224_v28  ;;  %v5098_v41 = vld [vmem:[#allocation19_spill] sm:$0xff] }
 0x2e2   : > { %v1946_v50 = vmul.f32 %v1934_v31, %v1562_v7 }
 0x2e3   : > { %v1947_v62 = vmul.f32 %v1935_v47, %v1563_v29  ;;  %v1875_v55 = vpop.permute.xlu1 %1874 }
 0x2e4   : > { %v1958_v56 = vsub.f32 %v1934_v31, %v1946_v50  ;;  %v1889_v16 = vsel %vm232_vm12, -1e+30, %v1875_v55  ;;  %v5097_v31 = vld [vmem:[#allocation98_spill] sm:$0xff]  ;;  %v5101_v55 = vld [vmem:[#allocation56_spill] sm:$0xff] }
 0x2e5   : > { %v1959_v51 = vsub.f32 %v1935_v47, %v1947_v62  ;;  %v1913_v37 = vmax.f32 %v1901_v22, %v1889_v16  ;;  %v5100_v47 = vld [vmem:[#allocation21_spill] sm:$0xff]  ;;  %v5102_v16 = vld [vmem:[#allocation40_spill] sm:$0xff] }
 0x2e6   : > { %v1970_v9 = vmax.f32 %v1958_v56, 0.0  ;;  %v642_v56 = vsel %vm229_vm11, -1e+30, %v5101_v55  ;;  %v681_v6 = vmax.f32 %v633_v40, %v5102_v16 }
 0x2e7   : > { %v1971_v15 = vmax.f32 %v1959_v51, 0.0  ;;  %v1925_v11 = vsub.f32 %v3662_v34, %v1913_v37  ;;  %v4535_v45 = vpop.permute.xlu1 %1842  ;;  %v1014_v34 = vsel %vm229_vm11, -1e+30, %v5097_v31  ;;  %v5103_v51 = vld [vmem:[#allocation103_spill] sm:$0xff]  ;;  %v5107_v31 = vld [vmem:[#allocation33_spill] sm:$0xff] }
 0x2e8   : > { %v1982_v32 = vadd.f32 %v1970_v9, %v1562_v7  ;;  %v5099_v7 = vld [vmem:[#allocation79_spill] sm:$0xff]  ;;  %v1050_v37 = vsel %vm232_vm12, -1e+30, %v5103_v51  ;;  %v5104_v9 = vld [vmem:[#allocation66_spill] sm:$0xff] }
 0x2e9   : > { %v1983_v14 = vadd.f32 %v1971_v15, %v1563_v29  ;;  %v1937_v36 = vmax.f32 %v1925_v11, 0.0  ;;  %v669_v29 = vsel %vm232_vm12, -1e+30, %v5099_v7  ;;  %v1062_v15 = vmax.f32 %v1014_v34, %v5104_v9 }
 0x2ea   : > { %v1994_v28 = vmul.f32 %v5095_v38, %v1982_v32  ;;  %v690_v34 = vmax.f32 %v642_v56, %v5107_v31  ;;  %v5111_v56 = vld [vmem:[#allocation90_spill] sm:$0xff] }
 0x2eb   : > { %v1995_v26 = vmul.f32 %v5095_v38, %v1983_v14  ;;  %v1949_v58 = vmul.f32 %v1937_v36, %v1565_v21  ;;  %v1837_v59 = vpop.permute.xlu1 %1836 }
 0x2ec   : > { %v2030_v42 = vmul.f32 %v1994_v28, %v5098_v41  ;;  %v1852_v10 = vsel %vm229_vm11, -1e+30, %v1837_v59 }
 0x2ed   : > { %v2031_v50 = vmul.f32 %v1995_v26, %v5100_v47  ;;  %v4552_v62 = vadd.f32 %v1995_v26, %v1994_v28  ;;  %v1961_v22 = vsub.f32 %v1937_v36, %v1949_v58  ;;  %v1900_v14 = vmax.f32 %v1852_v10, %v4218_v24  ;;  %v5106_v26 = vld [vmem:[#allocation65_spill] sm:$0xff]  ;;  %v5108_v24 = vld [vmem:[#allocation34_spill] sm:$0xff] }
 0x2ee   : > { %v643_v36 = vsel %vm229_vm11, -1e+30, %v5105_v19  ;;  %v678_v40 = vsel %vm232_vm12, -1e+30, %v5106_v26  ;;  %v693_v58 = vmax.f32 %v681_v6, %v669_v29  ;;  %v1077_v10 = vsub.f32 %v5108_v24, %v4050_v3  ;;  %v5110_v6 = vld [vmem:[#allocation32_spill] sm:$0xff] }
 0x2ef   : > { %v4562_v11 = vadd.f32 %v2031_v50, %v2030_v42  ;;  %v1973_v32 = vmax.f32 %v1961_v22, 0.0  ;;  %v1873_v28 = vpop.permute.xlu1 %1872  ;;  %v1074_v42 = vmax.f32 %v1062_v15, %v1050_v37  ;;  %v5109_v22 = vld [vmem:[#allocation63_spill] sm:$0xff]  ;;  %v702_v16 = vmax.f32 %v690_v34, %v678_v40  ;;  %v5114_v40 = vld [vmem:[#allocation16_spill] sm:$0xff] }
 0x2f0   : > { %v1888_v59 = vsel %vm232_vm12, -1e+30, %v1873_v28  ;;  %v679_v55 = vsel %vm232_vm12, -1e+30, %v5109_v22  ;;  %v691_v9 = vmax.f32 %v643_v36, %v5110_v6  ;;  %v705_v28 = vsub.f32 %v5100_v47, %v693_v58  ;;  %v5112_v37 = vld [vmem:[#allocation27_spill] sm:$0xff]  ;;  %v5116_v58 = vld [vmem:[#allocation74_spill] sm:$0xff] }
 0x2f1   : > { %v1985_v7 = vadd.f32 %v1973_v32, %v1565_v21  ;;  %v1912_v50 = vmax.f32 %v1900_v14, %v1888_v59  ;;  %v1015_v21 = vsel %vm229_vm11, -1e+30, %v5111_v56  ;;  %v1086_v15 = vsub.f32 %v5112_v37, %v1074_v42  ;;  %v5113_v14 = vld [vmem:[#allocation100_spill] sm:$0xff] }
 0x2f2   : > { %v703_v32 = vmax.f32 %v691_v9, %v679_v55  ;;  %v1051_v19 = vsel %vm232_vm12, -1e+30, %v5113_v14  ;;  %v1089_v26 = vmax.f32 %v1077_v10, 0.0  ;;  %v714_v59 = vsub.f32 %v5114_v40, %v702_v16  ;;  %v5117_v16 = vld [vmem:[#allocation17_spill] sm:$0xff]  ;;  %v5118_v9 = vld [vmem:[#allocation80_spill] sm:$0xff] }
 0x2f3   : > { %v1997_v51 = vmul.f32 %v5095_v38, %v1985_v7  ;;  %v1924_v29 = vsub.f32 %v3665_v20, %v1912_v50  ;;  %v5115_v20 = vld [vmem:[#allocation64_spill] sm:$0xff]  ;;  %v1425_v47 = vsel %vm229_vm11, -1e+30, %v4507_v12  ;;  %v632_v34 = vsel %vm229_vm11, -1e+30, %v5116_v58 }
 0x2f4   : > { %v1063_v31 = vmax.f32 %v1015_v21, %v5115_v20  ;;  %v717_v42 = vmax.f32 %v705_v28, 0.0  ;;  %v1098_v50 = vmax.f32 %v1086_v15, 0.0  ;;  %v1461_v24 = vsel %vm232_vm12, -1e+30, %v4514_v44  ;;  %v5119_v21 = vld [vmem:[#allocation41_spill] sm:$0xff]  ;;  %v5120_v15 = vld [vmem:[#allocation76_spill] sm:$0xff] }
 0x2f5   : > { %v1936_v3 = vmax.f32 %v1924_v29, 0.0  ;;  %v1434_v55 = vsel %vm229_vm11, -1e+30, %v4420_v63  ;;  %v1473_v12 = vmax.f32 %v1425_v47, %v4092_v0  ;;  %v715_v29 = vsub.f32 %v5117_v16, %v703_v32  ;;  %v5121_v0 = vld [vmem:[#allocation28_spill] sm:$0xff] }
 0x2f6   : > { %v1075_v7 = vmax.f32 %v1063_v31, %v1051_v19  ;;  %v1101_v22 = vmul.f32 %v1089_v26, %v717_v42  ;;  %v726_v6 = vmax.f32 %v714_v59, 0.0  ;;  %v668_v28 = vsel %vm232_vm12, -1e+30, %v5118_v9  ;;  %v5123_v9 = vld [vmem:[#allocation78_spill] sm:$0xff] }
 0x2f7   : > { %v1948_v36 = vmul.f32 %v1936_v3, %v4279_v25  ;;  %v680_v37 = vmax.f32 %v632_v34, %v5119_v21  ;;  %v634_v44 = vsel %vm229_vm11, -1e+30, %v5120_v15  ;;  %v1470_v63 = vsel %vm232_vm12, -1e+30, %v4484_v60  ;;  %v5122_v34 = vld [vmem:[#allocation43_spill] sm:$0xff] }
 0x2f8   : > { %v1087_v14 = vsub.f32 %v5121_v0, %v1075_v7  ;;  %v1110_v32 = vmul.f32 %v1098_v50, %v726_v6  ;;  %v1482_v19 = vmax.f32 %v1434_v55, %v3981_v8  ;;  %v1113_v31 = vsub.f32 %v1089_v26, %v1101_v22  ;;  %v5125_v8 = vld [vmem:[#allocation68_spill] sm:$0xff]  ;;  %v5126_v26 = vld [vmem:[#allocation18_spill] sm:$0xff] }
 0x2f9   : > { %v1960_v10 = vsub.f32 %v1936_v3, %v1948_v36  ;;  %v1485_v3 = vmax.f32 %v1473_v12, %v1461_v24  ;;  %v692_v20 = vmax.f32 %v680_v37, %v668_v28  ;;  %v4620_v47 = vmax.f32 %v715_v29, 0.0  ;;  %v5124_v24 = vld [vmem:[#allocation82_spill] sm:$0xff] }
 0x2fa   : > { %v1494_v36 = vmax.f32 %v1482_v19, %v1470_v63  ;;  %v636_v60 = vsel %vm229_vm11, -1e+30, %v5123_v9  ;;  %v670_v7 = vsel %vm232_vm12, -1e+30, %v5124_v24  ;;  %v1122_v12 = vsub.f32 %v1098_v50, %v1110_v32 }
 0x2fb   : > { %v1972_v56 = vmax.f32 %v1960_v10, 0.0  ;;  %v682_v10 = vmax.f32 %v634_v44, %v5122_v34  ;;  %v1497_v55 = vsub.f32 %v5125_v8, %v1485_v3  ;;  %v704_v28 = vsub.f32 %v5098_v41, %v692_v20  ;;  %v5128_v44 = vld [vmem:[#allocation51_spill] sm:$0xff]  ;;  %v1841_v8 = vpop.permute.xlu1 %1840 }
 0x2fc   : > { %v1125_v37 = vmax.f32 %v1113_v31, 0.0  ;;  %v1435_v15 = vsel %vm229_vm11, -1e+30, %v4464_v33  ;;  %v1506_v63 = vsub.f32 %v5128_v44, %v1494_v36  ;;  %v2033_v3 = vmul.f32 %v1997_v51, %v5051_v35  ;;  %v5131_v31 = vld [vmem:[#allocation36_spill] sm:$0xff] }
 0x2fd   : > { %v1984_v59 = vadd.f32 %v1972_v56, %v4279_v25  ;;  %v1099_v25 = vmax.f32 %v1087_v14, 0.0  ;;  %v5127_v56 = vld [vmem:[#allocation35_spill] sm:$0xff]  ;;  %v694_v14 = vmax.f32 %v682_v10, %v670_v7  ;;  %v1509_v32 = vmax.f32 %v1497_v55, 0.0 }
 0x2fe   : > { %v1076_v21 = vsub.f32 %v5127_v56, %v4054_v18  ;;  %v1471_v18 = vsel %vm232_vm12, -1e+30, %v4495_v53  ;;  %v1134_v19 = vmax.f32 %v1122_v12, 0.0  ;;  %v1078_v36 = vsub.f32 %v5131_v31, %v4068_v5  ;;  %v5132_v5 = vld [vmem:[#allocation53_spill] sm:$0xff] }
 0x2ff   : > { %v1996_v58 = vmul.f32 %v5095_v38, %v1984_v59  ;;  %v1111_v33 = vmul.f32 %v1099_v25, %v4620_v47  ;;  %v1483_v59 = vmax.f32 %v1435_v15, %v4044_v4  ;;  %v1518_v34 = vmax.f32 %v1506_v63, 0.0 }
 0x300   : > { %v1088_v20 = vmax.f32 %v1076_v21, 0.0  ;;  %v716_v9 = vmax.f32 %v704_v28, 0.0  ;;  %v706_v53 = vsub.f32 %v5126_v26, %v694_v14  ;;  %v1146_v12 = vadd.f32 %v1134_v19, %v726_v6  ;;  %v5133_v28 = vld [vmem:[#allocation23_spill] sm:$0xff] }
 0x301   : > { %v2032_v22 = vmul.f32 %v1996_v58, %v5126_v26  ;;  %v2049_v29 = vadd.f32 %v4552_v62, %v1996_v58  ;;  %v5129_v62 = vld [vmem:[#allocation84_spill] sm:$0xff]  ;;  %v1137_v58 = vadd.f32 %v1125_v37, %v717_v42  ;;  %v1495_v10 = vmax.f32 %v1483_v59, %v1471_v18 }
 0x302   : > { %v672_v41 = vsel %vm232_vm12, -1e+30, %v5129_v62  ;;  %v1123_v55 = vsub.f32 %v1099_v25, %v1111_v33  ;;  %v1100_v4 = vmul.f32 %v1088_v20, %v716_v9  ;;  %v4664_v56 = vmax.f32 %v706_v53, 0.0  ;;  %v5135_v53 = vld [vmem:[#allocation67_spill] sm:$0xff] }
 0x303   : > { %v2037_v50 = vadd.f32 %v4562_v11, %v2032_v22  ;;  %v4642_v0 = vadd.f32 %v2049_v29, %v1997_v51  ;;  %v5130_v11 = vld [vmem:[#allocation45_spill] sm:$0xff]  ;;  %v1521_v7 = vmul.f32 %v1509_v32, %v1137_v58  ;;  %v4658_v22 = vmax.f32 %v1078_v36, 0.0 }
 0x304   : > { %v684_v51 = vmax.f32 %v636_v60, %v5130_v11  ;;  %v1424_v60 = vsel %vm229_vm11, -1e+30, %v4426_v39  ;;  %v1530_v29 = vmul.f32 %v1518_v34, %v1146_v12  ;;  %v1507_v42 = vsub.f32 %v5132_v5, %v1495_v10 }
 0x305   : > { %v4652_v35 = vadd.f32 %v2037_v50, %v2033_v3  ;;  %v1533_v26 = vsub.f32 %v1509_v32, %v1521_v7  ;;  %v1460_v25 = vsel %vm232_vm12, -1e+30, %v4480_v48  ;;  %v1135_v37 = vmax.f32 %v1123_v55, 0.0  ;;  %v5134_v3 = vld [vmem:[#allocation38_spill] sm:$0xff] }
 0x306   : > { %v696_v24 = vmax.f32 %v684_v51, %v672_v41  ;;  %v1472_v15 = vmax.f32 %v1424_v60, %v4102_v13  ;;  %v1112_v39 = vsub.f32 %v1088_v20, %v1100_v4  ;;  %v1102_v63 = vmul.f32 %v4658_v22, %v4664_v56 }
 0x307   : > { %v1080_v50 = vsub.f32 %v5134_v3, %v4087_v46  ;;  %v1542_v14 = vsub.f32 %v1518_v34, %v1530_v29  ;;  %v1519_v62 = vmax.f32 %v1507_v42, 0.0  ;;  %v1426_v48 = vsel %vm229_vm11, -1e+30, %v4459_v30  ;;  %v5137_v3 = vld [vmem:[#allocation111_spill] sm:$0xff] }
 0x308   : > { %v708_v21 = vsub.f32 %v5133_v28, %v696_v24  ;;  %v1484_v41 = vmax.f32 %v1472_v15, %v1460_v25  ;;  %v1545_v13 = vmax.f32 %v1533_v26, 0.0  ;;  %v1462_v32 = vsel %vm232_vm12, -1e+30, %v4492_v27  ;;  %v5136_v15 = vld [vmem:[#allocation87_spill] sm:$0xff] }
 0x309   : > { %v1147_v46 = vadd.f32 %v1135_v37, %v4620_v47  ;;  %v1854_v11 = vsel %vm229_vm11, -1e+30, %v1841_v8  ;;  %v1124_v20 = vmax.f32 %v1112_v39, 0.0  ;;  %v1114_v31 = vsub.f32 %v4658_v22, %v1102_v63 }
 0x30a   : > { %v4680_v18 = vmax.f32 %v708_v21, 0.0  ;;  %v1474_v27 = vmax.f32 %v1426_v48, %v4110_v61  ;;  %v1554_v34 = vmax.f32 %v1542_v14, 0.0  ;;  %v1496_v47 = vsub.f32 %v5135_v53, %v1484_v41 }
 0x30b   : > { %v1531_v10 = vmul.f32 %v1519_v62, %v1147_v46  ;;  %v1902_v7 = vmax.f32 %v1854_v11, %v4258_v57  ;;  %v1428_v22 = vsel %vm229_vm11, -1e+30, %v4503_v52  ;;  %v1557_v61 = vadd.f32 %v1545_v13, %v1137_v58  ;;  %v5139_v11 = vld [vmem:[#allocation94_spill] sm:$0xff] }
 0x30c   : > { %v1823_v6 = vpop.permute.xlu1 %1822  ;;  %v1486_v24 = vmax.f32 %v1474_v27, %v1462_v32  ;;  %v1855_v57 = vsel %vm229_vm11, -1e+30, %v4535_v45  ;;  %v4710_v25 = vadd.f32 %v1124_v20, %v716_v9  ;;  %v1566_v52 = vadd.f32 %v1554_v34, %v1146_v12  ;;  %v5138_v12 = vld [vmem:[#allocation69_spill] sm:$0xff] }
 0x30d   : > { %v1845_v44 = vsel %vm229_vm11, -1e+30, %v1823_v6  ;;  %v1543_v26 = vsub.f32 %v1519_v62, %v1531_v10  ;;  %v1464_v58 = vsel %vm232_vm12, -1e+30, %v4512_v2  ;;  %v1508_v63 = vmax.f32 %v1496_v47, 0.0  ;;  %v5140_v27 = vld [vmem:[#allocation85_spill] sm:$0xff] }
 0x30e   : > { %v1893_v33 = vmax.f32 %v1845_v44, %v4343_v23  ;;  %v1092_v23 = vmax.f32 %v1080_v50, 0.0  ;;  %v1476_v50 = vmax.f32 %v1428_v22, %v5137_v3  ;;  %v1903_v14 = vmax.f32 %v1855_v57, %v4256_v54 }
 0x30f   : > { %v1498_v62 = vsub.f32 %v5138_v12, %v1486_v24  ;;  %v1126_v13 = vmax.f32 %v1114_v31, 0.0  ;;  %v1520_v54 = vmul.f32 %v1508_v63, %v4710_v25  ;;  %v5141_v31 = vld [vmem:[#allocation72_spill] sm:$0xff] }
 0x310   : > { %v1827_v19 = vpop.permute.xlu0 %1826  ;;  %v1859_v59 = vpop.permute.xlu1 %1858  ;;  %v1104_v21 = vmul.f32 %v1092_v23, %v4680_v18  ;;  %v1488_v32 = vmax.f32 %v1476_v50, %v1464_v58 }
 0x311   : > { %v1847_v30 = vsel %vm229_vm11, -1e+30, %v1827_v19  ;;  %v1881_v51 = vsel %vm232_vm12, -1e+30, %v1859_v59  ;;  %v1510_v34 = vmax.f32 %v1498_v62, 0.0  ;;  %v1138_v24 = vadd.f32 %v1126_v13, %v4664_v56 }
 0x312   : > { %v1905_v36 = vmax.f32 %v1893_v33, %v1881_v51  ;;  %v1895_v8 = vmax.f32 %v1847_v30, %v4365_v17  ;;  %v1116_v19 = vsub.f32 %v1092_v23, %v1104_v21 }
 0x314   : > { %v1917_v55 = vsub.f32 %v3870_v49, %v1905_v36  ;;  %v1863_v4 = vpop.permute.xlu0 %1862  ;;  %v1877_v60 = vpop.permute.xlu1 %1876  ;;  %v1128_v23 = vmax.f32 %v1116_v19, 0.0 }
 0x315   : > { %v1883_v29 = vsel %vm232_vm12, -1e+30, %v1863_v4  ;;  %v1890_v5 = vsel %vm232_vm12, -1e+30, %v1877_v60 }
 0x316   : > { %v1929_v17 = vmax.f32 %v1917_v55, 0.0  ;;  %v1907_v42 = vmax.f32 %v1895_v8, %v1883_v29  ;;  %v1914_v49 = vmax.f32 %v1902_v7, %v1890_v5  ;;  %v1500_v7 = vsub.f32 %v5141_v31, %v1488_v32 }
 0x317   : > { %v1532_v5 = vsub.f32 %v1508_v63, %v1520_v54  ;;  %v5146_v54 = vld [vmem:[#allocation105_spill] sm:$0xff] }
 0x318   : > { %v1941_v6 = vmul.f32 %v1929_v17, %v1557_v61  ;;  %v1919_v37 = vsub.f32 %v5055_v43, %v1907_v42  ;;  %v1926_v44 = vsub.f32 %v5136_v15, %v1914_v49  ;;  %v4717_v39 = vpop.permute.xlu0 %1830  ;;  %v1879_v45 = vpop.permute.xlu1 %1878  ;;  %v1555_v43 = vmax.f32 %v1543_v26, 0.0 }
 0x319   : > { %v1891_v9 = vsel %vm232_vm12, -1e+30, %v1879_v45  ;;  %v1512_v49 = vmax.f32 %v1500_v7, 0.0 }
 0x31a   : > { %v1953_v48 = vsub.f32 %v1929_v17, %v1941_v6  ;;  %v1931_v2 = vmax.f32 %v1919_v37, 0.0  ;;  %v1938_v41 = vmax.f32 %v1926_v44, 0.0  ;;  %v1915_v33 = vmax.f32 %v1903_v14, %v1891_v9  ;;  %v5142_v6 = vld [vmem:[#allocation91_spill] sm:$0xff] }
 0x31b   : > { %v1567_v8 = vadd.f32 %v1555_v43, %v1147_v46  ;;  %v1522_v17 = vmul.f32 %v1510_v34, %v1138_v24  ;;  %v1140_v46 = vadd.f32 %v1128_v23, %v4680_v18  ;;  %v1544_v44 = vmax.f32 %v1532_v5, 0.0 }
 0x31c   : > { %v1965_v59 = vmax.f32 %v1953_v48, 0.0  ;;  %v1943_v30 = vmul.f32 %v1931_v2, %v5139_v11  ;;  %v1950_v51 = vmul.f32 %v1938_v41, %v1566_v52  ;;  %v1821_v20 = vpop.permute.xlu0 %1820  ;;  %v1927_v36 = vsub.f32 %v5140_v27, %v1915_v33  ;;  %v5143_v48 = vld [vmem:[#allocation92_spill] sm:$0xff] }
 0x31d   : > { %v1534_v3 = vsub.f32 %v1510_v34, %v1522_v17  ;;  %v1524_v9 = vmul.f32 %v1512_v49, %v1140_v46 }
 0x31e   : > { %v1977_v10 = vadd.f32 %v1965_v59, %v1557_v61  ;;  %v1955_v53 = vsub.f32 %v1931_v2, %v1943_v30  ;;  %v1962_v47 = vsub.f32 %v1938_v41, %v1950_v51  ;;  %v1939_v55 = vmax.f32 %v1927_v36, 0.0  ;;  %v5144_v41 = vld [vmem:[#allocation104_spill] sm:$0xff]  ;;  %v5145_v30 = vld [vmem:[#allocation22_spill] sm:$0xff] }
 0x31f   : > { %v1844_v61 = vsel %vm229_vm11, -1e+30, %v1821_v20  ;;  %v1546_v19 = vmax.f32 %v1534_v3, 0.0  ;;  %v5150_v3 = vld [vmem:[#allocation15_spill] sm:$0xff] }
 0x320   : > { %v4730_v4 = vmul.f32 %v5095_v38, %v1977_v10  ;;  %v1967_v60 = vmax.f32 %v1955_v53, 0.0  ;;  %v1974_v22 = vmax.f32 %v1962_v47, 0.0  ;;  %v1825_v29 = vpop.permute.xlu0 %1824  ;;  %v1951_v57 = vmul.f32 %v1939_v55, %v1567_v8 }
 0x321   : > { %v1892_v37 = vmax.f32 %v1844_v61, %v5142_v6  ;;  %v1846_v63 = vsel %vm229_vm11, -1e+30, %v1825_v29  ;;  %v1558_v31 = vadd.f32 %v1546_v19, %v1138_v24 }
 0x322   : > { %v1979_v42 = vadd.f32 %v1967_v60, %v5139_v11  ;;  %v1986_v56 = vadd.f32 %v1974_v22, %v1566_v52  ;;  %v1963_v21 = vsub.f32 %v1939_v55, %v1951_v57  ;;  %v1894_v2 = vmax.f32 %v1846_v63, %v5143_v48  ;;  %v5147_v22 = vld [vmem:[#allocation97_spill] sm:$0xff]  ;;  %v5149_v63 = vld [vmem:[#allocation107_spill] sm:$0xff] }
 0x323   : > { %v1536_v11 = vsub.f32 %v1512_v49, %v1524_v9  ;;  %v1849_v57 = vsel %vm229_vm11, -1e+30, %v4717_v39 }
 0x324   : > { %v4737_v26 = vmul.f32 %v5095_v38, %v1979_v42  ;;  %v1998_v58 = vmul.f32 %v5095_v38, %v1986_v56  ;;  %v1857_v15 = vpop.permute.xlu0 %1856  ;;  %v1975_v45 = vmax.f32 %v1963_v21, 0.0 }
 0x325   : > { %v1880_v52 = vsel %vm232_vm12, -1e+30, %v1857_v15 }
 0x326   : > { %v2034_v50 = vmul.f32 %v1998_v58, %v5133_v28  ;;  %v2051_v18 = vadd.f32 %v4642_v0, %v1998_v58  ;;  %v1904_v14 = vmax.f32 %v1892_v37, %v1880_v52  ;;  %v1987_v12 = vadd.f32 %v1975_v45, %v1567_v8  ;;  %v5148_v37 = vld [vmem:[#allocation96_spill] sm:$0xff] }
 0x327   : > { %v1556_v28 = vadd.f32 %v1544_v44, %v4710_v25  ;;  %v1548_v8 = vmax.f32 %v1536_v11, 0.0  ;;  %v1897_v15 = vmax.f32 %v1849_v57, %v5148_v37 }
 0x328   : > { %v2039_v62 = vadd.f32 %v4652_v35, %v2034_v50  ;;  %v1916_v13 = vsub.f32 %v5144_v41, %v1904_v14  ;;  %v1861_v43 = vpop.permute.xlu0 %1860  ;;  %v1999_v32 = vmul.f32 %v5095_v38, %v1987_v12  ;;  %v2001_v50 = vmul.f32 %v5150_v3, %v4730_v4  ;;  %v5151_v12 = vld [vmem:[#allocation14_spill] sm:$0xff] }
 0x329   : > { %v1882_v33 = vsel %vm232_vm12, -1e+30, %v1861_v43  ;;  %v1560_v6 = vadd.f32 %v1548_v8, %v1140_v46 }
 0x32a   : > { %v1928_v59 = vmax.f32 %v1916_v13, 0.0  ;;  %v1906_v0 = vmax.f32 %v1894_v2, %v1882_v33  ;;  %v2035_v51 = vmul.f32 %v1999_v32, %v5145_v30  ;;  %v2052_v20 = vadd.f32 %v2051_v18, %v1999_v32 }
 0x32c   : > { %v1940_v35 = vmul.f32 %v1928_v59, %v1556_v28  ;;  %v1918_v27 = vsub.f32 %v5146_v54, %v1906_v0  ;;  %v1829_v36 = vpop.permute.xlu0 %1828  ;;  %v2040_v34 = vadd.f32 %v2039_v62, %v2035_v51  ;;  %v2053_v10 = vrot.slane %v2052_v20, 4 }
 0x32d   : > { %v1848_v53 = vsel %vm229_vm11, -1e+30, %v1829_v36 }
 0x32e   : > { %v1952_v47 = vsub.f32 %v1928_v59, %v1940_v35  ;;  %v1930_v7 = vmax.f32 %v1918_v27, 0.0  ;;  %v2041_v25 = vrot.slane %v2040_v34, 4  ;;  %v2054_v55 = vadd.f32 %v2053_v10, %v2052_v20  ;;  %v5154_v20 = vld [vmem:[#allocation13_spill] sm:$0xff] }
 0x32f   : > { %v1896_v29 = vmax.f32 %v1848_v53, %v5147_v22  ;;  %v2003_v35 = vmul.f32 %v5154_v20, %v4737_v26 }
 0x330   : > { %v1964_v23 = vmax.f32 %v1952_v47, 0.0  ;;  %v1942_v60 = vmul.f32 %v1930_v7, %v1558_v31  ;;  %v1865_v5 = vpop.permute.xlu0 %1864  ;;  %v2042_v61 = vadd.f32 %v2041_v25, %v2040_v34  ;;  %v2055_v17 = vrot.slane %v2054_v55, 2  ;;  %v5155_v34 = vld [vmem:[#allocation95_spill] sm:$0xff] }
 0x331   : > { %v1884_v42 = vsel %vm232_vm12, -1e+30, %v1865_v5 }
 0x332   : > { %v1976_v24 = vadd.f32 %v1964_v23, %v1556_v28  ;;  %v1954_v56 = vsub.f32 %v1930_v7, %v1942_v60  ;;  %v1908_v49 = vmax.f32 %v1896_v29, %v1884_v42  ;;  %v2043_v21 = vrot.slane %v2042_v61, 2  ;;  %v5152_v28 = vld [vmem:[#allocation108_spill] sm:$0xff] }
 0x333   : > { %v2056_v58 = vadd.f32 %v2055_v17, %v2054_v55 }
 0x334   : > { %v1988_v44 = vmul.f32 %v5095_v38, %v1976_v24  ;;  %v1966_v45 = vmax.f32 %v1954_v56, 0.0  ;;  %v1920_v52 = vsub.f32 %v5149_v63, %v1908_v49  ;;  %v1867_v39 = vpop.permute.xlu0 %1866  ;;  %v2044_v18 = vadd.f32 %v2043_v21, %v2042_v61 }
 0x335   : > { %v2057_v14 = vrot.slane %v2056_v58, 1  ;;  %v1885_v9 = vsel %vm232_vm12, -1e+30, %v1867_v39 }
 0x336   : > { %v2000_v62 = vmul.f32 %v5151_v12, %v1988_v44  ;;  %v2018_v46 = vadd.f32 %v4730_v4, %v1988_v44  ;;  %v1978_v48 = vadd.f32 %v1966_v45, %v1558_v31  ;;  %v1932_v2 = vmax.f32 %v1920_v52, 0.0 }
 0x337   : > { %v2045_v41 = vrot.slane %v2044_v18, 1  ;;  %v2058_v13 = vadd.f32 %v2057_v14, %v2056_v58  ;;  %v1909_v43 = vmax.f32 %v1897_v15, %v1885_v9 }
 0x338   : > { %v2006_v32 = vadd.f32 %v2001_v50, %v2000_v62  ;;  %v1990_v33 = vmul.f32 %v5095_v38, %v1978_v48  ;;  %v1944_v19 = vmul.f32 %v1932_v2, %v1560_v6 }
 0x339   : > { %v1921_v59 = vsub.f32 %v5152_v28, %v1909_v43  ;;  %v2046_v0 = vadd.f32 %v2045_v41, %v2044_v18  ;;  %2059 = vst [vmem:[%s4776_s17 + $0x3] sm:$0x1] %v2058_v13 }
 0x33a   : > { %v2002_v11 = vmul.f32 %v5153_v1, %v1990_v33  ;;  %v2019_v4 = vadd.f32 %v2018_v46, %v1990_v33  ;;  %v1956_v30 = vsub.f32 %v1932_v2, %v1944_v19 }
 0x33b   : > { %v1933_v51 = vmax.f32 %v1921_v59, 0.0  ;;  %2047 = vst [vmem:[%s4776_s17 + $0x2] sm:$0x1] %v2046_v0 }
 0x33c   : > { %v2007_v54 = vadd.f32 %v2006_v32, %v2002_v11  ;;  %v1968_v27 = vmax.f32 %v1956_v30, 0.0  ;;  %v2020_v36 = vadd.f32 %v2019_v4, %v4737_v26 }
 0x33d   : > { %v1945_v10 = vmul.f32 %v1933_v51, %v5155_v34 }
 0x33e   : > { %v1980_v53 = vadd.f32 %v1968_v27, %v1560_v6  ;;  %v2008_v47 = vadd.f32 %v2007_v54, %v2003_v35 }
 0x33f   : > { %v1957_v31 = vsub.f32 %v1933_v51, %v1945_v10 }
 0x340   : > { %v1992_v7 = vmul.f32 %v5095_v38, %v1980_v53 }
 0x341   : > { %v1969_v8 = vmax.f32 %v1957_v31, 0.0 }
 0x342   : > { %v2004_v25 = vmul.f32 %v5114_v40, %v1992_v7  ;;  %v2021_v55 = vadd.f32 %v2020_v36, %v1992_v7 }
 0x343   : > { %v1981_v23 = vadd.f32 %v1969_v8, %v5155_v34 }
 0x344   : > { %v2009_v60 = vadd.f32 %v2008_v47, %v2004_v25 }
 0x345   : > { %v1993_v22 = vmul.f32 %v5095_v38, %v1981_v23 }
 0x347   : > { %v2005_v26 = vmul.f32 %v5117_v16, %v1993_v22  ;;  %v2022_v29 = vadd.f32 %v2021_v55, %v1993_v22 }
 0x349   : > { %v2010_v5 = vadd.f32 %v2009_v60, %v2005_v26  ;;  %v2023_v57 = vrot.slane %v2022_v29, 4 }
 0x34b   : > { %v2011_v61 = vrot.slane %v2010_v5, 4  ;;  %v2024_v17 = vadd.f32 %v2023_v57, %v2022_v29 }
 0x34d   : > { %v2012_v42 = vadd.f32 %v2011_v61, %v2010_v5  ;;  %v2025_v40 = vrot.slane %v2024_v17, 2 }
 0x34f   : > { %v2013_v24 = vrot.slane %v2012_v42, 2  ;;  %v2026_v56 = vadd.f32 %v2025_v40, %v2024_v17 }
 0x351   : > { %v2014_v49 = vadd.f32 %v2013_v24, %v2012_v42  ;;  %v2027_v21 = vrot.slane %v2026_v56, 1 }
 0x353   : > { %v2015_v38 = vrot.slane %v2014_v49, 1  ;;  %v2028_v58 = vadd.f32 %v2027_v21, %v2026_v56 }
 0x355   : > { %v2016_v16 = vadd.f32 %v2015_v38, %v2014_v49  ;;  %2029 = vst [vmem:[%s4776_s17 + $0x1] sm:$0x1] %v2028_v58 }
 0x357   : > { %2017 = vst [vmem:[%s4776_s17] sm:$0x1] %v2016_v16 }
 0x358   : > { %2373 = shalt.err (!%p2370_p11)
}
 0x359   : > { %s2374_s30 = scalar_lea.hbm %s4796_s6, 64  ;;  %s2378_s23 = scalar_lea.hbm %s4843_s2, 128 }
 0x35a   : > { %p2375_p3 = scmp.ne.s32.totalorder %s4796_s6, %s2374_s30  ;;  %p2379_p2 = scmp.lt.u32.totalorder %s4796_s6, %s4843_s2 }
 0x35b   : > { %p2380_p4 = scmp.lt.u32.totalorder %s2378_s23, %s2374_s30  ;;  %p2382_p13 = scmp.lt.u32.totalorder %s2374_s30, %s4796_s6 }
 0x35c   : > { %p2376_p8 = pnand %p2375_p3, %p5156_p1 }
 0x35d   : > { %p2381_p6 = por %p2380_p4, %p2379_p2 }
 0x35e   : > { %p2377_p0 = pneg %p2376_p8 }
 0x35f   : > { %p2383_p12 = por %p2382_p13, %p2381_p6 }
 0x361   : > { %p2384_p10 = pnand %p2383_p12, %p2377_p0 }
 0x363   : > { %2387 = shalt.err (!%p2384_p10)
}
 0x364   : > { %2198 = dma.vmem_to_hbm [thread:$0]  (%p5156_p1), %s4798_s24, 64, %s4796_s6, %s2061_s7  }
 0x365 PF: > { %s2086_s20 = sand.u32 1, %s2418_s9   ;;  %p5157_p5 = scmp.ne.s32.totalorder %s4932_s22, 0 }
 0x366   : > { %p5158_p7 = scmp.ge.s32.totalorder %s2430_s12, 2  ;;  %s2087_s5 = scalar_lea.sflag [#allocation4], %s2086_s20 }
 0x368   : > { %p2208_p9 = pnand %p5158_p7, %p5157_p5 }
 0x36a   : > { %2413 = dma.done.wait (!%p2208_p9), %s2087_s5, 64  }
 0x36b   : > { %2415 = vsyncadd (!%p2208_p9), %s2087_s5, 4294967232  ;;  %p18_p11 = scmp.ge.s32.totalorder %s2480_s15, 4   ;;  %s5159_s9 = smov %s2422_s10 }
 0x36c   : > { %s5160_s10 = smov %s2426_s11  ;;  %s5161_s11 = smov %s2492_s18 }
 0x36d   : > { %s5162_s12 = smov %s2480_s15  ;;  %20 = sbr.rel (!%p18_p11) target bundleno = 7 (0x7), region = 86 }
 0x374   :  { %2092 = vsyncpa [#allocation3], 1 }
 0x375   :  { %2094 = vsyncpa [#allocation3 + $0x1], 1 }
 0x376   :  { %2095 = vsyncpa [#allocation6], 1 }
 0x377   :  { %2097 = vsyncpa [#allocation6 + $0x1], 1 }
 0x378   :  { %2098 = vsyncpa [#allocation4], 1 }
 0x379   :  { %2100 = vsyncpa [#allocation4 + $0x1], 1 }

</bundles_post_ra>
